<compile_context>
chip_gen: v6e
topology: v6e:2x2x1
jax: 0.10.0
libtpu: 0.0.40
codegen_flags: <defaults>
</compile_context>

<pallas_src>
import functools

import numpy as np
import jax
import jax.numpy as jnp
from jax import lax
from jax.experimental import pallas as pl
from jax.experimental.pallas import tpu as pltpu

_LANE = 128
_TAPS = [(kh, kw) for kh in range(3) for kw in range(3)]


def _round_up(x, m):
    return ((x + m - 1) // m) * m


# ---------------------------------------------------------------------------
# Fused Pallas kernel: K-packed conv1 -> band-scatter -> K-packed conv2 -> pool -> linear
# ---------------------------------------------------------------------------

def _fused_basenet_kernel(p1_ref, w1_ref, w2_ref, pm_ref, wl_ref, bl_ref,
                          o_ref, pk_scr, *, NB, R2, R_pk, B, W2, C1,
                          bias_col, inv_hw):
    f32, bf16 = jnp.float32, jnp.bfloat16

    # Rebuild the static structure of the conv2 packed LHS every step: zeros everywhere
    # (spatial halo + unused lanes) and a ones column at `bias_col` so conv2's bias rides
    # inside its single matmul.  One cheap pass; keeps the batch grid axis free of
    # cross-step scratch dependencies (safe with "parallel" / megacore sharding).
    lane = lax.broadcasted_iota(jnp.int32, pk_scr.shape, 1)
    pk_scr[...] = jnp.where(lane == bias_col, 1.0, 0.0).astype(pk_scr.dtype)

    # ---- block1: ONE K-packed MXU matmul for the whole batch block.
    # LHS rows already carry the 9 shifted taps (+ ones column for the bias); wrap rows
    # were zeroed in the wrapper, so relu(0)=0 there and no mask / bias pass is needed.
    # The weight replicates the C1 outputs into 9 lane-bands for the scatter below.
    y1 = jnp.maximum(
        jnp.dot(p1_ref[...], w1_ref[...], preferred_element_type=f32), 0.0)

    # ---- scatter y1 into the 9 lane-bands of the conv2 packed LHS with shifted row
    # slices (static offsets, lane-aligned bands -> plain masked stores, no rotation).
    for b in range(NB):
        s0 = b * R2
        for t, (kh, kw) in enumerate(_TAPS):
            d = (kh - 1) * W2 + (kw - 1)
            d0 = b * R_pk + B - d
            lo = t * C1
            pk_scr[d0:d0 + R2, lo:lo + C1] = y1[s0:s0 + R2, lo:lo + C1]

    # ---- block2 (one matmul per image) + masked MXU row-sum pooling, bf16 operands.
    w2 = w2_ref[...]
    pm = pm_ref[...]
    pooled = []
    for b in range(NB):
        r0 = b * R_pk + B
        seg = pk_scr[r0:r0 + R2, :].astype(bf16)
        y2 = jnp.maximum(jnp.dot(seg, w2, preferred_element_type=f32), 0.0)
        pooled.append(jnp.dot(pm, y2.astype(bf16), preferred_element_type=f32))
    pooled = jnp.concatenate(pooled, axis=0) * inv_hw                 # (NB, 128) f32

    # ---- classifier; lane-dense (NB, 128) store, valid columns sliced in the wrapper.
    logits = jnp.dot(pooled.astype(bf16), wl_ref[...],
                     preferred_element_type=f32) + bl_ref[...]
    o_ref[...] = logits.astype(o_ref.dtype)


@functools.partial(jax.jit, static_argnames=("num_classes", "c1"))
def basenet_forward(x_nchw, kparams, *, num_classes, c1):
    N, Cin, H, W = x_nchw.shape
    assert 9 * Cin + 1 <= _LANE and 9 * c1 + 1 <= _LANE and num_classes <= _LANE

    W2 = _round_up(W + 2, 8)            # padded row stride (wrap columns masked out)
    R2 = H * W2                         # flattened rows per image
    B = _round_up(W2 + 1, 16)           # halo rows above/below each image segment
    R_pk = R2 + 2 * B                   # conv2 packed-LHS rows per image
    K1 = 9 * Cin + 1                    # conv1 contraction: 9 taps * Cin + ones column

    NB = min(N, 8)                      # images per grid step (stacked along matmul M)
    Npad = _round_up(N, NB)
    NBLK = Npad // NB

    # NCHW -> NHWC, bf16, zero pad: 1-pixel conv halo + slack out to W2+2 columns.
    x = jnp.transpose(x_nchw, (0, 2, 3, 1)).astype(jnp.bfloat16)
    if Npad != N:
        x = jnp.pad(x, ((0, Npad - N), (0, 0), (0, 0), (0, 0)))
    xz = jnp.pad(x, ((0, 0), (1, 1), (1, W2 + 1 - W), (0, 0)))   # (Npad, H+2, W2+2, Cin)

    # K-packed conv1 LHS: row p = i*W2+j holds the 9 shifted taps plus a ones column
    # (bias); wrap columns j >= W are zeroed so conv1's output is exactly 0 there.
    taps = [xz[:, kh:kh + H, kw:kw + W2, :] for kh, kw in _TAPS]
    p1 = jnp.stack(taps, axis=3).reshape(Npad, R2, 9 * Cin)
    p1 = jnp.concatenate([p1, jnp.ones((Npad, R2, 1), jnp.bfloat16)], axis=2)
    colmask = (np.arange(R2) % W2 < W).astype(np.float32)        # trace-time constant
    p1 = p1 * jnp.asarray(colmask, jnp.bfloat16)[None, :, None]
    p1 = jnp.pad(p1, ((0, 0), (0, 0), (0, _LANE - K1)))
    p1 = p1.reshape(NBLK, NB * R2, _LANE)

    # Pooling mask (shared by every image) as a lane-dense bf16 MXU operand.
    pm = jnp.asarray(colmask, jnp.bfloat16)[None, :]             # (1, R2), exact 0/1

    kernel = functools.partial(
        _fused_basenet_kernel, NB=NB, R2=R2, R_pk=R_pk, B=B, W2=W2, C1=c1,
        bias_col=9 * c1, inv_hw=1.0 / float(H * W))

    flops = NBLK * (4 * NB * R2 * _LANE * _LANE      # conv1 + conv2 matmuls
                    + 2 * NB * R2 * _LANE            # pooling row-sum
                    + 2 * NB * _LANE * _LANE)        # classifier
    bytes_accessed = (p1.size * 2 + pm.size * 2 + 3 * _LANE * _LANE * 2
                      + _LANE * 4 + NBLK * NB * _LANE * 4)

    # TODO(synk): for large H*W add a row-tile grid axis (with a 2-row halo in the
    # index_map) so a single image block never exceeds v7x's 64 MiB per-core VMEM.
    out = pl.pallas_call(
        kernel,
        out_shape=jax.ShapeDtypeStruct((NBLK, NB, _LANE), jnp.float32),
        grid=(NBLK,),
        in_specs=[
            pl.BlockSpec((None, NB * R2, _LANE), lambda s: (s, 0, 0)),  # packed pixels
            pl.BlockSpec((_LANE, _LANE), lambda s: (0, 0)),             # conv1 packed W
            pl.BlockSpec((_LANE, _LANE), lambda s: (0, 0)),             # conv2 packed W
            pl.BlockSpec((1, R2), lambda s: (0, 0)),                    # pooling mask
            pl.BlockSpec((_LANE, _LANE), lambda s: (0, 0)),             # classifier W
            pl.BlockSpec((1, _LANE), lambda s: (0, 0)),                 # classifier b
        ],
        out_specs=pl.BlockSpec((None, NB, _LANE), lambda s: (s, 0, 0)),
        scratch_shapes=[pltpu.VMEM((NB * R_pk, _LANE), jnp.float32)],   # conv2 packed LHS
        compiler_params=pltpu.CompilerParams(
            dimension_semantics=("parallel",),          # batch-block axis -> megacore
            vmem_limit_bytes=32 * 1024 * 1024),
        cost_estimate=pl.CostEstimate(flops=flops, transcendentals=0,
                                      bytes_accessed=bytes_accessed),
    )(p1, kparams["w1"], kparams["w2"], pm, kparams["wl"], kparams["bl"])
    return out.reshape(Npad, _LANE)[:N, :num_classes]


# ---------------------------------------------------------------------------
# Plain-JAX reference (same precision policy); also serves the return_feature path
# ---------------------------------------------------------------------------

def reference_forward(x_nchw, w1, b1, w2, b2, wl, bl, return_feature=None):
    bf16, f32 = jnp.bfloat16, jnp.float32
    dn = ("NCHW", "OIHW", "NCHW")
    h = x_nchw
    for name, (w, b) in (("block1", (w1, b1)), ("block2", (w2, b2))):
        h = lax.conv_general_dilated(h.astype(bf16), w.astype(bf16), (1, 1),
                                     ((1, 1), (1, 1)), dimension_numbers=dn,
                                     preferred_element_type=f32)
        h = jnp.maximum(h + b[None, :, None, None], 0.0)
        if return_feature == name:
            return h
    pooled = jnp.mean(h, axis=(2, 3))
    return jnp.dot(pooled.astype(bf16), wl.astype(bf16),
                   preferred_element_type=f32) + bl[None, :]


# ---------------------------------------------------------------------------
# Concrete BaseNet (method='BP')
# ---------------------------------------------------------------------------

class BaseNetPallas:
    """block1/block2 = Conv2d(3x3, pad=1) + ReLU; then adaptive_avg_pool2d(.,1) + Linear.
    The hot path (return_feature=None) runs as one fused Pallas TPU kernel."""

    method = "BP"
    module_list = ["block1", "block2"]

    def __init__(self, key, in_ch=4, c1=8, c2=16, num_classes=10):
        k1, k2, k3, k4, k5, k6 = jax.random.split(key, 6)
        s = 0.1
        self.num_classes = num_classes
        self.w1 = (s * jax.random.normal(k1, (c1, in_ch, 3, 3))).astype(jnp.float32)
        self.b1 = (s * jax.random.normal(k2, (c1,))).astype(jnp.float32)
        self.w2 = (s * jax.random.normal(k3, (c2, c1, 3, 3))).astype(jnp.float32)
        self.b2 = (s * jax.random.normal(k4, (c2,))).astype(jnp.float32)
        self.wl = (s * jax.random.normal(k5, (c2, num_classes))).astype(jnp.float32)
        self.bl = (s * jax.random.normal(k6, (num_classes,))).astype(jnp.float32)
        self.kparams = self._pack_params()

    def _pack_params(self):
        c1, cin = self.w1.shape[0], self.w1.shape[1]
        c2, nc = self.w2.shape[0], self.wl.shape[1]
        assert 9 * cin + 1 <= _LANE and 9 * c1 + 1 <= _LANE and c2 <= _LANE and nc <= _LANE
        bf16, f32 = jnp.bfloat16, jnp.float32

        # conv1: (O,I,3,3) -> K-packed [(kh*3+kw)*Cin + ci, C1]; outputs replicated into
        # the 9 lane-bands used by the conv2 LHS packing; bias folded in as a K row.
        w1t = jnp.transpose(self.w1, (2, 3, 1, 0)).reshape(9 * cin, c1)
        w1p = jnp.concatenate([jnp.tile(w1t, (1, 9)),
                               jnp.tile(self.b1[None, :], (1, 9))], axis=0)
        w1p = jnp.pad(w1p, ((0, _LANE - 9 * cin - 1), (0, _LANE - 9 * c1)))

        # conv2: K-packed [(kh*3+kw)*C1 + c, C2]; bias as K row 9*C1 (the ones column).
        w2t = jnp.transpose(self.w2, (2, 3, 1, 0)).reshape(9 * c1, c2)
        w2p = jnp.concatenate([w2t, self.b2[None, :]], axis=0)
        w2p = jnp.pad(w2p, ((0, _LANE - 9 * c1 - 1), (0, _LANE - c2)))

        wlp = jnp.pad(self.wl, ((0, _LANE - c2), (0, _LANE - nc)))
        blp = jnp.pad(self.bl[None, :], ((0, 0), (0, _LANE - nc)))
        return {"w1": w1p.astype(bf16), "w2": w2p.astype(bf16),
                "wl": wlp.astype(bf16), "bl": blp.astype(f32)}

    def __call__(self, x, return_feature=None):
        if self.method != "BP":
            # TODO(synk): forward_F (per-block loss / DCL path) depends on per-block loss
            # modules the abstract base never defines; only forward_BP is implemented.
            raise NotImplementedError("only method='BP' is implemented")
        if return_feature is not None:
            # Debug / feature-extraction path (returns an intermediate NCHW block output);
            # not performance critical, so it stays in plain JAX.
            return reference_forward(x, self.w1, self.b1, self.w2, self.b2,
                                     self.wl, self.bl, return_feature=return_feature)
        return basenet_forward(x, self.kparams, num_classes=self.num_classes,
                               c1=self.w1.shape[0])


# ---------------------------------------------------------------------------
# Main
# ---------------------------------------------------------------------------

if __name__ == "__main__":
    key = jax.random.PRNGKey(0)
    kx, kp = jax.random.split(key)
    x = jax.random.normal(kx, (2, 4, 16, 16), dtype=jnp.float32)   # NCHW input

    model = BaseNetPallas(kp, in_ch=4, c1=8, c2=16, num_classes=10)
    logits = model(x)
    jax.block_until_ready(logits)

    assert logits.shape == (2, 10), logits.shape
    assert bool(jnp.all(jnp.isfinite(logits)))

    # Correctness check against a plain-JAX reference with the same precision policy.
    ref = reference_forward(x, model.w1, model.b1, model.w2, model.b2, model.wl, model.bl)
    assert jnp.allclose(logits, ref, rtol=2e-2, atol=2e-2), (logits, ref)

    print("KERNEL_OK")
</pallas_src>

<mosaic_0001>
module attributes {stable_mosaic.version = 11 : i64} {
  func.func @_fused_basenet_kernel(%arg0: i32, %arg1: memref<1x768x128xbf16, #tpu.memory_space<vmem>>, %arg2: memref<128x128xbf16, #tpu.memory_space<vmem>>, %arg3: memref<128x128xbf16, #tpu.memory_space<vmem>>, %arg4: memref<1x384xbf16, #tpu.memory_space<vmem>>, %arg5: memref<128x128xbf16, #tpu.memory_space<vmem>>, %arg6: memref<1x128xf32, #tpu.memory_space<vmem>>, %arg7: memref<1x2x128xf32, #tpu.memory_space<vmem>>, %arg8: memref<896x128xf32, #tpu.memory_space<vmem>>) attributes {dimension_semantics = [#tpu.dimension_semantics<parallel>], iteration_bounds = array<i64: 1>, scalar_prefetch = 0 : i64, scratch_operands = 1 : i64, tpu.core_type = #tpu.core_type<tc>, window_params = [{transform_indices = @transform_0, window_bounds = array<i64: 1, 768, 128>}, {pipeline_mode = #tpu.pipeline_mode<synchronous>, transform_indices = @transform_1, window_bounds = array<i64: 128, 128>}, {pipeline_mode = #tpu.pipeline_mode<synchronous>, transform_indices = @transform_2, window_bounds = array<i64: 128, 128>}, {pipeline_mode = #tpu.pipeline_mode<synchronous>, transform_indices = @transform_3, window_bounds = array<i64: 1, 384>}, {pipeline_mode = #tpu.pipeline_mode<synchronous>, transform_indices = @transform_4, window_bounds = array<i64: 128, 128>}, {pipeline_mode = #tpu.pipeline_mode<synchronous>, transform_indices = @transform_5, window_bounds = array<i64: 1, 128>}, {transform_indices = @transform_6, window_bounds = array<i64: 1, 2, 128>}]} {
    %0 = tpu.iota {dimensions = array<i32: 1>} : vector<896x128xi32>
    %c72_i32 = arith.constant 72 : i32
    %1 = vector.broadcast %c72_i32 : i32 to vector<896x128xi32>
    %2 = arith.cmpi eq, %0, %1 : vector<896x128xi32>
    %cst = arith.constant 1.000000e+00 : f32
    %cst_0 = arith.constant 0.000000e+00 : f32
    %3 = vector.broadcast %cst : f32 to vector<896x128xf32>
    %4 = vector.broadcast %cst_0 : f32 to vector<896x128xf32>
    %5 = arith.select %2, %3, %4 : vector<896x128xi1>, vector<896x128xf32>
    %c0 = arith.constant 0 : index
    %c0_1 = arith.constant 0 : index
    %6 = vector.load %arg8[%c0, %c0_1] : memref<896x128xf32, #tpu.memory_space<vmem>>, vector<896x128xf32>
    tpu.vector_store %arg8[%c0, %c0_1], %5 {strides = array<i32>} : memref<896x128xf32, #tpu.memory_space<vmem>>, vector<896x128xf32>,
    %c0_2 = arith.constant 0 : index
    %c0_3 = arith.constant 0 : index
    %c0_4 = arith.constant 0 : index
    %7 = vector.load %arg1[%c0_2, %c0_3, %c0_4] : memref<1x768x128xbf16, #tpu.memory_space<vmem>>, vector<1x768x128xbf16>
    %8 = vector.shape_cast %7 : vector<1x768x128xbf16> to vector<768x128xbf16>
    %c0_5 = arith.constant 0 : index
    %c0_6 = arith.constant 0 : index
    %9 = vector.load %arg2[%c0_5, %c0_6] : memref<128x128xbf16, #tpu.memory_space<vmem>>, vector<128x128xbf16>
    %cst_7 = arith.constant dense<0.000000e+00> : vector<768x128xf32>
    %10 = tpu.matmul %8, %9, %cst_7 {dimension_numbers = #tpu.dot_dimension_numbers<[1], [0], [0], [1], [0, 0, 1, 1], [], []>} : vector<768x128xbf16>, vector<128x128xbf16>, vector<768x128xf32> -> vector<768x128xf32>
    %cst_8 = arith.constant 0.000000e+00 : f32
    %11 = vector.broadcast %cst_8 : f32 to vector<768x128xf32>
    %12 = arith.maximumf %10, %11 : vector<768x128xf32>
    %13 = vector.extract_strided_slice %12 {offsets = [0, 0], sizes = [384, 8], strides = [1, 1]} : vector<768x128xf32> to vector<384x8xf32>
    %c57 = arith.constant 57 : index
    %c0_9 = arith.constant 0 : index
    %14 = vector.load %arg8[%c57, %c0_9] : memref<896x128xf32, #tpu.memory_space<vmem>>, vector<384x8xf32>
    tpu.vector_store %arg8[%c57, %c0_9], %13 {strides = array<i32>} : memref<896x128xf32, #tpu.memory_space<vmem>>, vector<384x8xf32>,
    %15 = vector.extract_strided_slice %12 {offsets = [0, 8], sizes = [384, 8], strides = [1, 1]} : vector<768x128xf32> to vector<384x8xf32>
    %c56 = arith.constant 56 : index
    %c8 = arith.constant 8 : index
    %16 = vector.load %arg8[%c56, %c8] : memref<896x128xf32, #tpu.memory_space<vmem>>, vector<384x8xf32>
    tpu.vector_store %arg8[%c56, %c8], %15 {strides = array<i32>} : memref<896x128xf32, #tpu.memory_space<vmem>>, vector<384x8xf32>,
    %17 = vector.extract_strided_slice %12 {offsets = [0, 16], sizes = [384, 8], strides = [1, 1]} : vector<768x128xf32> to vector<384x8xf32>
    %c55 = arith.constant 55 : index
    %c16 = arith.constant 16 : index
    %18 = vector.load %arg8[%c55, %c16] : memref<896x128xf32, #tpu.memory_space<vmem>>, vector<384x8xf32>
    tpu.vector_store %arg8[%c55, %c16], %17 {strides = array<i32>} : memref<896x128xf32, #tpu.memory_space<vmem>>, vector<384x8xf32>,
    %19 = vector.extract_strided_slice %12 {offsets = [0, 24], sizes = [384, 8], strides = [1, 1]} : vector<768x128xf32> to vector<384x8xf32>
    %c33 = arith.constant 33 : index
    %c24 = arith.constant 24 : index
    %20 = vector.load %arg8[%c33, %c24] : memref<896x128xf32, #tpu.memory_space<vmem>>, vector<384x8xf32>
    tpu.vector_store %arg8[%c33, %c24], %19 {strides = array<i32>} : memref<896x128xf32, #tpu.memory_space<vmem>>, vector<384x8xf32>,
    %21 = vector.extract_strided_slice %12 {offsets = [0, 32], sizes = [384, 8], strides = [1, 1]} : vector<768x128xf32> to vector<384x8xf32>
    %c32 = arith.constant 32 : index
    %c32_10 = arith.constant 32 : index
    %22 = vector.load %arg8[%c32, %c32_10] : memref<896x128xf32, #tpu.memory_space<vmem>>, vector<384x8xf32>
    tpu.vector_store %arg8[%c32, %c32_10], %21 {strides = array<i32>} : memref<896x128xf32, #tpu.memory_space<vmem>>, vector<384x8xf32>,
    %23 = vector.extract_strided_slice %12 {offsets = [0, 40], sizes = [384, 8], strides = [1, 1]} : vector<768x128xf32> to vector<384x8xf32>
    %c31 = arith.constant 31 : index
    %c40 = arith.constant 40 : index
    %24 = vector.load %arg8[%c31, %c40] : memref<896x128xf32, #tpu.memory_space<vmem>>, vector<384x8xf32>
    tpu.vector_store %arg8[%c31, %c40], %23 {strides = array<i32>} : memref<896x128xf32, #tpu.memory_space<vmem>>, vector<384x8xf32>,
    %25 = vector.extract_strided_slice %12 {offsets = [0, 48], sizes = [384, 8], strides = [1, 1]} : vector<768x128xf32> to vector<384x8xf32>
    %c9 = arith.constant 9 : index
    %c48 = arith.constant 48 : index
    %26 = vector.load %arg8[%c9, %c48] : memref<896x128xf32, #tpu.memory_space<vmem>>, vector<384x8xf32>
    tpu.vector_store %arg8[%c9, %c48], %25 {strides = array<i32>} : memref<896x128xf32, #tpu.memory_space<vmem>>, vector<384x8xf32>,
    %27 = vector.extract_strided_slice %12 {offsets = [0, 56], sizes = [384, 8], strides = [1, 1]} : vector<768x128xf32> to vector<384x8xf32>
    %c8_11 = arith.constant 8 : index
    %c56_12 = arith.constant 56 : index
    %28 = vector.load %arg8[%c8_11, %c56_12] : memref<896x128xf32, #tpu.memory_space<vmem>>, vector<384x8xf32>
    tpu.vector_store %arg8[%c8_11, %c56_12], %27 {strides = array<i32>} : memref<896x128xf32, #tpu.memory_space<vmem>>, vector<384x8xf32>,
    %29 = vector.extract_strided_slice %12 {offsets = [0, 64], sizes = [384, 8], strides = [1, 1]} : vector<768x128xf32> to vector<384x8xf32>
    %c7 = arith.constant 7 : index
    %c64 = arith.constant 64 : index
    %30 = vector.load %arg8[%c7, %c64] : memref<896x128xf32, #tpu.memory_space<vmem>>, vector<384x8xf32>
    tpu.vector_store %arg8[%c7, %c64], %29 {strides = array<i32>} : memref<896x128xf32, #tpu.memory_space<vmem>>, vector<384x8xf32>,
    %31 = vector.extract_strided_slice %12 {offsets = [384, 0], sizes = [384, 8], strides = [1, 1]} : vector<768x128xf32> to vector<384x8xf32>
    %c505 = arith.constant 505 : index
    %c0_13 = arith.constant 0 : index
    %32 = vector.load %arg8[%c505, %c0_13] : memref<896x128xf32, #tpu.memory_space<vmem>>, vector<384x8xf32>
    tpu.vector_store %arg8[%c505, %c0_13], %31 {strides = array<i32>} : memref<896x128xf32, #tpu.memory_space<vmem>>, vector<384x8xf32>,
    %33 = vector.extract_strided_slice %12 {offsets = [384, 8], sizes = [384, 8], strides = [1, 1]} : vector<768x128xf32> to vector<384x8xf32>
    %c504 = arith.constant 504 : index
    %c8_14 = arith.constant 8 : index
    %34 = vector.load %arg8[%c504, %c8_14] : memref<896x128xf32, #tpu.memory_space<vmem>>, vector<384x8xf32>
    tpu.vector_store %arg8[%c504, %c8_14], %33 {strides = array<i32>} : memref<896x128xf32, #tpu.memory_space<vmem>>, vector<384x8xf32>,
    %35 = vector.extract_strided_slice %12 {offsets = [384, 16], sizes = [384, 8], strides = [1, 1]} : vector<768x128xf32> to vector<384x8xf32>
    %c503 = arith.constant 503 : index
    %c16_15 = arith.constant 16 : index
    %36 = vector.load %arg8[%c503, %c16_15] : memref<896x128xf32, #tpu.memory_space<vmem>>, vector<384x8xf32>
    tpu.vector_store %arg8[%c503, %c16_15], %35 {strides = array<i32>} : memref<896x128xf32, #tpu.memory_space<vmem>>, vector<384x8xf32>,
    %37 = vector.extract_strided_slice %12 {offsets = [384, 24], sizes = [384, 8], strides = [1, 1]} : vector<768x128xf32> to vector<384x8xf32>
    %c481 = arith.constant 481 : index
    %c24_16 = arith.constant 24 : index
    %38 = vector.load %arg8[%c481, %c24_16] : memref<896x128xf32, #tpu.memory_space<vmem>>, vector<384x8xf32>
    tpu.vector_store %arg8[%c481, %c24_16], %37 {strides = array<i32>} : memref<896x128xf32, #tpu.memory_space<vmem>>, vector<384x8xf32>,
    %39 = vector.extract_strided_slice %12 {offsets = [384, 32], sizes = [384, 8], strides = [1, 1]} : vector<768x128xf32> to vector<384x8xf32>
    %c480 = arith.constant 480 : index
    %c32_17 = arith.constant 32 : index
    %40 = vector.load %arg8[%c480, %c32_17] : memref<896x128xf32, #tpu.memory_space<vmem>>, vector<384x8xf32>
    tpu.vector_store %arg8[%c480, %c32_17], %39 {strides = array<i32>} : memref<896x128xf32, #tpu.memory_space<vmem>>, vector<384x8xf32>,
    %41 = vector.extract_strided_slice %12 {offsets = [384, 40], sizes = [384, 8], strides = [1, 1]} : vector<768x128xf32> to vector<384x8xf32>
    %c479 = arith.constant 479 : index
    %c40_18 = arith.constant 40 : index
    %42 = vector.load %arg8[%c479, %c40_18] : memref<896x128xf32, #tpu.memory_space<vmem>>, vector<384x8xf32>
    tpu.vector_store %arg8[%c479, %c40_18], %41 {strides = array<i32>} : memref<896x128xf32, #tpu.memory_space<vmem>>, vector<384x8xf32>,
    %43 = vector.extract_strided_slice %12 {offsets = [384, 48], sizes = [384, 8], strides = [1, 1]} : vector<768x128xf32> to vector<384x8xf32>
    %c457 = arith.constant 457 : index
    %c48_19 = arith.constant 48 : index
    %44 = vector.load %arg8[%c457, %c48_19] : memref<896x128xf32, #tpu.memory_space<vmem>>, vector<384x8xf32>
    tpu.vector_store %arg8[%c457, %c48_19], %43 {strides = array<i32>} : memref<896x128xf32, #tpu.memory_space<vmem>>, vector<384x8xf32>,
    %45 = vector.extract_strided_slice %12 {offsets = [384, 56], sizes = [384, 8], strides = [1, 1]} : vector<768x128xf32> to vector<384x8xf32>
    %c456 = arith.constant 456 : index
    %c56_20 = arith.constant 56 : index
    %46 = vector.load %arg8[%c456, %c56_20] : memref<896x128xf32, #tpu.memory_space<vmem>>, vector<384x8xf32>
    tpu.vector_store %arg8[%c456, %c56_20], %45 {strides = array<i32>} : memref<896x128xf32, #tpu.memory_space<vmem>>, vector<384x8xf32>,
    %47 = vector.extract_strided_slice %12 {offsets = [384, 64], sizes = [384, 8], strides = [1, 1]} : vector<768x128xf32> to vector<384x8xf32>
    %c455 = arith.constant 455 : index
    %c64_21 = arith.constant 64 : index
    %48 = vector.load %arg8[%c455, %c64_21] : memref<896x128xf32, #tpu.memory_space<vmem>>, vector<384x8xf32>
    tpu.vector_store %arg8[%c455, %c64_21], %47 {strides = array<i32>} : memref<896x128xf32, #tpu.memory_space<vmem>>, vector<384x8xf32>,
    %c0_22 = arith.constant 0 : index
    %c0_23 = arith.constant 0 : index
    %49 = vector.load %arg3[%c0_22, %c0_23] : memref<128x128xbf16, #tpu.memory_space<vmem>>, vector<128x128xbf16>
    %c0_24 = arith.constant 0 : index
    %c0_25 = arith.constant 0 : index
    %50 = vector.load %arg4[%c0_24, %c0_25] : memref<1x384xbf16, #tpu.memory_space<vmem>>, vector<1x384xbf16>
    %c32_26 = arith.constant 32 : index
    %c0_27 = arith.constant 0 : index
    %51 = vector.load %arg8[%c32_26, %c0_27] : memref<896x128xf32, #tpu.memory_space<vmem>>, vector<384x128xf32>
    %52 = arith.truncf %51 : vector<384x128xf32> to vector<384x128xbf16>
    %cst_28 = arith.constant dense<0.000000e+00> : vector<384x128xf32>
    %53 = tpu.matmul %52, %49, %cst_28 {dimension_numbers = #tpu.dot_dimension_numbers<[1], [0], [0], [1], [0, 0, 1, 1], [], []>} : vector<384x128xbf16>, vector<128x128xbf16>, vector<384x128xf32> -> vector<384x128xf32>
    %cst_29 = arith.constant 0.000000e+00 : f32
    %54 = vector.broadcast %cst_29 : f32 to vector<384x128xf32>
    %55 = arith.maximumf %53, %54 : vector<384x128xf32>
    %56 = arith.truncf %55 : vector<384x128xf32> to vector<384x128xbf16>
    %cst_30 = arith.constant dense<0.000000e+00> : vector<1x128xf32>
    %57 = tpu.matmul %50, %56, %cst_30 {dimension_numbers = #tpu.dot_dimension_numbers<[1], [0], [0], [1], [0, 0, 1, 1], [], []>} : vector<1x384xbf16>, vector<384x128xbf16>, vector<1x128xf32> -> vector<1x128xf32>
    %c480_31 = arith.constant 480 : index
    %c0_32 = arith.constant 0 : index
    %58 = vector.load %arg8[%c480_31, %c0_32] : memref<896x128xf32, #tpu.memory_space<vmem>>, vector<384x128xf32>
    %59 = arith.truncf %58 : vector<384x128xf32> to vector<384x128xbf16>
    %cst_33 = arith.constant dense<0.000000e+00> : vector<384x128xf32>
    %60 = tpu.matmul %59, %49, %cst_33 {dimension_numbers = #tpu.dot_dimension_numbers<[1], [0], [0], [1], [0, 0, 1, 1], [], []>} : vector<384x128xbf16>, vector<128x128xbf16>, vector<384x128xf32> -> vector<384x128xf32>
    %cst_34 = arith.constant 0.000000e+00 : f32
    %61 = vector.broadcast %cst_34 : f32 to vector<384x128xf32>
    %62 = arith.maximumf %60, %61 : vector<384x128xf32>
    %63 = arith.truncf %62 : vector<384x128xf32> to vector<384x128xbf16>
    %cst_35 = arith.constant dense<0.000000e+00> : vector<1x128xf32>
    %64 = tpu.matmul %50, %63, %cst_35 {dimension_numbers = #tpu.dot_dimension_numbers<[1], [0], [0], [1], [0, 0, 1, 1], [], []>} : vector<1x384xbf16>, vector<384x128xbf16>, vector<1x128xf32> -> vector<1x128xf32>
    %65 = tpu.concatenate %57, %64 in 0 : vector<1x128xf32>, vector<1x128xf32> -> vector<2x128xf32>
    %cst_36 = arith.constant 3.906250e-03 : f32
    %66 = vector.broadcast %cst_36 : f32 to vector<2x128xf32>
    %67 = arith.mulf %65, %66 : vector<2x128xf32>
    %68 = arith.truncf %67 : vector<2x128xf32> to vector<2x128xbf16>
    %c0_37 = arith.constant 0 : index
    %c0_38 = arith.constant 0 : index
    %69 = vector.load %arg5[%c0_37, %c0_38] : memref<128x128xbf16, #tpu.memory_space<vmem>>, vector<128x128xbf16>
    %cst_39 = arith.constant dense<0.000000e+00> : vector<2x128xf32>
    %70 = tpu.matmul %68, %69, %cst_39 {dimension_numbers = #tpu.dot_dimension_numbers<[1], [0], [0], [1], [0, 0, 1, 1], [], []>} : vector<2x128xbf16>, vector<128x128xbf16>, vector<2x128xf32> -> vector<2x128xf32>
    %c0_40 = arith.constant 0 : index
    %c0_41 = arith.constant 0 : index
    %71 = vector.load %arg6[%c0_40, %c0_41] : memref<1x128xf32, #tpu.memory_space<vmem>>, vector<1x128xf32>
    %72 = vector.broadcast %71 : vector<1x128xf32> to vector<2x128xf32>
    %73 = arith.addf %70, %72 : vector<2x128xf32>
    %c0_42 = arith.constant 0 : index
    %c0_43 = arith.constant 0 : index
    %c0_44 = arith.constant 0 : index
    %74 = vector.load %arg7[%c0_42, %c0_43, %c0_44] : memref<1x2x128xf32, #tpu.memory_space<vmem>>, vector<1x2x128xf32>
    %75 = vector.shape_cast %74 : vector<1x2x128xf32> to vector<2x128xf32>
    %76 = vector.shape_cast %73 : vector<2x128xf32> to vector<1x2x128xf32>
    tpu.vector_store %arg7[%c0_42, %c0_43, %c0_44], %76 {strides = array<i32>} : memref<1x2x128xf32, #tpu.memory_space<vmem>>, vector<1x2x128xf32>,
    return
  }
  func.func @transform_0(%arg0: i32) -> (i32, i32, i32) {
    %c0_i32 = arith.constant 0 : i32
    %c0_i32_0 = arith.constant 0 : i32
    %c0_i32_1 = arith.constant 0 : i32
    return %arg0, %c0_i32, %c0_i32_0 : i32, i32, i32
  }
  func.func @transform_1(%arg0: i32) -> (i32, i32) {
    %c0_i32 = arith.constant 0 : i32
    %c0_i32_0 = arith.constant 0 : i32
    %c0_i32_1 = arith.constant 0 : i32
    return %c0_i32, %c0_i32_0 : i32, i32
  }
  func.func @transform_2(%arg0: i32) -> (i32, i32) {
    %c0_i32 = arith.constant 0 : i32
    %c0_i32_0 = arith.constant 0 : i32
    %c0_i32_1 = arith.constant 0 : i32
    return %c0_i32, %c0_i32_0 : i32, i32
  }
  func.func @transform_3(%arg0: i32) -> (i32, i32) {
    %c0_i32 = arith.constant 0 : i32
    %c0_i32_0 = arith.constant 0 : i32
    %c0_i32_1 = arith.constant 0 : i32
    return %c0_i32, %c0_i32_0 : i32, i32
  }
  func.func @transform_4(%arg0: i32) -> (i32, i32) {
    %c0_i32 = arith.constant 0 : i32
    %c0_i32_0 = arith.constant 0 : i32
    %c0_i32_1 = arith.constant 0 : i32
    return %c0_i32, %c0_i32_0 : i32, i32
  }
  func.func @transform_5(%arg0: i32) -> (i32, i32) {
    %c0_i32 = arith.constant 0 : i32
    %c0_i32_0 = arith.constant 0 : i32
    %c0_i32_1 = arith.constant 0 : i32
    return %c0_i32, %c0_i32_0 : i32, i32
  }
  func.func @transform_6(%arg0: i32) -> (i32, i32, i32) {
    %c0_i32 = arith.constant 0 : i32
    %c0_i32_0 = arith.constant 0 : i32
    %c0_i32_1 = arith.constant 0 : i32
    return %arg0, %c0_i32, %c0_i32_0 : i32, i32, i32
  }
}

</mosaic_0001>

<bundles_post_ra>
// kernel: basenet_forward.1
= control target key start
LH: loop header
LB: loop body
LE: loop exit
PB: predicated region body
PF: predicated region fallthrough
CT: control target
= control target key end

     0   :  { %v25_v1 = vlaneseq  ;;  %v3769_v5 = vmov 0.0   ;;  %s5375_s0 = inlined_call_operand.vmem [shape: bf16[1,768,128], index: 0, kind: input, shape index: {}]   ;;  %s5376_s1 = inlined_call_operand.vmem [shape: bf16[128,128], index: 1, kind: input, shape index: {}]   ;;  %s5377_s2 = inlined_call_operand.vmem [shape: bf16[128,128], index: 2, kind: input, shape index: {}]   ;;  %s5378_s3 = inlined_call_operand.vmem [shape: bf16[1,384], index: 3, kind: input, shape index: {}]   ;;  %s5379_s4 = inlined_call_operand.vmem [shape: bf16[128,128], index: 4, kind: input, shape index: {}]   ;;  %s5380_s5 = inlined_call_operand.vmem [shape: f32[1,128], index: 5, kind: input, shape index: {}]   ;;  %s5381_s6 = inlined_call_operand.hbm [shape: f32[1,2,128], index: 6, kind: output, shape index: {}]  }
   0x1   :  { %v3667_v0 = vld [vmem:[%s5376_s1 + $0x38] sm:$0xff]   ;;  %v3814_v2 = vld [vmem:[%s5376_s1 + $0x30] sm:$0xff]   ;;  %v3821_v4 = vld [vmem:[%s5376_s1 + $0x28] sm:$0xff]  }
   0x2   :  { %3363 = vmatprep.subr.bf16.mxu0 %v3667_v0  ;;  %v26_v3 = vand.u32 127, %v25_v1  ;;  %v3670_v7 = vld [vmem:[%s5376_s1 + $0x20] sm:$0xff]   ;;  %v3671_v9 = vld [vmem:[%s5376_s1 + $0x18] sm:$0xff]   ;;  %v3672_v10 = vld [vmem:[%s5376_s1 + $0x10] sm:$0xff]  }
   0x3   :  { %3364 = vmatpush3.bf16.msra.mxu0 %v3667_v0  ;;  %v3675_v8 = vld [vmem:[%s5375_s0] sm:$0xff]   ;;  %v3673_v11 = vld [vmem:[%s5376_s1 + $0x8] sm:$0xff]   ;;  %v3677_v14 = vld [vmem:[%s5375_s0 + $0x10] sm:$0xff]  }
   0x4   :  { %3365 = vmatprep.subr.bf16.mxu0 %v3814_v2  ;;  %vm27_vm0 = vcmp.eq.s32.totalorder %v26_v3, 72  ;;  %3379 = vmatprep.mubr.bf16.mxu0 %v3675_v8  ;;  %v3674_v12 = vld [vmem:[%s5376_s1] sm:$0xff]   ;;  %v3676_v13 = vld [vmem:[%s5375_s0 + $0x8] sm:$0xff]   ;;  %v3678_v15 = vld [vmem:[%s5375_s0 + $0x18] sm:$0xff]  }
   0x5   :  { %v3824_v6 = vsel %vm27_vm0, 1.0, %v3769_v5  ;;  %v3679_v16 = vld [vmem:[%s5375_s0 + $0x20] sm:$0xff]   ;;  %v3680_v17 = vld [vmem:[%s5375_s0 + $0x28] sm:$0xff]   ;;  %v3681_v18 = vld [vmem:[%s5375_s0 + $0x30] sm:$0xff]  }
   0x6   :  { %38 = vst [vmem:[#allocation2 + $0x48] sm:$0xff] %v3824_v6  ;;  %39 = vst [vmem:[#allocation2 + $0x50] sm:$0xff] %v3824_v6  ;;  %v3682_v19 = vld [vmem:[%s5375_s0 + $0x38] sm:$0xff]   ;;  %v3683_v20 = vld [vmem:[%s5375_s0 + $0x40] sm:$0xff]  }
   0x7   :  { %33 = vst [vmem:[#allocation2 + $0x20] sm:$0xff] %v3824_v6  ;;  %34 = vst [vmem:[#allocation2 + $0x28] sm:$0xff] %v3824_v6  ;;  %3366 = vmatpush3.bf16.msra.mxu0 %v3814_v2 }
   0x8   :  { %35 = vst [vmem:[#allocation2 + $0x30] sm:$0xff] %v3824_v6  ;;  %36 = vst [vmem:[#allocation2 + $0x38] sm:$0xff] %v3824_v6  ;;  %3367 = vmatprep.subr.bf16.mxu0 %v3821_v4 }
   0x9   :  { %37 = vst [vmem:[#allocation2 + $0x40] sm:$0xff] %v3824_v6  ;;  %40 = vst [vmem:[#allocation2 + $0x58] sm:$0xff] %v3824_v6 }
   0xa   :  { %41 = vst [vmem:[#allocation2 + $0x60] sm:$0xff] %v3824_v6  ;;  %42 = vst [vmem:[#allocation2 + $0x68] sm:$0xff] %v3824_v6 }
   0xb   :  { %43 = vst [vmem:[#allocation2 + $0x70] sm:$0xff] %v3824_v6  ;;  %44 = vst [vmem:[#allocation2 + $0x78] sm:$0xff] %v3824_v6  ;;  %3368 = vmatpush3.bf16.msra.mxu0 %v3821_v4 }
   0xc   :  { %45 = vst [vmem:[#allocation2 + $0x80] sm:$0xff] %v3824_v6  ;;  %46 = vst [vmem:[#allocation2 + $0x88] sm:$0xff] %v3824_v6  ;;  %3369 = vmatprep.subr.bf16.mxu0 %v3670_v7 }
   0xd   :  { %47 = vst [vmem:[#allocation2 + $0x90] sm:$0xff] %v3824_v6  ;;  %48 = vst [vmem:[#allocation2 + $0x98] sm:$0xff] %v3824_v6 }
   0xe   :  { %49 = vst [vmem:[#allocation2 + $0xa0] sm:$0xff] %v3824_v6  ;;  %50 = vst [vmem:[#allocation2 + $0xa8] sm:$0xff] %v3824_v6 }
   0xf   :  { %51 = vst [vmem:[#allocation2 + $0xb0] sm:$0xff] %v3824_v6  ;;  %52 = vst [vmem:[#allocation2 + $0xb8] sm:$0xff] %v3824_v6  ;;  %3370 = vmatpush3.bf16.msra.mxu0 %v3670_v7 }
  0x10   :  { %53 = vst [vmem:[#allocation2 + $0xc0] sm:$0xff] %v3824_v6  ;;  %54 = vst [vmem:[#allocation2 + $0xc8] sm:$0xff] %v3824_v6  ;;  %3371 = vmatprep.subr.bf16.mxu0 %v3671_v9 }
  0x11   :  { %55 = vst [vmem:[#allocation2 + $0xd0] sm:$0xff] %v3824_v6  ;;  %56 = vst [vmem:[#allocation2 + $0xd8] sm:$0xff] %v3824_v6 }
  0x12   :  { %57 = vst [vmem:[#allocation2 + $0xe0] sm:$0xff] %v3824_v6  ;;  %58 = vst [vmem:[#allocation2 + $0xe8] sm:$0xff] %v3824_v6 }
  0x13   :  { %59 = vst [vmem:[#allocation2 + $0xf0] sm:$0xff] %v3824_v6  ;;  %60 = vst [vmem:[#allocation2 + $0xf8] sm:$0xff] %v3824_v6  ;;  %3372 = vmatpush3.bf16.msra.mxu0 %v3671_v9 }
  0x14   :  { %61 = vst [vmem:[#allocation2 + $0x100] sm:$0xff] %v3824_v6  ;;  %62 = vst [vmem:[#allocation2 + $0x108] sm:$0xff] %v3824_v6  ;;  %3373 = vmatprep.subr.bf16.mxu0 %v3672_v10 }
  0x15   :  { %63 = vst [vmem:[#allocation2 + $0x110] sm:$0xff] %v3824_v6  ;;  %64 = vst [vmem:[#allocation2 + $0x118] sm:$0xff] %v3824_v6 }
  0x16   :  { %65 = vst [vmem:[#allocation2 + $0x120] sm:$0xff] %v3824_v6  ;;  %66 = vst [vmem:[#allocation2 + $0x128] sm:$0xff] %v3824_v6 }
  0x17   :  { %67 = vst [vmem:[#allocation2 + $0x130] sm:$0xff] %v3824_v6  ;;  %68 = vst [vmem:[#allocation2 + $0x138] sm:$0xff] %v3824_v6  ;;  %3374 = vmatpush3.bf16.msra.mxu0 %v3672_v10 }
  0x18   :  { %69 = vst [vmem:[#allocation2 + $0x140] sm:$0xff] %v3824_v6  ;;  %70 = vst [vmem:[#allocation2 + $0x148] sm:$0xff] %v3824_v6  ;;  %3375 = vmatprep.subr.bf16.mxu0 %v3673_v11 }
  0x19   :  { %71 = vst [vmem:[#allocation2 + $0x150] sm:$0xff] %v3824_v6  ;;  %72 = vst [vmem:[#allocation2 + $0x158] sm:$0xff] %v3824_v6 }
  0x1a   :  { %73 = vst [vmem:[#allocation2 + $0x160] sm:$0xff] %v3824_v6  ;;  %74 = vst [vmem:[#allocation2 + $0x168] sm:$0xff] %v3824_v6 }
  0x1b   :  { %75 = vst [vmem:[#allocation2 + $0x170] sm:$0xff] %v3824_v6  ;;  %76 = vst [vmem:[#allocation2 + $0x178] sm:$0xff] %v3824_v6  ;;  %3376 = vmatpush3.bf16.msra.mxu0 %v3673_v11 }
  0x1c   :  { %77 = vst [vmem:[#allocation2 + $0x180] sm:$0xff] %v3824_v6  ;;  %78 = vst [vmem:[#allocation2 + $0x188] sm:$0xff] %v3824_v6  ;;  %3377 = vmatprep.subr.bf16.mxu0 %v3674_v12 }
  0x1d   :  { %79 = vst [vmem:[#allocation2 + $0x190] sm:$0xff] %v3824_v6  ;;  %80 = vst [vmem:[#allocation2 + $0x198] sm:$0xff] %v3824_v6 }
  0x1e   :  { %89 = vst [vmem:[#allocation2 + $0x1e0] sm:$0xff] %v3824_v6  ;;  %90 = vst [vmem:[#allocation2 + $0x1e8] sm:$0xff] %v3824_v6 }
  0x1f   :  { %91 = vst [vmem:[#allocation2 + $0x1f0] sm:$0xff] %v3824_v6  ;;  %92 = vst [vmem:[#allocation2 + $0x1f8] sm:$0xff] %v3824_v6  ;;  %3378 = vmatpush3.bf16.msra.mxu0 %v3674_v12 }
  0x20   :  { %93 = vst [vmem:[#allocation2 + $0x200] sm:$0xff] %v3824_v6  ;;  %94 = vst [vmem:[#allocation2 + $0x208] sm:$0xff] %v3824_v6 }
  0x21   :  { %95 = vst [vmem:[#allocation2 + $0x210] sm:$0xff] %v3824_v6  ;;  %96 = vst [vmem:[#allocation2 + $0x218] sm:$0xff] %v3824_v6 }
  0x22   :  { %97 = vst [vmem:[#allocation2 + $0x220] sm:$0xff] %v3824_v6  ;;  %98 = vst [vmem:[#allocation2 + $0x228] sm:$0xff] %v3824_v6  ;;  %3380 = vmatmul.mubr.bf16.vlgmr.msra.gmra.mxu0 %v3676_v13 }
  0x23   :  { %99 = vst [vmem:[#allocation2 + $0x230] sm:$0xff] %v3824_v6  ;;  %100 = vst [vmem:[#allocation2 + $0x238] sm:$0xff] %v3824_v6  ;;  %3383 = vmatprep.mubr.bf16.mxu0 %v3677_v14 }
  0x24   :  { %101 = vst [vmem:[#allocation2 + $0x240] sm:$0xff] %v3824_v6  ;;  %102 = vst [vmem:[#allocation2 + $0x248] sm:$0xff] %v3824_v6 }
  0x25   :  { %103 = vst [vmem:[#allocation2 + $0x250] sm:$0xff] %v3824_v6  ;;  %104 = vst [vmem:[#allocation2 + $0x258] sm:$0xff] %v3824_v6 }
  0x26   :  { %105 = vst [vmem:[#allocation2 + $0x260] sm:$0xff] %v3824_v6  ;;  %106 = vst [vmem:[#allocation2 + $0x268] sm:$0xff] %v3824_v6 }
  0x27   :  { %107 = vst [vmem:[#allocation2 + $0x270] sm:$0xff] %v3824_v6  ;;  %108 = vst [vmem:[#allocation2 + $0x278] sm:$0xff] %v3824_v6 }
  0x28   :  { %109 = vst [vmem:[#allocation2 + $0x280] sm:$0xff] %v3824_v6  ;;  %110 = vst [vmem:[#allocation2 + $0x288] sm:$0xff] %v3824_v6 }
  0x29   :  { %111 = vst [vmem:[#allocation2 + $0x290] sm:$0xff] %v3824_v6  ;;  %112 = vst [vmem:[#allocation2 + $0x298] sm:$0xff] %v3824_v6 }
  0x2a   :  { %113 = vst [vmem:[#allocation2 + $0x2a0] sm:$0xff] %v3824_v6  ;;  %114 = vst [vmem:[#allocation2 + $0x2a8] sm:$0xff] %v3824_v6  ;;  %3384 = vmatmul.mubr.bf16.gmra.mxu0 %v3678_v15 }
  0x2b   :  { %115 = vst [vmem:[#allocation2 + $0x2b0] sm:$0xff] %v3824_v6  ;;  %116 = vst [vmem:[#allocation2 + $0x2b8] sm:$0xff] %v3824_v6  ;;  %3387 = vmatprep.mubr.bf16.mxu0 %v3679_v16 }
  0x2c   :  { %117 = vst [vmem:[#allocation2 + $0x2c0] sm:$0xff] %v3824_v6  ;;  %118 = vst [vmem:[#allocation2 + $0x2c8] sm:$0xff] %v3824_v6 }
  0x2d   :  { %119 = vst [vmem:[#allocation2 + $0x2d0] sm:$0xff] %v3824_v6  ;;  %120 = vst [vmem:[#allocation2 + $0x2d8] sm:$0xff] %v3824_v6 }
  0x2e   :  { %121 = vst [vmem:[#allocation2 + $0x2e0] sm:$0xff] %v3824_v6  ;;  %122 = vst [vmem:[#allocation2 + $0x2e8] sm:$0xff] %v3824_v6 }
  0x2f   :  { %123 = vst [vmem:[#allocation2 + $0x2f0] sm:$0xff] %v3824_v6  ;;  %124 = vst [vmem:[#allocation2 + $0x2f8] sm:$0xff] %v3824_v6 }
  0x30   :  { %125 = vst [vmem:[#allocation2 + $0x300] sm:$0xff] %v3824_v6  ;;  %126 = vst [vmem:[#allocation2 + $0x308] sm:$0xff] %v3824_v6 }
  0x31   :  { %127 = vst [vmem:[#allocation2 + $0x310] sm:$0xff] %v3824_v6  ;;  %128 = vst [vmem:[#allocation2 + $0x318] sm:$0xff] %v3824_v6 }
  0x32   :  { %129 = vst [vmem:[#allocation2 + $0x320] sm:$0xff] %v3824_v6  ;;  %130 = vst [vmem:[#allocation2 + $0x328] sm:$0xff] %v3824_v6  ;;  %3388 = vmatmul.mubr.bf16.gmra.mxu0 %v3680_v17 }
  0x33   :  { %131 = vst [vmem:[#allocation2 + $0x330] sm:$0xff] %v3824_v6  ;;  %132 = vst [vmem:[#allocation2 + $0x338] sm:$0xff] %v3824_v6  ;;  %3391 = vmatprep.mubr.bf16.mxu0 %v3681_v18 }
  0x34   :  { %133 = vst [vmem:[#allocation2 + $0x340] sm:$0xff] %v3824_v6  ;;  %134 = vst [vmem:[#allocation2 + $0x348] sm:$0xff] %v3824_v6 }
  0x35   :  { %135 = vst [vmem:[#allocation2 + $0x350] sm:$0xff] %v3824_v6  ;;  %136 = vst [vmem:[#allocation2 + $0x358] sm:$0xff] %v3824_v6 }
  0x3a   :  { %3392 = vmatmul.mubr.bf16.gmra.mxu0 %v3682_v19 }
  0x3b   :  { %11 = vsyncpa [#allocation4], 0  ;;  %3395 = vmatprep.mubr.bf16.mxu0 %v3683_v20  ;;  %v3684_v21 = vld [vmem:[%s5375_s0 + $0x48] sm:$0xff]   ;;  %v3685_v22 = vld [vmem:[%s5375_s0 + $0x50] sm:$0xff]   ;;  %vm1102_vm1 = vcmask 64512   ;;  %vm1249_vm2 = vcmask 261312  }
  0x3c   :  { %v3686_v23 = vld [vmem:[%s5375_s0 + $0x58] sm:$0xff]   ;;  %v3687_v24 = vld [vmem:[%s5375_s0 + $0x60] sm:$0xff]   ;;  %v3688_v25 = vld [vmem:[%s5375_s0 + $0x68] sm:$0xff]   ;;  %vm1396_vm3 = vcmask 458112   ;;  %vm1151_vm4 = vcmask 130112   ;;  %vm1298_vm5 = vcmask 326912  }
  0x3d   :  { %v3689_v26 = vld [vmem:[%s5375_s0 + $0x70] sm:$0xff]   ;;  %v3690_v27 = vld [vmem:[%s5375_s0 + $0x78] sm:$0xff]   ;;  %v3691_v28 = vld [vmem:[%s5375_s0 + $0x80] sm:$0xff]   ;;  %vm1445_vm6 = vcmask 523712   ;;  %vm1200_vm7 = vcmask 195712   ;;  %vm1347_vm8 = vcmask 392512  }
  0x3e   :  { %v3692_v29 = vld [vmem:[%s5375_s0 + $0x88] sm:$0xff]   ;;  %v3693_v30 = vld [vmem:[%s5375_s0 + $0x90] sm:$0xff]   ;;  %v3699_v31 = vld [vmem:[%s5377_s2 + $0x38] sm:$0xff]   ;;  %vm1494_vm9 = vcmask 589312   ;;  %vm3771_vm10 = vmmov 0   ;;  %vm2968_vm11 = vcmask 1040384  }
  0x3f   :  { %3475 = vmatprep.subr.bf16.mxu1 %v3699_v31  ;;  %v3700_v32 = vld [vmem:[%s5377_s2 + $0x30] sm:$0xff]   ;;  %v3694_v33 = vld [vmem:[%s5375_s0 + $0x98] sm:$0xff]   ;;  %v3695_v34 = vld [vmem:[%s5375_s0 + $0xa0] sm:$0xff]   ;;  %s3772_s29 = smov [#allocation3]  }
  0x40   :  { %3476 = vmatpush3.bf16.msra.mxu1 %v3699_v31  ;;  %v3701_v35 = vld [vmem:[%s5377_s2 + $0x28] sm:$0xff]   ;;  %v3702_v36 = vld [vmem:[%s5377_s2 + $0x20] sm:$0xff]   ;;  %v3697_v38 = vld [vmem:[%s5375_s0 + $0xb0] sm:$0xff]   ;;  %s3090_s30 = sshll.u32 %s3772_s29, 4  ;;  %s3091_s30 = int_to_ptr.vmem [resolvable:$true] %s3090_s30 }
  0x41   :  { %3477 = vmatprep.subr.bf16.mxu1 %v3700_v32  ;;  %v3696_v37 = vld [vmem:[%s5375_s0 + $0xa8] sm:$0xff]   ;;  %v3703_v39 = vld [vmem:[%s5377_s2 + $0x18] sm:$0xff]   ;;  %v3704_v40 = vld [vmem:[%s5377_s2 + $0x10] sm:$0xff]   ;;  %s3747_s7 = scalar_lea.vmem %s3091_s30, 32  ;;  %p3752_p1 = scmp.lt.s32.totalorder %s3091_s30, %s3091_s30 }
  0x42   :  { %3396 = vmatmul.mubr.bf16.gmra.mxu0 %v3684_v21  ;;  %v3698_v41 = vld [vmem:[%s5375_s0 + $0xb8] sm:$0xff]   ;;  %v3705_v42 = vld [vmem:[%s5377_s2 + $0x8] sm:$0xff]   ;;  %v3706_v43 = vld [vmem:[%s5377_s2] sm:$0xff]   ;;  %p3748_p0 = scmp.ne.s32.totalorder %s3091_s30, %s3747_s7  ;;  %p3753_p2 = scmp.lt.s32.totalorder %s3747_s7, %s3747_s7 }
  0x43   :  { %3399 = vmatprep.mubr.bf16.mxu0 %v3685_v22  ;;  %v3707_v44 = vld [vmem:[%s5375_s0 + $0xc0] sm:$0xff]   ;;  %v3708_v45 = vld [vmem:[%s5375_s0 + $0xc8] sm:$0xff]   ;;  %v3709_v46 = vld [vmem:[%s5375_s0 + $0xd0] sm:$0xff]  }
  0x44   :  { %3478 = vmatpush3.bf16.msra.mxu1 %v3700_v32  ;;  %v3710_v47 = vld [vmem:[%s5375_s0 + $0xd8] sm:$0xff]   ;;  %v3711_v49 = vld [vmem:[%s5375_s0 + $0xe0] sm:$0xff]   ;;  %v3712_v57 = vld [vmem:[%s5375_s0 + $0xe8] sm:$0xff]   ;;  %p3754_p3 = por %p3753_p2, %p3752_p1 }
  0x45   :  { %3479 = vmatprep.subr.bf16.mxu1 %v3701_v35  ;;  %v3713_v59 = vld [vmem:[%s5375_s0 + $0xf0] sm:$0xff]   ;;  %v3714_v4 = vld [vmem:[%s5375_s0 + $0xf8] sm:$0xff]   ;;  %v3715_v7 = vld [vmem:[%s5375_s0 + $0x100] sm:$0xff]  }
  0x46   :  { %v3716_v15 = vld [vmem:[%s5375_s0 + $0x108] sm:$0xff]   ;;  %v3717_v17 = vld [vmem:[%s5375_s0 + $0x110] sm:$0xff]   ;;  %v3718_v31 = vld [vmem:[%s5375_s0 + $0x118] sm:$0xff]   ;;  %p3755_p4 = pnand %p3754_p3, %p3748_p0 }
  0x48   :  { %3480 = vmatpush3.bf16.msra.mxu1 %v3701_v35 }
  0x49   :  { %3481 = vmatprep.subr.bf16.mxu1 %v3702_v36 }
  0x4a   :  { %3400 = vmatmul.mubr.bf16.gmra.mxu0 %v3686_v23 }
  0x4b   :  { %3403 = vmatprep.mubr.bf16.mxu0 %v3687_v24 }
  0x4c   :  { %3482 = vmatpush3.bf16.msra.mxu1 %v3702_v36 }
  0x4d   :  { %3483 = vmatprep.subr.bf16.mxu1 %v3703_v39 }
  0x50   :  { %3484 = vmatpush3.bf16.msra.mxu1 %v3703_v39 }
  0x51   :  { %3485 = vmatprep.subr.bf16.mxu1 %v3704_v40 }
  0x52   :  { %3404 = vmatmul.mubr.bf16.gmra.mxu0 %v3688_v25 }
  0x53   :  { %3407 = vmatprep.mubr.bf16.mxu0 %v3689_v26 }
  0x54   :  { %3486 = vmatpush3.bf16.msra.mxu1 %v3704_v40 }
  0x55   :  { %3487 = vmatprep.subr.bf16.mxu1 %v3705_v42 }
  0x58   :  { %3488 = vmatpush3.bf16.msra.mxu1 %v3705_v42 }
  0x59   :  { %3489 = vmatprep.subr.bf16.mxu1 %v3706_v43 }
  0x5a   :  { %3408 = vmatmul.mubr.bf16.gmra.mxu0 %v3690_v27 }
  0x5b   :  { %3411 = vmatprep.mubr.bf16.mxu0 %v3691_v28 }
  0x5c   :  { %3490 = vmatpush3.bf16.msra.mxu1 %v3706_v43 }
  0x62   :  { %3412 = vmatmul.mubr.bf16.gmra.mxu0 %v3692_v29 }
  0x63   :  { %3415 = vmatprep.mubr.bf16.mxu0 %v3693_v30 }
  0x6a   :  { %3416 = vmatmul.mubr.bf16.gmra.mxu0 %v3694_v33  ;;  %v3719_v33 = vld [vmem:[%s5375_s0 + $0x120] sm:$0xff]  }
  0x6b   :  { %3419 = vmatprep.mubr.bf16.mxu0 %v3695_v34 }
  0x72   :  { %3420 = vmatmul.mubr.bf16.gmra.mxu0 %v3696_v37 }
  0x73   :  { %3423 = vmatprep.mubr.bf16.mxu0 %v3697_v38 }
  0x7a   :  { %3424 = vmatmul.mubr.bf16.gmra.mxu0 %v3698_v41 }
  0x7b   :  { %3427 = vmatprep.mubr.bf16.mxu0 %v3707_v44 }
  0x82   :  { %3428 = vmatmul.mubr.bf16.gmra.mxu0 %v3708_v45 }
  0x83   :  { %3431 = vmatprep.mubr.bf16.mxu0 %v3709_v46 }
  0x8a   :  { %3432 = vmatmul.mubr.bf16.gmra.mxu0 %v3710_v47  ;;  %v3720_v47 = vld [vmem:[%s5375_s0 + $0x128] sm:$0xff]  }
  0x8b   :  { %3435 = vmatprep.mubr.bf16.mxu0 %v3711_v49  ;;  %v3721_v49 = vld [vmem:[%s5375_s0 + $0x130] sm:$0xff]  }
  0x92   :  { %3436 = vmatmul.mubr.bf16.gmra.mxu0 %v3712_v57 }
  0x93   :  { %3439 = vmatprep.mubr.bf16.mxu0 %v3713_v59 }
  0x9a   :  { %3440 = vmatmul.mubr.bf16.gmra.mxu0 %v3714_v4 }
  0x9b   :  { %3443 = vmatprep.mubr.bf16.mxu0 %v3715_v7 }
  0xa2   :  { %3444 = vmatmul.mubr.bf16.gmra.mxu0 %v3716_v15 }
  0xa3   :  { %3447 = vmatprep.mubr.bf16.mxu0 %v3717_v17  ;;  %v3724_v17 = vld [vmem:[%s5375_s0 + $0x148] sm:$0xff]  }
  0xaa   :  { %3448 = vmatmul.mubr.bf16.gmra.mxu0 %v3718_v31 }
  0xab   :  { %3451 = vmatprep.mubr.bf16.mxu0 %v3719_v33  ;;  %v3726_v33 = vld [vmem:[%s5375_s0 + $0x158] sm:$0xff]  }
  0xb2   :  { %3452 = vmatmul.mubr.bf16.gmra.mxu0 %v3720_v47 }
  0xb3   :  { %3455 = vmatprep.mubr.bf16.mxu0 %v3721_v49 }
  0xe2   :  { %v3381_v48 = vpop.f32.mrf.mxu0 }
  0xe3   :  { %v1008_v50 = vmax.f32 %v3381_v48, 0.0 }
  0xe4   :  { %v623_v51 = vpop.f32.mrf.mxu0 }
  0xe5   :  { %1105 = vst.msk [vmem:[#allocation2 + $0x49] sm:$0xff] %vm1102_vm1, %v1008_v50  ;;  %v1006_v52 = vmax.f32 %v623_v51, 0.0 }
  0xe6   :  { %v3382_v53 = vpop.f32.mrf.mxu0 }
  0xe7   :  { %1103 = vst.msk [vmem:[#allocation2 + $0x39] sm:$0xff] %vm1102_vm1, %v1006_v52  ;;  %v1009_v54 = vmax.f32 %v3382_v53, 0.0 }
  0xe8   :  { %1250 = vst.msk [vmem:[#allocation2 + $0x21] sm:$0xff] %vm1249_vm2, %v1006_v52  ;;  %v626_v55 = vpop.f32.mrf.mxu0 }
  0xe9   :  { %1152 = vst.msk [vmem:[#allocation2 + $0x38] sm:$0xff] %vm1151_vm4, %v1006_v52  ;;  %v1007_v56 = vmax.f32 %v626_v55, 0.0 }
  0xea   :  { %1299 = vst.msk [vmem:[#allocation2 + $0x20] sm:$0xff] %vm1298_vm5, %v1006_v52  ;;  %v3385_v58 = vpop.f32.mrf.mxu0 }
  0xeb   :  { %1201 = vst.msk [vmem:[#allocation2 + $0x37] sm:$0xff] %vm1200_vm7, %v1006_v52  ;;  %v1012_v60 = vmax.f32 %v3385_v58, 0.0 }
  0xec   :  { %1348 = vst.msk [vmem:[#allocation2 + $0x1f] sm:$0xff] %vm1347_vm8, %v1006_v52  ;;  %v639_v61 = vpop.f32.mrf.mxu0 }
  0xed   :  { %1106 = vst.msk [vmem:[#allocation2 + $0x51] sm:$0xff] %vm1102_vm1, %v1009_v54  ;;  %1104 = vst.msk [vmem:[#allocation2 + $0x41] sm:$0xff] %vm1102_vm1, %v1007_v56  ;;  %v1010_v62 = vmax.f32 %v639_v61, 0.0 }
  0xee   :  { %1252 = vst.msk [vmem:[#allocation2 + $0x31] sm:$0xff] %vm1249_vm2, %v1008_v50  ;;  %1251 = vst.msk [vmem:[#allocation2 + $0x29] sm:$0xff] %vm1249_vm2, %v1007_v56  ;;  %v3386_v63 = vpop.f32.mrf.mxu0 }
  0xef   :  { %1399 = vst.msk [vmem:[#allocation2 + $0x19] sm:$0xff] %vm1396_vm3, %v1008_v50  ;;  %v1013_v0 = vmax.f32 %v3386_v63, 0.0  ;;  %v3722_v63 = vld [vmem:[%s5375_s0 + $0x138] sm:$0xff]  }
  0xf0   :  { %1155 = vst.msk [vmem:[#allocation2 + $0x50] sm:$0xff] %vm1151_vm4, %v1009_v54  ;;  %1153 = vst.msk [vmem:[#allocation2 + $0x40] sm:$0xff] %vm1151_vm4, %v1007_v56  ;;  %v642_v2 = vpop.f32.mrf.mxu0  ;;  %3456 = vmatmul.mubr.bf16.gmra.mxu0 %v3722_v63 }
  0xf1   :  { %1154 = vst.msk [vmem:[#allocation2 + $0x48] sm:$0xff] %vm1151_vm4, %v1008_v50  ;;  %v1011_v3 = vmax.f32 %v642_v2, 0.0  ;;  %v3723_v2 = vld [vmem:[%s5375_s0 + $0x140] sm:$0xff]  }
  0xf2   :  { %1300 = vst.msk [vmem:[#allocation2 + $0x28] sm:$0xff] %vm1298_vm5, %v1007_v56  ;;  %1301 = vst.msk [vmem:[#allocation2 + $0x30] sm:$0xff] %vm1298_vm5, %v1008_v50  ;;  %v3389_v6 = vpop.f32.mrf.mxu0  ;;  %3459 = vmatprep.mubr.bf16.mxu0 %v3723_v2 }
  0xf3   :  { %1202 = vst.msk [vmem:[#allocation2 + $0x3f] sm:$0xff] %vm1200_vm7, %v1007_v56  ;;  %1203 = vst.msk [vmem:[#allocation2 + $0x47] sm:$0xff] %vm1200_vm7, %v1008_v50  ;;  %v4108_v8 = vmax.f32 %v3389_v6, 0.0 }
  0xf4   :  { %1349 = vst.msk [vmem:[#allocation2 + $0x27] sm:$0xff] %vm1347_vm8, %v1007_v56  ;;  %1350 = vst.msk [vmem:[#allocation2 + $0x2f] sm:$0xff] %vm1347_vm8, %v1008_v50  ;;  %v655_v9 = vpop.f32.mrf.mxu0 }
  0xf5   :  { %1204 = vst.msk [vmem:[#allocation2 + $0x4f] sm:$0xff] %vm1200_vm7, %v1009_v54  ;;  %v1014_v10 = vmax.f32 %v655_v9, 0.0 }
  0xf6   :  { %1109 = vst.msk [vmem:[#allocation2 + $0x69] sm:$0xff] %vm1102_vm1, %v1012_v60  ;;  %1107 = vst.msk [vmem:[#allocation2 + $0x59] sm:$0xff] %vm1102_vm1, %v1010_v62  ;;  %v3390_v11 = vpop.f32.mrf.mxu0 }
  0xf7   :  { %1253 = vst.msk [vmem:[#allocation2 + $0x39] sm:$0xff] %vm1249_vm2, %v1009_v54  ;;  %1254 = vst.msk [vmem:[#allocation2 + $0x41] sm:$0xff] %vm1249_vm2, %v1010_v62  ;;  %v1017_v12 = vmax.f32 %v3390_v11, 0.0 }
  0xf8   :  { %1400 = vst.msk [vmem:[#allocation2 + $0x21] sm:$0xff] %vm1396_vm3, %v1009_v54  ;;  %1401 = vst.msk [vmem:[#allocation2 + $0x29] sm:$0xff] %vm1396_vm3, %v1010_v62  ;;  %v658_v13 = vpop.f32.mrf.mxu0  ;;  %3460 = vmatmul.mubr.bf16.gmra.mxu0 %v3724_v17 }
  0xf9   :  { %1302 = vst.msk [vmem:[#allocation2 + $0x38] sm:$0xff] %vm1298_vm5, %v1009_v54  ;;  %1303 = vst.msk [vmem:[#allocation2 + $0x40] sm:$0xff] %vm1298_vm5, %v1010_v62  ;;  %v1015_v14 = vmax.f32 %v658_v13, 0.0 }
  0xfa   :  { %1449 = vst.msk [vmem:[#allocation2 + $0x20] sm:$0xff] %vm1445_vm6, %v1009_v54  ;;  %1450 = vst.msk [vmem:[#allocation2 + $0x28] sm:$0xff] %vm1445_vm6, %v1010_v62  ;;  %v3393_v16 = vpop.f32.mrf.mxu0 }
  0xfb   :  { %1351 = vst.msk [vmem:[#allocation2 + $0x37] sm:$0xff] %vm1347_vm8, %v1009_v54  ;;  %1352 = vst.msk [vmem:[#allocation2 + $0x3f] sm:$0xff] %vm1347_vm8, %v1010_v62  ;;  %v4155_v18 = vmax.f32 %v3393_v16, 0.0 }
  0xfc   :  { %1498 = vst.msk [vmem:[#allocation2 + $0x1f] sm:$0xff] %vm1494_vm9, %v1009_v54  ;;  %1499 = vst.msk [vmem:[#allocation2 + $0x27] sm:$0xff] %vm1494_vm9, %v1010_v62  ;;  %v671_v19 = vpop.f32.mrf.mxu0 }
  0xfd   :  { %1156 = vst.msk [vmem:[#allocation2 + $0x58] sm:$0xff] %vm1151_vm4, %v1010_v62  ;;  %v1018_v22 = vmax.f32 %v671_v19, 0.0  ;;  %v3725_v19 = vld [vmem:[%s5375_s0 + $0x150] sm:$0xff]  }
  0xfe   :  { %1205 = vst.msk [vmem:[#allocation2 + $0x57] sm:$0xff] %vm1200_vm7, %v1010_v62  ;;  %v3394_v24 = vpop.f32.mrf.mxu0  ;;  %3463 = vmatprep.mubr.bf16.mxu0 %v3725_v19 }
  0xff   :  { %1110 = vst.msk [vmem:[#allocation2 + $0x71] sm:$0xff] %vm1102_vm1, %v1013_v0  ;;  %1108 = vst.msk [vmem:[#allocation2 + $0x61] sm:$0xff] %vm1102_vm1, %v1011_v3  ;;  %v1021_v25 = vmax.f32 %v3394_v24, 0.0 }
 0x100   :  { %1256 = vst.msk [vmem:[#allocation2 + $0x51] sm:$0xff] %vm1249_vm2, %v1012_v60  ;;  %1255 = vst.msk [vmem:[#allocation2 + $0x49] sm:$0xff] %vm1249_vm2, %v1011_v3  ;;  %v674_v28 = vpop.f32.mrf.mxu0  ;;  %3464 = vmatmul.mubr.bf16.gmra.mxu0 %v3726_v33 }
 0x101   :  { %1403 = vst.msk [vmem:[#allocation2 + $0x39] sm:$0xff] %vm1396_vm3, %v1012_v60  ;;  %1402 = vst.msk [vmem:[#allocation2 + $0x31] sm:$0xff] %vm1396_vm3, %v1011_v3  ;;  %v1019_v30 = vmax.f32 %v674_v28, 0.0 }
 0x102   :  { %1159 = vst.msk [vmem:[#allocation2 + $0x70] sm:$0xff] %vm1151_vm4, %v1013_v0  ;;  %1157 = vst.msk [vmem:[#allocation2 + $0x60] sm:$0xff] %vm1151_vm4, %v1011_v3  ;;  %v3397_v32 = vpop.f32.mrf.mxu0 }
 0x103   :  { %1158 = vst.msk [vmem:[#allocation2 + $0x68] sm:$0xff] %vm1151_vm4, %v1012_v60  ;;  %v1992_v20 = vld [vmem:[#allocation2 + $0x20] sm:$0xff]  ;;  %v4208_v34 = vmax.f32 %v3397_v32, 0.0 }
 0x104   :  { %1304 = vst.msk [vmem:[#allocation2 + $0x48] sm:$0xff] %vm1298_vm5, %v1011_v3  ;;  %1305 = vst.msk [vmem:[#allocation2 + $0x50] sm:$0xff] %vm1298_vm5, %v1012_v60  ;;  %v687_v35 = vpop.f32.mrf.mxu0 }
 0x105   :  { %1451 = vst.msk [vmem:[#allocation2 + $0x30] sm:$0xff] %vm1445_vm6, %v1011_v3  ;;  %1452 = vst.msk [vmem:[#allocation2 + $0x38] sm:$0xff] %vm1445_vm6, %v1012_v60  ;;  %v1022_v38 = vmax.f32 %v687_v35, 0.0 }
 0x106   :  { %1206 = vst.msk [vmem:[#allocation2 + $0x5f] sm:$0xff] %vm1200_vm7, %v1011_v3  ;;  %1207 = vst.msk [vmem:[#allocation2 + $0x67] sm:$0xff] %vm1200_vm7, %v1012_v60  ;;  %v3398_v40 = vpop.f32.mrf.mxu0 }
 0x107   :  { %1353 = vst.msk [vmem:[#allocation2 + $0x47] sm:$0xff] %vm1347_vm8, %v1011_v3  ;;  %1354 = vst.msk [vmem:[#allocation2 + $0x4f] sm:$0xff] %vm1347_vm8, %v1012_v60  ;;  %v1025_v41 = vmax.f32 %v3398_v40, 0.0 }
 0x108   :  { %1208 = vst.msk [vmem:[#allocation2 + $0x6f] sm:$0xff] %vm1200_vm7, %v1013_v0  ;;  %v690_v44 = vpop.f32.mrf.mxu0 }
 0x109   :  { %1113 = vst.msk [vmem:[#allocation2 + $0x89] sm:$0xff] %vm1102_vm1, %v4108_v8  ;;  %1111 = vst.msk [vmem:[#allocation2 + $0x79] sm:$0xff] %vm1102_vm1, %v1014_v10  ;;  %v1023_v46 = vmax.f32 %v690_v44, 0.0 }
 0x10a   :  { %1500 = vst.msk [vmem:[#allocation2 + $0x2f] sm:$0xff] %vm1494_vm9, %v1011_v3  ;;  %1501 = vst.msk [vmem:[#allocation2 + $0x37] sm:$0xff] %vm1494_vm9, %v1012_v60  ;;  %v3401_v48 = vpop.f32.mrf.mxu0 }
 0x10b   :  { %1257 = vst.msk [vmem:[#allocation2 + $0x59] sm:$0xff] %vm1249_vm2, %v1013_v0  ;;  %1258 = vst.msk [vmem:[#allocation2 + $0x61] sm:$0xff] %vm1249_vm2, %v1014_v10  ;;  %v4261_v50 = vmax.f32 %v3401_v48, 0.0 }
 0x10c   :  { %1404 = vst.msk [vmem:[#allocation2 + $0x41] sm:$0xff] %vm1396_vm3, %v1013_v0  ;;  %1405 = vst.msk [vmem:[#allocation2 + $0x49] sm:$0xff] %vm1396_vm3, %v1014_v10  ;;  %v703_v51 = vpop.f32.mrf.mxu0 }
 0x10d   :  { %1306 = vst.msk [vmem:[#allocation2 + $0x58] sm:$0xff] %vm1298_vm5, %v1013_v0  ;;  %1307 = vst.msk [vmem:[#allocation2 + $0x60] sm:$0xff] %vm1298_vm5, %v1014_v10  ;;  %v1026_v54 = vmax.f32 %v703_v51, 0.0 }
 0x10e   :  { %1453 = vst.msk [vmem:[#allocation2 + $0x40] sm:$0xff] %vm1445_vm6, %v1013_v0  ;;  %1454 = vst.msk [vmem:[#allocation2 + $0x48] sm:$0xff] %vm1445_vm6, %v1014_v10  ;;  %v3402_v56 = vpop.f32.mrf.mxu0 }
 0x10f   :  { %1355 = vst.msk [vmem:[#allocation2 + $0x57] sm:$0xff] %vm1347_vm8, %v1013_v0  ;;  %1356 = vst.msk [vmem:[#allocation2 + $0x5f] sm:$0xff] %vm1347_vm8, %v1014_v10  ;;  %v1029_v57 = vmax.f32 %v3402_v56, 0.0 }
 0x110   :  { %1502 = vst.msk [vmem:[#allocation2 + $0x3f] sm:$0xff] %vm1494_vm9, %v1013_v0  ;;  %1503 = vst.msk [vmem:[#allocation2 + $0x47] sm:$0xff] %vm1494_vm9, %v1014_v10  ;;  %v706_v60 = vpop.f32.mrf.mxu0 }
 0x111   :  { %1160 = vst.msk [vmem:[#allocation2 + $0x78] sm:$0xff] %vm1151_vm4, %v1014_v10  ;;  %v1993_v21 = vld [vmem:[#allocation2 + $0x28] sm:$0xff]  ;;  %v1994_v26 = vld [vmem:[#allocation2 + $0x30] sm:$0xff]  ;;  %v1027_v62 = vmax.f32 %v706_v60, 0.0 }
 0x112   :  { %1209 = vst.msk [vmem:[#allocation2 + $0x77] sm:$0xff] %vm1200_vm7, %v1014_v10  ;;  %v2040_v23 = vpack.c.bf16 %v1993_v21, %v1992_v20  ;;  %v3405_v0 = vpop.f32.mrf.mxu0 }
 0x113   :  { %1114 = vst.msk [vmem:[#allocation2 + $0x91] sm:$0xff] %vm1102_vm1, %v1017_v12  ;;  %1112 = vst.msk [vmem:[#allocation2 + $0x81] sm:$0xff] %vm1102_vm1, %v1015_v14  ;;  %v4314_v3 = vmax.f32 %v3405_v0, 0.0 }
 0x114   :  { %1260 = vst.msk [vmem:[#allocation2 + $0x71] sm:$0xff] %vm1249_vm2, %v4108_v8  ;;  %1259 = vst.msk [vmem:[#allocation2 + $0x69] sm:$0xff] %vm1249_vm2, %v1015_v14  ;;  %3491 = vmatprep.mubr.bf16.mxu1 %v2040_v23  ;;  %v719_v4 = vpop.f32.mrf.mxu0 }
 0x115   :  { %1407 = vst.msk [vmem:[#allocation2 + $0x59] sm:$0xff] %vm1396_vm3, %v4108_v8  ;;  %1406 = vst.msk [vmem:[#allocation2 + $0x51] sm:$0xff] %vm1396_vm3, %v1015_v14 }
 0x116   :  { %1163 = vst.msk [vmem:[#allocation2 + $0x90] sm:$0xff] %vm1151_vm4, %v1017_v12  ;;  %1161 = vst.msk [vmem:[#allocation2 + $0x80] sm:$0xff] %vm1151_vm4, %v1015_v14  ;;  %v3406_v10 = vpop.f32.mrf.mxu0 }
 0x117   :  { %1162 = vst.msk [vmem:[#allocation2 + $0x88] sm:$0xff] %vm1151_vm4, %v4108_v8  ;;  %v1995_v27 = vld [vmem:[#allocation2 + $0x38] sm:$0xff]  ;;  %v1996_v36 = vld [vmem:[#allocation2 + $0x40] sm:$0xff]  ;;  %v1033_v11 = vmax.f32 %v3406_v10, 0.0 }
 0x118   :  { %1308 = vst.msk [vmem:[#allocation2 + $0x68] sm:$0xff] %vm1298_vm5, %v1015_v14  ;;  %1309 = vst.msk [vmem:[#allocation2 + $0x70] sm:$0xff] %vm1298_vm5, %v4108_v8  ;;  %v2041_v29 = vpack.c.bf16 %v1995_v27, %v1994_v26 }
 0x119   :  { %1455 = vst.msk [vmem:[#allocation2 + $0x50] sm:$0xff] %vm1445_vm6, %v1015_v14  ;;  %1456 = vst.msk [vmem:[#allocation2 + $0x58] sm:$0xff] %vm1445_vm6, %v4108_v8 }
 0x11a   :  { %1210 = vst.msk [vmem:[#allocation2 + $0x7f] sm:$0xff] %vm1200_vm7, %v1015_v14  ;;  %1211 = vst.msk [vmem:[#allocation2 + $0x87] sm:$0xff] %vm1200_vm7, %v4108_v8  ;;  %3492 = vmatmul.mubr.bf16.vlgmr.msra.gmra.mxu1 %v2041_v29 }
 0x11b   :  { %1357 = vst.msk [vmem:[#allocation2 + $0x67] sm:$0xff] %vm1347_vm8, %v1015_v14  ;;  %1358 = vst.msk [vmem:[#allocation2 + $0x6f] sm:$0xff] %vm1347_vm8, %v4108_v8 }
 0x11c   :  { %1212 = vst.msk [vmem:[#allocation2 + $0x8f] sm:$0xff] %vm1200_vm7, %v1017_v12 }
 0x11d   :  { %1117 = vst.msk [vmem:[#allocation2 + $0xa9] sm:$0xff] %vm1102_vm1, %v4155_v18  ;;  %1115 = vst.msk [vmem:[#allocation2 + $0x99] sm:$0xff] %vm1102_vm1, %v1018_v22 }
 0x11e   :  { %1504 = vst.msk [vmem:[#allocation2 + $0x4f] sm:$0xff] %vm1494_vm9, %v1015_v14  ;;  %1505 = vst.msk [vmem:[#allocation2 + $0x57] sm:$0xff] %vm1494_vm9, %v4108_v8  ;;  %v1030_v8 = vmax.f32 %v719_v4, 0.0  ;;  %v722_v14 = vpop.f32.mrf.mxu0 }
 0x11f   :  { %1261 = vst.msk [vmem:[#allocation2 + $0x79] sm:$0xff] %vm1249_vm2, %v1017_v12  ;;  %1262 = vst.msk [vmem:[#allocation2 + $0x81] sm:$0xff] %vm1249_vm2, %v1018_v22  ;;  %v1031_v16 = vmax.f32 %v722_v14, 0.0 }
 0x120   :  { %1408 = vst.msk [vmem:[#allocation2 + $0x61] sm:$0xff] %vm1396_vm3, %v1017_v12  ;;  %1409 = vst.msk [vmem:[#allocation2 + $0x69] sm:$0xff] %vm1396_vm3, %v1018_v22 }
 0x121   :  { %1310 = vst.msk [vmem:[#allocation2 + $0x78] sm:$0xff] %vm1298_vm5, %v1017_v12  ;;  %1311 = vst.msk [vmem:[#allocation2 + $0x80] sm:$0xff] %vm1298_vm5, %v1018_v22 }
 0x122   :  { %1457 = vst.msk [vmem:[#allocation2 + $0x60] sm:$0xff] %vm1445_vm6, %v1017_v12  ;;  %1458 = vst.msk [vmem:[#allocation2 + $0x68] sm:$0xff] %vm1445_vm6, %v1018_v22 }
 0x123   :  { %1359 = vst.msk [vmem:[#allocation2 + $0x77] sm:$0xff] %vm1347_vm8, %v1017_v12  ;;  %1360 = vst.msk [vmem:[#allocation2 + $0x7f] sm:$0xff] %vm1347_vm8, %v1018_v22 }
 0x124   :  { %1506 = vst.msk [vmem:[#allocation2 + $0x5f] sm:$0xff] %vm1494_vm9, %v1017_v12  ;;  %1507 = vst.msk [vmem:[#allocation2 + $0x67] sm:$0xff] %vm1494_vm9, %v1018_v22 }
 0x125   :  { %1164 = vst.msk [vmem:[#allocation2 + $0x98] sm:$0xff] %vm1151_vm4, %v1018_v22  ;;  %v1997_v37 = vld [vmem:[#allocation2 + $0x48] sm:$0xff]  ;;  %v1998_v42 = vld [vmem:[#allocation2 + $0x50] sm:$0xff] }
 0x126   :  { %1213 = vst.msk [vmem:[#allocation2 + $0x97] sm:$0xff] %vm1200_vm7, %v1018_v22  ;;  %v2042_v39 = vpack.c.bf16 %v1997_v37, %v1996_v36 }
 0x127   :  { %1118 = vst.msk [vmem:[#allocation2 + $0xb1] sm:$0xff] %vm1102_vm1, %v1021_v25  ;;  %1116 = vst.msk [vmem:[#allocation2 + $0xa1] sm:$0xff] %vm1102_vm1, %v1019_v30 }
 0x128   :  { %1264 = vst.msk [vmem:[#allocation2 + $0x91] sm:$0xff] %vm1249_vm2, %v4155_v18  ;;  %1263 = vst.msk [vmem:[#allocation2 + $0x89] sm:$0xff] %vm1249_vm2, %v1019_v30  ;;  %3495 = vmatprep.mubr.bf16.mxu1 %v2042_v39 }
 0x129   :  { %1411 = vst.msk [vmem:[#allocation2 + $0x79] sm:$0xff] %vm1396_vm3, %v4155_v18  ;;  %1410 = vst.msk [vmem:[#allocation2 + $0x71] sm:$0xff] %vm1396_vm3, %v1019_v30 }
 0x12a   :  { %1167 = vst.msk [vmem:[#allocation2 + $0xb0] sm:$0xff] %vm1151_vm4, %v1021_v25  ;;  %1165 = vst.msk [vmem:[#allocation2 + $0xa0] sm:$0xff] %vm1151_vm4, %v1019_v30 }
 0x12b   :  { %1166 = vst.msk [vmem:[#allocation2 + $0xa8] sm:$0xff] %vm1151_vm4, %v4155_v18  ;;  %v1999_v43 = vld [vmem:[#allocation2 + $0x58] sm:$0xff]  ;;  %v2000_v52 = vld [vmem:[#allocation2 + $0x60] sm:$0xff] }
 0x12c   :  { %1312 = vst.msk [vmem:[#allocation2 + $0x88] sm:$0xff] %vm1298_vm5, %v1019_v30  ;;  %1313 = vst.msk [vmem:[#allocation2 + $0x90] sm:$0xff] %vm1298_vm5, %v4155_v18  ;;  %v2043_v45 = vpack.c.bf16 %v1999_v43, %v1998_v42 }
 0x12d   :  { %1459 = vst.msk [vmem:[#allocation2 + $0x70] sm:$0xff] %vm1445_vm6, %v1019_v30  ;;  %1460 = vst.msk [vmem:[#allocation2 + $0x78] sm:$0xff] %vm1445_vm6, %v4155_v18 }
 0x12e   :  { %1214 = vst.msk [vmem:[#allocation2 + $0x9f] sm:$0xff] %vm1200_vm7, %v1019_v30  ;;  %1215 = vst.msk [vmem:[#allocation2 + $0xa7] sm:$0xff] %vm1200_vm7, %v4155_v18  ;;  %3496 = vmatmul.mubr.bf16.gmra.mxu1 %v2043_v45 }
 0x12f   :  { %1361 = vst.msk [vmem:[#allocation2 + $0x87] sm:$0xff] %vm1347_vm8, %v1019_v30  ;;  %1362 = vst.msk [vmem:[#allocation2 + $0x8f] sm:$0xff] %vm1347_vm8, %v4155_v18 }
 0x130   :  { %1216 = vst.msk [vmem:[#allocation2 + $0xaf] sm:$0xff] %vm1200_vm7, %v1021_v25 }
 0x131   :  { %1121 = vst.msk [vmem:[#allocation2 + $0xc9] sm:$0xff] %vm1102_vm1, %v4208_v34  ;;  %1119 = vst.msk [vmem:[#allocation2 + $0xb9] sm:$0xff] %vm1102_vm1, %v1022_v38 }
 0x132   :  { %1508 = vst.msk [vmem:[#allocation2 + $0x6f] sm:$0xff] %vm1494_vm9, %v1019_v30  ;;  %1509 = vst.msk [vmem:[#allocation2 + $0x77] sm:$0xff] %vm1494_vm9, %v4155_v18  ;;  %v3409_v18 = vpop.f32.mrf.mxu0 }
 0x133   :  { %1265 = vst.msk [vmem:[#allocation2 + $0x99] sm:$0xff] %vm1249_vm2, %v1021_v25  ;;  %1266 = vst.msk [vmem:[#allocation2 + $0xa1] sm:$0xff] %vm1249_vm2, %v1022_v38  ;;  %v4367_v20 = vmax.f32 %v3409_v18, 0.0 }
 0x134   :  { %1412 = vst.msk [vmem:[#allocation2 + $0x81] sm:$0xff] %vm1396_vm3, %v1021_v25  ;;  %1413 = vst.msk [vmem:[#allocation2 + $0x89] sm:$0xff] %vm1396_vm3, %v1022_v38  ;;  %v735_v21 = vpop.f32.mrf.mxu0 }
 0x135   :  { %1314 = vst.msk [vmem:[#allocation2 + $0x98] sm:$0xff] %vm1298_vm5, %v1021_v25  ;;  %1315 = vst.msk [vmem:[#allocation2 + $0xa0] sm:$0xff] %vm1298_vm5, %v1022_v38  ;;  %v1034_v24 = vmax.f32 %v735_v21, 0.0 }
 0x136   :  { %1461 = vst.msk [vmem:[#allocation2 + $0x80] sm:$0xff] %vm1445_vm6, %v1021_v25  ;;  %1462 = vst.msk [vmem:[#allocation2 + $0x88] sm:$0xff] %vm1445_vm6, %v1022_v38  ;;  %v3410_v26 = vpop.f32.mrf.mxu0 }
 0x137   :  { %1363 = vst.msk [vmem:[#allocation2 + $0x97] sm:$0xff] %vm1347_vm8, %v1021_v25  ;;  %1364 = vst.msk [vmem:[#allocation2 + $0x9f] sm:$0xff] %vm1347_vm8, %v1022_v38  ;;  %v1037_v27 = vmax.f32 %v3410_v26, 0.0 }
 0x138   :  { %1510 = vst.msk [vmem:[#allocation2 + $0x7f] sm:$0xff] %vm1494_vm9, %v1021_v25  ;;  %1511 = vst.msk [vmem:[#allocation2 + $0x87] sm:$0xff] %vm1494_vm9, %v1022_v38  ;;  %v738_v30 = vpop.f32.mrf.mxu0 }
 0x139   :  { %1168 = vst.msk [vmem:[#allocation2 + $0xb8] sm:$0xff] %vm1151_vm4, %v1022_v38  ;;  %v2001_v53 = vld [vmem:[#allocation2 + $0x68] sm:$0xff]  ;;  %v2002_v58 = vld [vmem:[#allocation2 + $0x70] sm:$0xff]  ;;  %v1035_v32 = vmax.f32 %v738_v30, 0.0 }
 0x13a   :  { %1217 = vst.msk [vmem:[#allocation2 + $0xb7] sm:$0xff] %vm1200_vm7, %v1022_v38  ;;  %v2044_v55 = vpack.c.bf16 %v2001_v53, %v2000_v52 }
 0x13b   :  { %1122 = vst.msk [vmem:[#allocation2 + $0xd1] sm:$0xff] %vm1102_vm1, %v1025_v41  ;;  %1120 = vst.msk [vmem:[#allocation2 + $0xc1] sm:$0xff] %vm1102_vm1, %v1023_v46 }
 0x13c   :  { %1268 = vst.msk [vmem:[#allocation2 + $0xb1] sm:$0xff] %vm1249_vm2, %v4208_v34  ;;  %1267 = vst.msk [vmem:[#allocation2 + $0xa9] sm:$0xff] %vm1249_vm2, %v1023_v46  ;;  %3499 = vmatprep.mubr.bf16.mxu1 %v2044_v55 }
 0x13d   :  { %1415 = vst.msk [vmem:[#allocation2 + $0x99] sm:$0xff] %vm1396_vm3, %v4208_v34  ;;  %1414 = vst.msk [vmem:[#allocation2 + $0x91] sm:$0xff] %vm1396_vm3, %v1023_v46 }
 0x13e   :  { %1171 = vst.msk [vmem:[#allocation2 + $0xd0] sm:$0xff] %vm1151_vm4, %v1025_v41  ;;  %1169 = vst.msk [vmem:[#allocation2 + $0xc0] sm:$0xff] %vm1151_vm4, %v1023_v46 }
 0x13f   :  { %1170 = vst.msk [vmem:[#allocation2 + $0xc8] sm:$0xff] %vm1151_vm4, %v4208_v34  ;;  %v2003_v59 = vld [vmem:[#allocation2 + $0x78] sm:$0xff]  ;;  %v2004_v6 = vld [vmem:[#allocation2 + $0x80] sm:$0xff] }
 0x140   :  { %1316 = vst.msk [vmem:[#allocation2 + $0xa8] sm:$0xff] %vm1298_vm5, %v1023_v46  ;;  %1317 = vst.msk [vmem:[#allocation2 + $0xb0] sm:$0xff] %vm1298_vm5, %v4208_v34  ;;  %v2045_v61 = vpack.c.bf16 %v2003_v59, %v2002_v58 }
 0x141   :  { %1463 = vst.msk [vmem:[#allocation2 + $0x90] sm:$0xff] %vm1445_vm6, %v1023_v46  ;;  %1464 = vst.msk [vmem:[#allocation2 + $0x98] sm:$0xff] %vm1445_vm6, %v4208_v34 }
 0x142   :  { %1218 = vst.msk [vmem:[#allocation2 + $0xbf] sm:$0xff] %vm1200_vm7, %v1023_v46  ;;  %1219 = vst.msk [vmem:[#allocation2 + $0xc7] sm:$0xff] %vm1200_vm7, %v4208_v34  ;;  %3500 = vmatmul.mubr.bf16.gmra.mxu1 %v2045_v61 }
 0x143   :  { %1365 = vst.msk [vmem:[#allocation2 + $0xa7] sm:$0xff] %vm1347_vm8, %v1023_v46  ;;  %1366 = vst.msk [vmem:[#allocation2 + $0xaf] sm:$0xff] %vm1347_vm8, %v4208_v34 }
 0x144   :  { %1220 = vst.msk [vmem:[#allocation2 + $0xcf] sm:$0xff] %vm1200_vm7, %v1025_v41 }
 0x145   :  { %1125 = vst.msk [vmem:[#allocation2 + $0xe9] sm:$0xff] %vm1102_vm1, %v4261_v50  ;;  %1123 = vst.msk [vmem:[#allocation2 + $0xd9] sm:$0xff] %vm1102_vm1, %v1026_v54 }
 0x146   :  { %1512 = vst.msk [vmem:[#allocation2 + $0x8f] sm:$0xff] %vm1494_vm9, %v1023_v46  ;;  %1513 = vst.msk [vmem:[#allocation2 + $0x97] sm:$0xff] %vm1494_vm9, %v4208_v34  ;;  %v3413_v34 = vpop.f32.mrf.mxu0 }
 0x147   :  { %1269 = vst.msk [vmem:[#allocation2 + $0xb9] sm:$0xff] %vm1249_vm2, %v1025_v41  ;;  %1270 = vst.msk [vmem:[#allocation2 + $0xc1] sm:$0xff] %vm1249_vm2, %v1026_v54  ;;  %v4417_v35 = vmax.f32 %v3413_v34, 0.0 }
 0x148   :  { %1416 = vst.msk [vmem:[#allocation2 + $0xa1] sm:$0xff] %vm1396_vm3, %v1025_v41  ;;  %1417 = vst.msk [vmem:[#allocation2 + $0xa9] sm:$0xff] %vm1396_vm3, %v1026_v54  ;;  %v751_v36 = vpop.f32.mrf.mxu0 }
 0x149   :  { %1318 = vst.msk [vmem:[#allocation2 + $0xb8] sm:$0xff] %vm1298_vm5, %v1025_v41  ;;  %1319 = vst.msk [vmem:[#allocation2 + $0xc0] sm:$0xff] %vm1298_vm5, %v1026_v54  ;;  %v1038_v39 = vmax.f32 %v751_v36, 0.0  ;;  %v3729_v36 = vld [vmem:[%s5375_s0 + $0x170] sm:$0xff]  }
 0x14a   :  { %1465 = vst.msk [vmem:[#allocation2 + $0xa0] sm:$0xff] %vm1445_vm6, %v1025_v41  ;;  %1466 = vst.msk [vmem:[#allocation2 + $0xa8] sm:$0xff] %vm1445_vm6, %v1026_v54 }
 0x14b   :  { %1367 = vst.msk [vmem:[#allocation2 + $0xb7] sm:$0xff] %vm1347_vm8, %v1025_v41  ;;  %1368 = vst.msk [vmem:[#allocation2 + $0xbf] sm:$0xff] %vm1347_vm8, %v1026_v54 }
 0x14c   :  { %1514 = vst.msk [vmem:[#allocation2 + $0x9f] sm:$0xff] %vm1494_vm9, %v1025_v41  ;;  %1515 = vst.msk [vmem:[#allocation2 + $0xa7] sm:$0xff] %vm1494_vm9, %v1026_v54  ;;  %v3414_v41 = vpop.f32.mrf.mxu0 }
 0x14d   :  { %1172 = vst.msk [vmem:[#allocation2 + $0xd8] sm:$0xff] %vm1151_vm4, %v1026_v54  ;;  %v2005_v7 = vld [vmem:[#allocation2 + $0x88] sm:$0xff]  ;;  %v2006_v12 = vld [vmem:[#allocation2 + $0x90] sm:$0xff]  ;;  %v1041_v42 = vmax.f32 %v3414_v41, 0.0 }
 0x14e   :  { %1221 = vst.msk [vmem:[#allocation2 + $0xd7] sm:$0xff] %vm1200_vm7, %v1026_v54  ;;  %v2046_v9 = vpack.c.bf16 %v2005_v7, %v2004_v6  ;;  %v754_v45 = vpop.f32.mrf.mxu0 }
 0x14f   :  { %1126 = vst.msk [vmem:[#allocation2 + $0xf1] sm:$0xff] %vm1102_vm1, %v1029_v57  ;;  %1124 = vst.msk [vmem:[#allocation2 + $0xe1] sm:$0xff] %vm1102_vm1, %v1027_v62  ;;  %v1039_v47 = vmax.f32 %v754_v45, 0.0 }
 0x150   :  { %1272 = vst.msk [vmem:[#allocation2 + $0xd1] sm:$0xff] %vm1249_vm2, %v4261_v50  ;;  %1271 = vst.msk [vmem:[#allocation2 + $0xc9] sm:$0xff] %vm1249_vm2, %v1027_v62  ;;  %3503 = vmatprep.mubr.bf16.mxu1 %v2046_v9  ;;  %v3417_v48 = vpop.f32.mrf.mxu0 }
 0x151   :  { %1419 = vst.msk [vmem:[#allocation2 + $0xb9] sm:$0xff] %vm1396_vm3, %v4261_v50  ;;  %1418 = vst.msk [vmem:[#allocation2 + $0xb1] sm:$0xff] %vm1396_vm3, %v1027_v62  ;;  %v4464_v49 = vmax.f32 %v3417_v48, 0.0 }
 0x152   :  { %1175 = vst.msk [vmem:[#allocation2 + $0xf0] sm:$0xff] %vm1151_vm4, %v1029_v57  ;;  %1173 = vst.msk [vmem:[#allocation2 + $0xe0] sm:$0xff] %vm1151_vm4, %v1027_v62 }
 0x153   :  { %1174 = vst.msk [vmem:[#allocation2 + $0xe8] sm:$0xff] %vm1151_vm4, %v4261_v50  ;;  %v2007_v13 = vld [vmem:[#allocation2 + $0x98] sm:$0xff]  ;;  %v2008_v22 = vld [vmem:[#allocation2 + $0xa0] sm:$0xff] }
 0x154   :  { %1320 = vst.msk [vmem:[#allocation2 + $0xc8] sm:$0xff] %vm1298_vm5, %v1027_v62  ;;  %1321 = vst.msk [vmem:[#allocation2 + $0xd0] sm:$0xff] %vm1298_vm5, %v4261_v50  ;;  %v2047_v15 = vpack.c.bf16 %v2007_v13, %v2006_v12 }
 0x155   :  { %1467 = vst.msk [vmem:[#allocation2 + $0xb0] sm:$0xff] %vm1445_vm6, %v1027_v62  ;;  %1468 = vst.msk [vmem:[#allocation2 + $0xb8] sm:$0xff] %vm1445_vm6, %v4261_v50 }
 0x156   :  { %1222 = vst.msk [vmem:[#allocation2 + $0xdf] sm:$0xff] %vm1200_vm7, %v1027_v62  ;;  %1223 = vst.msk [vmem:[#allocation2 + $0xe7] sm:$0xff] %vm1200_vm7, %v4261_v50  ;;  %3504 = vmatmul.mubr.bf16.gmra.mxu1 %v2047_v15 }
 0x157   :  { %1369 = vst.msk [vmem:[#allocation2 + $0xc7] sm:$0xff] %vm1347_vm8, %v1027_v62  ;;  %1370 = vst.msk [vmem:[#allocation2 + $0xcf] sm:$0xff] %vm1347_vm8, %v4261_v50 }
 0x158   :  { %1224 = vst.msk [vmem:[#allocation2 + $0xef] sm:$0xff] %vm1200_vm7, %v1029_v57 }
 0x159   :  { %1129 = vst.msk [vmem:[#allocation2 + $0x109] sm:$0xff] %vm1102_vm1, %v4314_v3  ;;  %1127 = vst.msk [vmem:[#allocation2 + $0xf9] sm:$0xff] %vm1102_vm1, %v1030_v8 }
 0x15a   :  { %1516 = vst.msk [vmem:[#allocation2 + $0xaf] sm:$0xff] %vm1494_vm9, %v1027_v62  ;;  %1517 = vst.msk [vmem:[#allocation2 + $0xb7] sm:$0xff] %vm1494_vm9, %v4261_v50  ;;  %v767_v50 = vpop.f32.mrf.mxu0 }
 0x15b   :  { %1273 = vst.msk [vmem:[#allocation2 + $0xd9] sm:$0xff] %vm1249_vm2, %v1029_v57  ;;  %1274 = vst.msk [vmem:[#allocation2 + $0xe1] sm:$0xff] %vm1249_vm2, %v1030_v8  ;;  %v1042_v53 = vmax.f32 %v767_v50, 0.0  ;;  %v3770_v50 = vmov 1966171168  }
 0x15c   :  { %1420 = vst.msk [vmem:[#allocation2 + $0xc1] sm:$0xff] %vm1396_vm3, %v1029_v57  ;;  %1421 = vst.msk [vmem:[#allocation2 + $0xc9] sm:$0xff] %vm1396_vm3, %v1030_v8  ;;  %v3418_v55 = vpop.f32.mrf.mxu0 }
 0x15d   :  { %1322 = vst.msk [vmem:[#allocation2 + $0xd8] sm:$0xff] %vm1298_vm5, %v1029_v57  ;;  %1323 = vst.msk [vmem:[#allocation2 + $0xe0] sm:$0xff] %vm1298_vm5, %v1030_v8  ;;  %v1045_v56 = vmax.f32 %v3418_v55, 0.0 }
 0x15e   :  { %1469 = vst.msk [vmem:[#allocation2 + $0xc0] sm:$0xff] %vm1445_vm6, %v1029_v57  ;;  %1470 = vst.msk [vmem:[#allocation2 + $0xc8] sm:$0xff] %vm1445_vm6, %v1030_v8  ;;  %v770_v59 = vpop.f32.mrf.mxu0 }
 0x15f   :  { %1371 = vst.msk [vmem:[#allocation2 + $0xd7] sm:$0xff] %vm1347_vm8, %v1029_v57  ;;  %1372 = vst.msk [vmem:[#allocation2 + $0xdf] sm:$0xff] %vm1347_vm8, %v1030_v8  ;;  %v1043_v61 = vmax.f32 %v770_v59, 0.0 }
 0x160   :  { %1518 = vst.msk [vmem:[#allocation2 + $0xbf] sm:$0xff] %vm1494_vm9, %v1029_v57  ;;  %1519 = vst.msk [vmem:[#allocation2 + $0xc7] sm:$0xff] %vm1494_vm9, %v1030_v8  ;;  %v3421_v62 = vpop.f32.mrf.mxu0 }
 0x161   :  { %1176 = vst.msk [vmem:[#allocation2 + $0xf8] sm:$0xff] %vm1151_vm4, %v1030_v8  ;;  %v2009_v23 = vld [vmem:[#allocation2 + $0xa8] sm:$0xff]  ;;  %v2010_v28 = vld [vmem:[#allocation2 + $0xb0] sm:$0xff]  ;;  %v4511_v63 = vmax.f32 %v3421_v62, 0.0 }
 0x162   :  { %1225 = vst.msk [vmem:[#allocation2 + $0xf7] sm:$0xff] %vm1200_vm7, %v1030_v8  ;;  %v2048_v25 = vpack.c.bf16 %v2009_v23, %v2008_v22  ;;  %v783_v0 = vpop.f32.mrf.mxu0 }
 0x163   :  { %1130 = vst.msk [vmem:[#allocation2 + $0x111] sm:$0xff] %vm1102_vm1, %v1033_v11  ;;  %1128 = vst.msk [vmem:[#allocation2 + $0x101] sm:$0xff] %vm1102_vm1, %v1031_v16  ;;  %v1046_v4 = vmax.f32 %v783_v0, 0.0 }
 0x164   :  { %1276 = vst.msk [vmem:[#allocation2 + $0xf1] sm:$0xff] %vm1249_vm2, %v4314_v3  ;;  %1275 = vst.msk [vmem:[#allocation2 + $0xe9] sm:$0xff] %vm1249_vm2, %v1031_v16  ;;  %3507 = vmatprep.mubr.bf16.mxu1 %v2048_v25  ;;  %v3422_v7 = vpop.f32.mrf.mxu0 }
 0x165   :  { %1423 = vst.msk [vmem:[#allocation2 + $0xd9] sm:$0xff] %vm1396_vm3, %v4314_v3  ;;  %1422 = vst.msk [vmem:[#allocation2 + $0xd1] sm:$0xff] %vm1396_vm3, %v1031_v16  ;;  %v1049_v8 = vmax.f32 %v3422_v7, 0.0 }
 0x166   :  { %1179 = vst.msk [vmem:[#allocation2 + $0x110] sm:$0xff] %vm1151_vm4, %v1033_v11  ;;  %1177 = vst.msk [vmem:[#allocation2 + $0x100] sm:$0xff] %vm1151_vm4, %v1031_v16 }
 0x167   :  { %1178 = vst.msk [vmem:[#allocation2 + $0x108] sm:$0xff] %vm1151_vm4, %v4314_v3  ;;  %v2011_v29 = vld [vmem:[#allocation2 + $0xb8] sm:$0xff]  ;;  %v2012_v37 = vld [vmem:[#allocation2 + $0xc0] sm:$0xff] }
 0x168   :  { %1324 = vst.msk [vmem:[#allocation2 + $0xe8] sm:$0xff] %vm1298_vm5, %v1031_v16  ;;  %1325 = vst.msk [vmem:[#allocation2 + $0xf0] sm:$0xff] %vm1298_vm5, %v4314_v3  ;;  %v2049_v31 = vpack.c.bf16 %v2011_v29, %v2010_v28  ;;  %v3727_v28 = vld [vmem:[%s5375_s0 + $0x160] sm:$0xff]   ;;  %v3728_v29 = vld [vmem:[%s5375_s0 + $0x168] sm:$0xff]  }
 0x169   :  { %1471 = vst.msk [vmem:[#allocation2 + $0xd0] sm:$0xff] %vm1445_vm6, %v1031_v16  ;;  %1472 = vst.msk [vmem:[#allocation2 + $0xd8] sm:$0xff] %vm1445_vm6, %v4314_v3  ;;  %3467 = vmatprep.mubr.bf16.mxu0 %v3727_v28 }
 0x16a   :  { %1226 = vst.msk [vmem:[#allocation2 + $0xff] sm:$0xff] %vm1200_vm7, %v1031_v16  ;;  %1227 = vst.msk [vmem:[#allocation2 + $0x107] sm:$0xff] %vm1200_vm7, %v4314_v3  ;;  %3508 = vmatmul.mubr.bf16.gmra.mxu1 %v2049_v31  ;;  %3468 = vmatmul.mubr.bf16.gmra.mxu0 %v3728_v29 }
 0x16b   :  { %1373 = vst.msk [vmem:[#allocation2 + $0xe7] sm:$0xff] %vm1347_vm8, %v1031_v16  ;;  %1374 = vst.msk [vmem:[#allocation2 + $0xef] sm:$0xff] %vm1347_vm8, %v4314_v3  ;;  %3471 = vmatprep.mubr.bf16.mxu0 %v3729_v36 }
 0x16c   :  { %1228 = vst.msk [vmem:[#allocation2 + $0x10f] sm:$0xff] %vm1200_vm7, %v1033_v11 }
 0x16d   :  { %1133 = vst.msk [vmem:[#allocation2 + $0x129] sm:$0xff] %vm1102_vm1, %v4367_v20  ;;  %1131 = vst.msk [vmem:[#allocation2 + $0x119] sm:$0xff] %vm1102_vm1, %v1034_v24 }
 0x16e   :  { %1520 = vst.msk [vmem:[#allocation2 + $0xcf] sm:$0xff] %vm1494_vm9, %v1031_v16  ;;  %1521 = vst.msk [vmem:[#allocation2 + $0xd7] sm:$0xff] %vm1494_vm9, %v4314_v3 }
 0x16f   :  { %1277 = vst.msk [vmem:[#allocation2 + $0xf9] sm:$0xff] %vm1249_vm2, %v1033_v11  ;;  %1278 = vst.msk [vmem:[#allocation2 + $0x101] sm:$0xff] %vm1249_vm2, %v1034_v24 }
 0x170   :  { %1424 = vst.msk [vmem:[#allocation2 + $0xe1] sm:$0xff] %vm1396_vm3, %v1033_v11  ;;  %1425 = vst.msk [vmem:[#allocation2 + $0xe9] sm:$0xff] %vm1396_vm3, %v1034_v24 }
 0x171   :  { %1326 = vst.msk [vmem:[#allocation2 + $0xf8] sm:$0xff] %vm1298_vm5, %v1033_v11  ;;  %1327 = vst.msk [vmem:[#allocation2 + $0x100] sm:$0xff] %vm1298_vm5, %v1034_v24 }
 0x172   :  { %1473 = vst.msk [vmem:[#allocation2 + $0xe0] sm:$0xff] %vm1445_vm6, %v1033_v11  ;;  %1474 = vst.msk [vmem:[#allocation2 + $0xe8] sm:$0xff] %vm1445_vm6, %v1034_v24 }
 0x173   :  { %1375 = vst.msk [vmem:[#allocation2 + $0xf7] sm:$0xff] %vm1347_vm8, %v1033_v11  ;;  %1376 = vst.msk [vmem:[#allocation2 + $0xff] sm:$0xff] %vm1347_vm8, %v1034_v24 }
 0x174   :  { %1522 = vst.msk [vmem:[#allocation2 + $0xdf] sm:$0xff] %vm1494_vm9, %v1033_v11  ;;  %1523 = vst.msk [vmem:[#allocation2 + $0xe7] sm:$0xff] %vm1494_vm9, %v1034_v24  ;;  %v786_v11 = vpop.f32.mrf.mxu0 }
 0x175   :  { %1180 = vst.msk [vmem:[#allocation2 + $0x118] sm:$0xff] %vm1151_vm4, %v1034_v24  ;;  %v2013_v38 = vld [vmem:[#allocation2 + $0xc8] sm:$0xff]  ;;  %v2014_v43 = vld [vmem:[#allocation2 + $0xd0] sm:$0xff]  ;;  %v1047_v13 = vmax.f32 %v786_v11, 0.0 }
 0x176   :  { %1229 = vst.msk [vmem:[#allocation2 + $0x117] sm:$0xff] %vm1200_vm7, %v1034_v24  ;;  %v2050_v40 = vpack.c.bf16 %v2013_v38, %v2012_v37  ;;  %v3425_v14 = vpop.f32.mrf.mxu0  ;;  %v3730_v37 = vld [vmem:[%s5375_s0 + $0x178] sm:$0xff]  }
 0x177   :  { %1134 = vst.msk [vmem:[#allocation2 + $0x131] sm:$0xff] %vm1102_vm1, %v1037_v27  ;;  %1132 = vst.msk [vmem:[#allocation2 + $0x121] sm:$0xff] %vm1102_vm1, %v1035_v32  ;;  %v1052_v15 = vmax.f32 %v3425_v14, 0.0  ;;  %3472 = vmatmul.mubr.bf16.gmra.mxu0 %v3730_v37 }
 0x178   :  { %1280 = vst.msk [vmem:[#allocation2 + $0x111] sm:$0xff] %vm1249_vm2, %v4367_v20  ;;  %1279 = vst.msk [vmem:[#allocation2 + $0x109] sm:$0xff] %vm1249_vm2, %v1035_v32  ;;  %3511 = vmatprep.mubr.bf16.mxu1 %v2050_v40  ;;  %v799_v16 = vpop.f32.mrf.mxu0 }
 0x179   :  { %1427 = vst.msk [vmem:[#allocation2 + $0xf9] sm:$0xff] %vm1396_vm3, %v4367_v20  ;;  %1426 = vst.msk [vmem:[#allocation2 + $0xf1] sm:$0xff] %vm1396_vm3, %v1035_v32  ;;  %v1050_v19 = vmax.f32 %v799_v16, 0.0 }
 0x17a   :  { %1183 = vst.msk [vmem:[#allocation2 + $0x130] sm:$0xff] %vm1151_vm4, %v1037_v27  ;;  %1181 = vst.msk [vmem:[#allocation2 + $0x120] sm:$0xff] %vm1151_vm4, %v1035_v32  ;;  %v3426_v21 = vpop.f32.mrf.mxu0 }
 0x17b   :  { %1182 = vst.msk [vmem:[#allocation2 + $0x128] sm:$0xff] %vm1151_vm4, %v4367_v20  ;;  %v2015_v44 = vld [vmem:[#allocation2 + $0xd8] sm:$0xff]  ;;  %v2016_v51 = vld [vmem:[#allocation2 + $0xe0] sm:$0xff]  ;;  %v1053_v22 = vmax.f32 %v3426_v21, 0.0 }
 0x17c   :  { %1328 = vst.msk [vmem:[#allocation2 + $0x108] sm:$0xff] %vm1298_vm5, %v1035_v32  ;;  %1329 = vst.msk [vmem:[#allocation2 + $0x110] sm:$0xff] %vm1298_vm5, %v4367_v20  ;;  %v2051_v46 = vpack.c.bf16 %v2015_v44, %v2014_v43  ;;  %v802_v25 = vpop.f32.mrf.mxu0 }
 0x17d   :  { %1475 = vst.msk [vmem:[#allocation2 + $0xf0] sm:$0xff] %vm1445_vm6, %v1035_v32  ;;  %1476 = vst.msk [vmem:[#allocation2 + $0xf8] sm:$0xff] %vm1445_vm6, %v4367_v20 }
 0x17e   :  { %1230 = vst.msk [vmem:[#allocation2 + $0x11f] sm:$0xff] %vm1200_vm7, %v1035_v32  ;;  %1231 = vst.msk [vmem:[#allocation2 + $0x127] sm:$0xff] %vm1200_vm7, %v4367_v20  ;;  %3512 = vmatmul.mubr.bf16.gmra.mxu1 %v2051_v46  ;;  %v3429_v59 = vpop.f32.mrf.mxu0 }
 0x17f   :  { %1377 = vst.msk [vmem:[#allocation2 + $0x107] sm:$0xff] %vm1347_vm8, %v1035_v32  ;;  %1378 = vst.msk [vmem:[#allocation2 + $0x10f] sm:$0xff] %vm1347_vm8, %v4367_v20 }
 0x180   :  { %1232 = vst.msk [vmem:[#allocation2 + $0x12f] sm:$0xff] %vm1200_vm7, %v1037_v27 }
 0x181   :  { %1137 = vst.msk [vmem:[#allocation2 + $0x149] sm:$0xff] %vm1102_vm1, %v4417_v35  ;;  %1135 = vst.msk [vmem:[#allocation2 + $0x139] sm:$0xff] %vm1102_vm1, %v1038_v39 }
 0x182   :  { %1524 = vst.msk [vmem:[#allocation2 + $0xef] sm:$0xff] %vm1494_vm9, %v1035_v32  ;;  %1525 = vst.msk [vmem:[#allocation2 + $0xf7] sm:$0xff] %vm1494_vm9, %v4367_v20 }
 0x183   :  { %1281 = vst.msk [vmem:[#allocation2 + $0x119] sm:$0xff] %vm1249_vm2, %v1037_v27  ;;  %1282 = vst.msk [vmem:[#allocation2 + $0x121] sm:$0xff] %vm1249_vm2, %v1038_v39 }
 0x184   :  { %1428 = vst.msk [vmem:[#allocation2 + $0x101] sm:$0xff] %vm1396_vm3, %v1037_v27  ;;  %1429 = vst.msk [vmem:[#allocation2 + $0x109] sm:$0xff] %vm1396_vm3, %v1038_v39 }
 0x185   :  { %1330 = vst.msk [vmem:[#allocation2 + $0x118] sm:$0xff] %vm1298_vm5, %v1037_v27  ;;  %1331 = vst.msk [vmem:[#allocation2 + $0x120] sm:$0xff] %vm1298_vm5, %v1038_v39 }
 0x186   :  { %1477 = vst.msk [vmem:[#allocation2 + $0x100] sm:$0xff] %vm1445_vm6, %v1037_v27  ;;  %1478 = vst.msk [vmem:[#allocation2 + $0x108] sm:$0xff] %vm1445_vm6, %v1038_v39 }
 0x187   :  { %1379 = vst.msk [vmem:[#allocation2 + $0x117] sm:$0xff] %vm1347_vm8, %v1037_v27  ;;  %1380 = vst.msk [vmem:[#allocation2 + $0x11f] sm:$0xff] %vm1347_vm8, %v1038_v39 }
 0x188   :  { %1526 = vst.msk [vmem:[#allocation2 + $0xff] sm:$0xff] %vm1494_vm9, %v1037_v27  ;;  %1527 = vst.msk [vmem:[#allocation2 + $0x107] sm:$0xff] %vm1494_vm9, %v1038_v39  ;;  %v1051_v27 = vmax.f32 %v802_v25, 0.0 }
 0x189   :  { %1184 = vst.msk [vmem:[#allocation2 + $0x138] sm:$0xff] %vm1151_vm4, %v1038_v39  ;;  %v2017_v52 = vld [vmem:[#allocation2 + $0xe8] sm:$0xff]  ;;  %v2018_v57 = vld [vmem:[#allocation2 + $0xf0] sm:$0xff] }
 0x18a   :  { %1233 = vst.msk [vmem:[#allocation2 + $0x137] sm:$0xff] %vm1200_vm7, %v1038_v39  ;;  %v2052_v54 = vpack.c.bf16 %v2017_v52, %v2016_v51  ;;  %v2419_v51 = vunpack.c.l.s4 %v3770_v50 }
 0x18b   :  { %1138 = vst.msk [vmem:[#allocation2 + $0x151] sm:$0xff] %vm1102_vm1, %v1041_v42  ;;  %1136 = vst.msk [vmem:[#allocation2 + $0x141] sm:$0xff] %vm1102_vm1, %v1039_v47 }
 0x18c   :  { %1284 = vst.msk [vmem:[#allocation2 + $0x131] sm:$0xff] %vm1249_vm2, %v4417_v35  ;;  %1283 = vst.msk [vmem:[#allocation2 + $0x129] sm:$0xff] %vm1249_vm2, %v1039_v47  ;;  %3515 = vmatprep.mubr.bf16.mxu1 %v2052_v54  ;;  %v2420_v52 = vunpack.c.0.s8 %v2419_v51  ;;  %v3162_v54 = vld.sshfl [vmem:[%s5378_s3] sm:$0x13 pattern:$0x75316420] }
 0x18d   :  { %1431 = vst.msk [vmem:[#allocation2 + $0x119] sm:$0xff] %vm1396_vm3, %v4417_v35  ;;  %1430 = vst.msk [vmem:[#allocation2 + $0x111] sm:$0xff] %vm1396_vm3, %v1039_v47  ;;  %v2417_v55 = vcombine.high %v3162_v54, %v3162_v54 }
 0x18e   :  { %1187 = vst.msk [vmem:[#allocation2 + $0x150] sm:$0xff] %vm1151_vm4, %v1041_v42  ;;  %1185 = vst.msk [vmem:[#allocation2 + $0x140] sm:$0xff] %vm1151_vm4, %v1039_v47 }
 0x18f   :  { %1186 = vst.msk [vmem:[#allocation2 + $0x148] sm:$0xff] %vm1151_vm4, %v4417_v35  ;;  %v2019_v58 = vld [vmem:[#allocation2 + $0xf8] sm:$0xff]  ;;  %v2020_v2 = vld [vmem:[#allocation2 + $0x100] sm:$0xff] }
 0x190   :  { %1332 = vst.msk [vmem:[#allocation2 + $0x128] sm:$0xff] %vm1298_vm5, %v1039_v47  ;;  %1333 = vst.msk [vmem:[#allocation2 + $0x130] sm:$0xff] %vm1298_vm5, %v4417_v35  ;;  %v2053_v60 = vpack.c.bf16 %v2019_v58, %v2018_v57 }
 0x191   :  { %1479 = vst.msk [vmem:[#allocation2 + $0x110] sm:$0xff] %vm1445_vm6, %v1039_v47  ;;  %1480 = vst.msk [vmem:[#allocation2 + $0x118] sm:$0xff] %vm1445_vm6, %v4417_v35 }
 0x192   :  { %1234 = vst.msk [vmem:[#allocation2 + $0x13f] sm:$0xff] %vm1200_vm7, %v1039_v47  ;;  %1235 = vst.msk [vmem:[#allocation2 + $0x147] sm:$0xff] %vm1200_vm7, %v4417_v35  ;;  %3516 = vmatmul.mubr.bf16.gmra.mxu1 %v2053_v60  ;;  %v1056_v60 = vmax.f32 %v3429_v59, 0.0 }
 0x193   :  { %1381 = vst.msk [vmem:[#allocation2 + $0x127] sm:$0xff] %vm1347_vm8, %v1039_v47  ;;  %1382 = vst.msk [vmem:[#allocation2 + $0x12f] sm:$0xff] %vm1347_vm8, %v4417_v35 }
 0x194   :  { %1236 = vst.msk [vmem:[#allocation2 + $0x14f] sm:$0xff] %vm1200_vm7, %v1041_v42 }
 0x195   :  { %1141 = vst.msk [vmem:[#allocation2 + $0x169] sm:$0xff] %vm1102_vm1, %v4464_v49  ;;  %1139 = vst.msk [vmem:[#allocation2 + $0x159] sm:$0xff] %vm1102_vm1, %v1042_v53 }
 0x196   :  { %1528 = vst.msk [vmem:[#allocation2 + $0x10f] sm:$0xff] %vm1494_vm9, %v1039_v47  ;;  %1529 = vst.msk [vmem:[#allocation2 + $0x117] sm:$0xff] %vm1494_vm9, %v4417_v35 }
 0x197   :  { %1285 = vst.msk [vmem:[#allocation2 + $0x139] sm:$0xff] %vm1249_vm2, %v1041_v42  ;;  %1286 = vst.msk [vmem:[#allocation2 + $0x141] sm:$0xff] %vm1249_vm2, %v1042_v53 }
 0x198   :  { %1432 = vst.msk [vmem:[#allocation2 + $0x121] sm:$0xff] %vm1396_vm3, %v1041_v42  ;;  %1433 = vst.msk [vmem:[#allocation2 + $0x129] sm:$0xff] %vm1396_vm3, %v1042_v53 }
 0x199   :  { %1334 = vst.msk [vmem:[#allocation2 + $0x138] sm:$0xff] %vm1298_vm5, %v1041_v42  ;;  %1335 = vst.msk [vmem:[#allocation2 + $0x140] sm:$0xff] %vm1298_vm5, %v1042_v53 }
 0x19a   :  { %1481 = vst.msk [vmem:[#allocation2 + $0x120] sm:$0xff] %vm1445_vm6, %v1041_v42  ;;  %1482 = vst.msk [vmem:[#allocation2 + $0x128] sm:$0xff] %vm1445_vm6, %v1042_v53 }
 0x19b   :  { %1383 = vst.msk [vmem:[#allocation2 + $0x137] sm:$0xff] %vm1347_vm8, %v1041_v42  ;;  %1384 = vst.msk [vmem:[#allocation2 + $0x13f] sm:$0xff] %vm1347_vm8, %v1042_v53 }
 0x19c   :  { %1530 = vst.msk [vmem:[#allocation2 + $0x11f] sm:$0xff] %vm1494_vm9, %v1041_v42  ;;  %1531 = vst.msk [vmem:[#allocation2 + $0x127] sm:$0xff] %vm1494_vm9, %v1042_v53 }
 0x19d   :  { %1188 = vst.msk [vmem:[#allocation2 + $0x158] sm:$0xff] %vm1151_vm4, %v1042_v53  ;;  %v2021_v3 = vld [vmem:[#allocation2 + $0x108] sm:$0xff]  ;;  %v2022_v9 = vld [vmem:[#allocation2 + $0x110] sm:$0xff] }
 0x19e   :  { %1237 = vst.msk [vmem:[#allocation2 + $0x157] sm:$0xff] %vm1200_vm7, %v1042_v53  ;;  %v2054_v6 = vpack.c.bf16 %v2021_v3, %v2020_v2  ;;  %v2422_v53 = vshrl.u32 %v25_v1, 7 }
 0x19f   :  { %1142 = vst.msk [vmem:[#allocation2 + $0x171] sm:$0xff] %vm1102_vm1, %v1045_v56  ;;  %1140 = vst.msk [vmem:[#allocation2 + $0x161] sm:$0xff] %vm1102_vm1, %v1043_v61 }
 0x1a0   :  { %1288 = vst.msk [vmem:[#allocation2 + $0x151] sm:$0xff] %vm1249_vm2, %v4464_v49  ;;  %1287 = vst.msk [vmem:[#allocation2 + $0x149] sm:$0xff] %vm1249_vm2, %v1043_v61  ;;  %3519 = vmatprep.mubr.bf16.mxu1 %v2054_v6 }
 0x1a1   :  { %1435 = vst.msk [vmem:[#allocation2 + $0x139] sm:$0xff] %vm1396_vm3, %v4464_v49  ;;  %1434 = vst.msk [vmem:[#allocation2 + $0x131] sm:$0xff] %vm1396_vm3, %v1043_v61 }
 0x1a2   :  { %1191 = vst.msk [vmem:[#allocation2 + $0x170] sm:$0xff] %vm1151_vm4, %v1045_v56  ;;  %1189 = vst.msk [vmem:[#allocation2 + $0x160] sm:$0xff] %vm1151_vm4, %v1043_v61 }
 0x1a3   :  { %1190 = vst.msk [vmem:[#allocation2 + $0x168] sm:$0xff] %vm1151_vm4, %v4464_v49  ;;  %v2023_v10 = vld [vmem:[#allocation2 + $0x118] sm:$0xff]  ;;  %v2024_v17 = vld [vmem:[#allocation2 + $0x120] sm:$0xff] }
 0x1a4   :  { %1336 = vst.msk [vmem:[#allocation2 + $0x148] sm:$0xff] %vm1298_vm5, %v1043_v61  ;;  %1337 = vst.msk [vmem:[#allocation2 + $0x150] sm:$0xff] %vm1298_vm5, %v4464_v49  ;;  %v2055_v12 = vpack.c.bf16 %v2023_v10, %v2022_v9 }
 0x1a5   :  { %1483 = vst.msk [vmem:[#allocation2 + $0x130] sm:$0xff] %vm1445_vm6, %v1043_v61  ;;  %1484 = vst.msk [vmem:[#allocation2 + $0x138] sm:$0xff] %vm1445_vm6, %v4464_v49 }
 0x1a6   :  { %1238 = vst.msk [vmem:[#allocation2 + $0x15f] sm:$0xff] %vm1200_vm7, %v1043_v61  ;;  %1239 = vst.msk [vmem:[#allocation2 + $0x167] sm:$0xff] %vm1200_vm7, %v4464_v49  ;;  %3520 = vmatmul.mubr.bf16.gmra.mxu1 %v2055_v12 }
 0x1a7   :  { %1385 = vst.msk [vmem:[#allocation2 + $0x147] sm:$0xff] %vm1347_vm8, %v1043_v61  ;;  %1386 = vst.msk [vmem:[#allocation2 + $0x14f] sm:$0xff] %vm1347_vm8, %v4464_v49 }
 0x1a8   :  { %1240 = vst.msk [vmem:[#allocation2 + $0x16f] sm:$0xff] %vm1200_vm7, %v1045_v56 }
 0x1a9   :  { %1145 = vst.msk [vmem:[#allocation2 + $0x189] sm:$0xff] %vm1102_vm1, %v4511_v63  ;;  %1143 = vst.msk [vmem:[#allocation2 + $0x179] sm:$0xff] %vm1102_vm1, %v1046_v4 }
 0x1aa   :  { %1532 = vst.msk [vmem:[#allocation2 + $0x12f] sm:$0xff] %vm1494_vm9, %v1043_v61  ;;  %1533 = vst.msk [vmem:[#allocation2 + $0x137] sm:$0xff] %vm1494_vm9, %v4464_v49  ;;  %v815_v61 = vpop.f32.mrf.mxu0 }
 0x1ab   :  { %1289 = vst.msk [vmem:[#allocation2 + $0x159] sm:$0xff] %vm1249_vm2, %v1045_v56  ;;  %1290 = vst.msk [vmem:[#allocation2 + $0x161] sm:$0xff] %vm1249_vm2, %v1046_v4  ;;  %v1054_v62 = vmax.f32 %v815_v61, 0.0 }
 0x1ac   :  { %1436 = vst.msk [vmem:[#allocation2 + $0x141] sm:$0xff] %vm1396_vm3, %v1045_v56  ;;  %1437 = vst.msk [vmem:[#allocation2 + $0x149] sm:$0xff] %vm1396_vm3, %v1046_v4 }
 0x1ad   :  { %1338 = vst.msk [vmem:[#allocation2 + $0x158] sm:$0xff] %vm1298_vm5, %v1045_v56  ;;  %1339 = vst.msk [vmem:[#allocation2 + $0x160] sm:$0xff] %vm1298_vm5, %v1046_v4 }
 0x1ae   :  { %1485 = vst.msk [vmem:[#allocation2 + $0x140] sm:$0xff] %vm1445_vm6, %v1045_v56  ;;  %1486 = vst.msk [vmem:[#allocation2 + $0x148] sm:$0xff] %vm1445_vm6, %v1046_v4 }
 0x1af   :  { %1387 = vst.msk [vmem:[#allocation2 + $0x157] sm:$0xff] %vm1347_vm8, %v1045_v56  ;;  %1388 = vst.msk [vmem:[#allocation2 + $0x15f] sm:$0xff] %vm1347_vm8, %v1046_v4 }
 0x1b0   :  { %1534 = vst.msk [vmem:[#allocation2 + $0x13f] sm:$0xff] %vm1494_vm9, %v1045_v56  ;;  %1535 = vst.msk [vmem:[#allocation2 + $0x147] sm:$0xff] %vm1494_vm9, %v1046_v4  ;;  %v2423_v56 = vsub.s32 %v2420_v52, %v2422_v53 }
 0x1b1   :  { %1192 = vst.msk [vmem:[#allocation2 + $0x178] sm:$0xff] %vm1151_vm4, %v1046_v4  ;;  %v2025_v18 = vld [vmem:[#allocation2 + $0x128] sm:$0xff]  ;;  %v2026_v23 = vld [vmem:[#allocation2 + $0x130] sm:$0xff] }
 0x1b2   :  { %1241 = vst.msk [vmem:[#allocation2 + $0x177] sm:$0xff] %vm1200_vm7, %v1046_v4  ;;  %v2056_v20 = vpack.c.bf16 %v2025_v18, %v2024_v17  ;;  %v2431_v57 = vrot.slane %v2417_v55, %v2423_v56  ;;  %v4627_v58 = vrot.slane %v3162_v54, %v2423_v56 }
 0x1b3   :  { %1146 = vst.msk [vmem:[#allocation2 + $0x191] sm:$0xff] %vm1102_vm1, %v1049_v8  ;;  %1144 = vst.msk [vmem:[#allocation2 + $0x181] sm:$0xff] %vm1102_vm1, %v1047_v13 }
 0x1b4   :  { %1292 = vst.msk [vmem:[#allocation2 + $0x171] sm:$0xff] %vm1249_vm2, %v4511_v63  ;;  %1291 = vst.msk [vmem:[#allocation2 + $0x169] sm:$0xff] %vm1249_vm2, %v1047_v13  ;;  %3523 = vmatprep.mubr.bf16.mxu1 %v2056_v20  ;;  %2917 = vmatprep.mubr.bf16.mxu0 %v2431_v57 }
 0x1b5   :  { %1439 = vst.msk [vmem:[#allocation2 + $0x159] sm:$0xff] %vm1396_vm3, %v4511_v63  ;;  %1438 = vst.msk [vmem:[#allocation2 + $0x151] sm:$0xff] %vm1396_vm3, %v1047_v13 }
 0x1b6   :  { %1195 = vst.msk [vmem:[#allocation2 + $0x190] sm:$0xff] %vm1151_vm4, %v1049_v8  ;;  %1193 = vst.msk [vmem:[#allocation2 + $0x180] sm:$0xff] %vm1151_vm4, %v1047_v13 }
 0x1b7   :  { %1194 = vst.msk [vmem:[#allocation2 + $0x188] sm:$0xff] %vm1151_vm4, %v4511_v63  ;;  %v2027_v24 = vld [vmem:[#allocation2 + $0x138] sm:$0xff]  ;;  %v2028_v30 = vld [vmem:[#allocation2 + $0x140] sm:$0xff] }
 0x1b8   :  { %1340 = vst.msk [vmem:[#allocation2 + $0x168] sm:$0xff] %vm1298_vm5, %v1047_v13  ;;  %1341 = vst.msk [vmem:[#allocation2 + $0x170] sm:$0xff] %vm1298_vm5, %v4511_v63  ;;  %v2057_v26 = vpack.c.bf16 %v2027_v24, %v2026_v23 }
 0x1b9   :  { %1487 = vst.msk [vmem:[#allocation2 + $0x150] sm:$0xff] %vm1445_vm6, %v1047_v13  ;;  %1488 = vst.msk [vmem:[#allocation2 + $0x158] sm:$0xff] %vm1445_vm6, %v4511_v63 }
 0x1ba   :  { %1242 = vst.msk [vmem:[#allocation2 + $0x17f] sm:$0xff] %vm1200_vm7, %v1047_v13  ;;  %1243 = vst.msk [vmem:[#allocation2 + $0x187] sm:$0xff] %vm1200_vm7, %v4511_v63  ;;  %3524 = vmatmul.mubr.bf16.gmra.mxu1 %v2057_v26 }
 0x1bb   :  { %1389 = vst.msk [vmem:[#allocation2 + $0x167] sm:$0xff] %vm1347_vm8, %v1047_v13  ;;  %1390 = vst.msk [vmem:[#allocation2 + $0x16f] sm:$0xff] %vm1347_vm8, %v4511_v63 }
 0x1bc   :  { %1244 = vst.msk [vmem:[#allocation2 + $0x18f] sm:$0xff] %vm1200_vm7, %v1049_v8 }
 0x1bd   :  { %1536 = vst.msk [vmem:[#allocation2 + $0x14f] sm:$0xff] %vm1494_vm9, %v1047_v13  ;;  %1537 = vst.msk [vmem:[#allocation2 + $0x157] sm:$0xff] %vm1494_vm9, %v4511_v63  ;;  %v3430_v63 = vpop.f32.mrf.mxu0 }
 0x1be   :  { %1293 = vst.msk [vmem:[#allocation2 + $0x179] sm:$0xff] %vm1249_vm2, %v1049_v8  ;;  %1294 = vst.msk [vmem:[#allocation2 + $0x181] sm:$0xff] %vm1249_vm2, %v1050_v19  ;;  %v1057_v1 = vmax.f32 %v3430_v63, 0.0 }
 0x1bf   :  { %1440 = vst.msk [vmem:[#allocation2 + $0x161] sm:$0xff] %vm1396_vm3, %v1049_v8  ;;  %1441 = vst.msk [vmem:[#allocation2 + $0x169] sm:$0xff] %vm1396_vm3, %v1050_v19  ;;  %v818_v0 = vpop.f32.mrf.mxu0 }
 0x1c0   :  { %1342 = vst.msk [vmem:[#allocation2 + $0x178] sm:$0xff] %vm1298_vm5, %v1049_v8  ;;  %1343 = vst.msk [vmem:[#allocation2 + $0x180] sm:$0xff] %vm1298_vm5, %v1050_v19  ;;  %v1055_v2 = vmax.f32 %v818_v0, 0.0 }
 0x1c1   :  { %1489 = vst.msk [vmem:[#allocation2 + $0x160] sm:$0xff] %vm1445_vm6, %v1049_v8  ;;  %1490 = vst.msk [vmem:[#allocation2 + $0x168] sm:$0xff] %vm1445_vm6, %v1050_v19  ;;  %v3433_v3 = vpop.f32.mrf.mxu0 }
 0x1c2   :  { %1147 = vst.msk [vmem:[#allocation2 + $0x199] sm:$0xff] %vm1102_vm1, %v1050_v19  ;;  %1545 = vst.msk [vmem:[#allocation2 + $0x209] sm:$0xff] %vm1102_vm1, %v1056_v60  ;;  %v1060_v4 = vmax.f32 %v3433_v3, 0.0 }
 0x1c3   :  { %1391 = vst.msk [vmem:[#allocation2 + $0x177] sm:$0xff] %vm1347_vm8, %v1049_v8  ;;  %1392 = vst.msk [vmem:[#allocation2 + $0x17f] sm:$0xff] %vm1347_vm8, %v1050_v19  ;;  %v831_v6 = vpop.f32.mrf.mxu0 }
 0x1c4   :  { %1538 = vst.msk [vmem:[#allocation2 + $0x15f] sm:$0xff] %vm1494_vm9, %v1049_v8  ;;  %1539 = vst.msk [vmem:[#allocation2 + $0x167] sm:$0xff] %vm1494_vm9, %v1050_v19  ;;  %v2029_v31 = vld [vmem:[#allocation2 + $0x148] sm:$0xff]  ;;  %v2030_v33 = vld [vmem:[#allocation2 + $0x150] sm:$0xff]  ;;  %v1058_v7 = vmax.f32 %v831_v6, 0.0 }
 0x1c5   :  { %1196 = vst.msk [vmem:[#allocation2 + $0x198] sm:$0xff] %vm1151_vm4, %v1050_v19  ;;  %v2058_v32 = vpack.c.bf16 %v2029_v31, %v2028_v30  ;;  %v3434_v8 = vpop.f32.mrf.mxu0 }
 0x1c6   :  { %1245 = vst.msk [vmem:[#allocation2 + $0x197] sm:$0xff] %vm1200_vm7, %v1050_v19  ;;  %1246 = vst.msk [vmem:[#allocation2 + $0x19f] sm:$0xff] %vm1200_vm7, %v1051_v27  ;;  %v1061_v9 = vmax.f32 %v3434_v8, 0.0 }
 0x1c7   :  { %1296 = vst.msk [vmem:[#allocation2 + $0x191] sm:$0xff] %vm1249_vm2, %v1052_v15  ;;  %1295 = vst.msk [vmem:[#allocation2 + $0x189] sm:$0xff] %vm1249_vm2, %v1051_v27  ;;  %3527 = vmatprep.mubr.bf16.mxu1 %v2058_v32  ;;  %v834_v10 = vpop.f32.mrf.mxu0 }
 0x1c8   :  { %1443 = vst.msk [vmem:[#allocation2 + $0x179] sm:$0xff] %vm1396_vm3, %v1052_v15  ;;  %1442 = vst.msk [vmem:[#allocation2 + $0x171] sm:$0xff] %vm1396_vm3, %v1051_v27  ;;  %v1059_v11 = vmax.f32 %v834_v10, 0.0 }
 0x1c9   :  { %1344 = vst.msk [vmem:[#allocation2 + $0x188] sm:$0xff] %vm1298_vm5, %v1051_v27  ;;  %1345 = vst.msk [vmem:[#allocation2 + $0x190] sm:$0xff] %vm1298_vm5, %v1052_v15  ;;  %v3437_v13 = vpop.f32.mrf.mxu0 }
 0x1ca   :  { %1491 = vst.msk [vmem:[#allocation2 + $0x170] sm:$0xff] %vm1445_vm6, %v1051_v27  ;;  %1492 = vst.msk [vmem:[#allocation2 + $0x178] sm:$0xff] %vm1445_vm6, %v1052_v15  ;;  %v4674_v14 = vmax.f32 %v3437_v13, 0.0 }
 0x1cb   :  { %1393 = vst.msk [vmem:[#allocation2 + $0x187] sm:$0xff] %vm1347_vm8, %v1051_v27  ;;  %1394 = vst.msk [vmem:[#allocation2 + $0x18f] sm:$0xff] %vm1347_vm8, %v1052_v15  ;;  %v2031_v34 = vld [vmem:[#allocation2 + $0x158] sm:$0xff]  ;;  %v2032_v38 = vld [vmem:[#allocation2 + $0x160] sm:$0xff]  ;;  %v847_v16 = vpop.f32.mrf.mxu0 }
 0x1cc   :  { %1540 = vst.msk [vmem:[#allocation2 + $0x16f] sm:$0xff] %vm1494_vm9, %v1051_v27  ;;  %1541 = vst.msk [vmem:[#allocation2 + $0x177] sm:$0xff] %vm1494_vm9, %v1052_v15  ;;  %v2059_v35 = vpack.c.bf16 %v2031_v34, %v2030_v33  ;;  %v1062_v17 = vmax.f32 %v847_v16, 0.0 }
 0x1cd   :  { %1297 = vst.msk [vmem:[#allocation2 + $0x199] sm:$0xff] %vm1249_vm2, %v1053_v22  ;;  %1687 = vst.msk [vmem:[#allocation2 + $0x1e1] sm:$0xff] %vm1249_vm2, %v1054_v62  ;;  %v3438_v19 = vpop.f32.mrf.mxu0 }
 0x1ce   :  { %1444 = vst.msk [vmem:[#allocation2 + $0x181] sm:$0xff] %vm1396_vm3, %v1053_v22  ;;  %3528 = vmatmul.mubr.bf16.gmra.mxu1 %v2059_v35 }
 0x1cf   :  { %1346 = vst.msk [vmem:[#allocation2 + $0x198] sm:$0xff] %vm1298_vm5, %v1053_v22  ;;  %1735 = vst.msk [vmem:[#allocation2 + $0x1e0] sm:$0xff] %vm1298_vm5, %v1054_v62  ;;  %v850_v24 = vpop.f32.mrf.mxu0 }
 0x1d0   :  { %1493 = vst.msk [vmem:[#allocation2 + $0x180] sm:$0xff] %vm1445_vm6, %v1053_v22  ;;  %v1063_v28 = vmax.f32 %v850_v24, 0.0 }
 0x1d1   :  { %1395 = vst.msk [vmem:[#allocation2 + $0x197] sm:$0xff] %vm1347_vm8, %v1053_v22  ;;  %1783 = vst.msk [vmem:[#allocation2 + $0x1df] sm:$0xff] %vm1347_vm8, %v1054_v62  ;;  %v3441_v30 = vpop.f32.mrf.mxu0 }
 0x1d2   :  { %1542 = vst.msk [vmem:[#allocation2 + $0x17f] sm:$0xff] %vm1494_vm9, %v1053_v22  ;;  %v1065_v22 = vmax.f32 %v3438_v19, 0.0  ;;  %v4719_v32 = vmax.f32 %v3441_v30, 0.0 }
 0x1d3   :  { %v2033_v39 = vld [vmem:[#allocation2 + $0x168] sm:$0xff]  ;;  %v2034_v41 = vld [vmem:[#allocation2 + $0x170] sm:$0xff]  ;;  %1543 = vst.msk [vmem:[#allocation2 + $0x1f9] sm:$0xff] %vm1102_vm1, %v1054_v62  ;;  %1546 = vst.msk [vmem:[#allocation2 + $0x211] sm:$0xff] %vm1102_vm1, %v1057_v1  ;;  %v863_v34 = vpop.f32.mrf.mxu0 }
 0x1d4   :  { %v2060_v40 = vpack.c.bf16 %v2033_v39, %v2032_v38  ;;  %1591 = vst.msk [vmem:[#allocation2 + $0x1f8] sm:$0xff] %vm1151_vm4, %v1054_v62  ;;  %1594 = vst.msk [vmem:[#allocation2 + $0x210] sm:$0xff] %vm1151_vm4, %v1057_v1  ;;  %v1066_v35 = vmax.f32 %v863_v34, 0.0 }
 0x1d5   :  { %v2037_v44 = vld [vmem:[#allocation2 + $0x188] sm:$0xff]  ;;  %1639 = vst.msk [vmem:[#allocation2 + $0x1f7] sm:$0xff] %vm1200_vm7, %v1054_v62  ;;  %v3442_v37 = vpop.f32.mrf.mxu0 }
 0x1d6   :  { %3531 = vmatprep.mubr.bf16.mxu1 %v2060_v40  ;;  %1689 = vst.msk [vmem:[#allocation2 + $0x1f1] sm:$0xff] %vm1249_vm2, %v1056_v60  ;;  %1688 = vst.msk [vmem:[#allocation2 + $0x1e9] sm:$0xff] %vm1249_vm2, %v1055_v2  ;;  %v1069_v40 = vmax.f32 %v3442_v37, 0.0 }
 0x1d7   :  { %1833 = vst.msk [vmem:[#allocation2 + $0x1d9] sm:$0xff] %vm1396_vm3, %v1056_v60 }
 0x1d8   :  { %v2038_v47 = vld [vmem:[#allocation2 + $0x190] sm:$0xff]  ;;  %v2039_v48 = vld [vmem:[#allocation2 + $0x198] sm:$0xff]  ;;  %1544 = vst.msk [vmem:[#allocation2 + $0x201] sm:$0xff] %vm1102_vm1, %v1055_v2  ;;  %1549 = vst.msk [vmem:[#allocation2 + $0x229] sm:$0xff] %vm1102_vm1, %v1060_v4 }
 0x1d9   :  { %v2035_v42 = vld [vmem:[#allocation2 + $0x178] sm:$0xff]  ;;  %v2036_v43 = vld [vmem:[#allocation2 + $0x180] sm:$0xff]  ;;  %v2063_v49 = vpack.c.bf16 %v2039_v48, %v2038_v47  ;;  %1592 = vst.msk [vmem:[#allocation2 + $0x200] sm:$0xff] %vm1151_vm4, %v1055_v2  ;;  %1593 = vst.msk [vmem:[#allocation2 + $0x208] sm:$0xff] %vm1151_vm4, %v1056_v60 }
 0x1da   :  { %v2061_v45 = vpack.c.bf16 %v2035_v42, %v2034_v41  ;;  %v2062_v46 = vpack.c.bf16 %v2037_v44, %v2036_v43  ;;  %1736 = vst.msk [vmem:[#allocation2 + $0x1e8] sm:$0xff] %vm1298_vm5, %v1055_v2  ;;  %1737 = vst.msk [vmem:[#allocation2 + $0x1f0] sm:$0xff] %vm1298_vm5, %v1056_v60  ;;  %v3493_v12 = vpop.f32.mrf.mxu1  ;;  %v866_v42 = vpop.f32.mrf.mxu0 }
 0x1db   :  { %1640 = vst.msk [vmem:[#allocation2 + $0x1ff] sm:$0xff] %vm1200_vm7, %v1055_v2  ;;  %1641 = vst.msk [vmem:[#allocation2 + $0x207] sm:$0xff] %vm1200_vm7, %v1056_v60  ;;  %v2339_v20 = vmax.f32 %v3493_v12, 0.0 }
 0x1dc   :  { %3532 = vmatmul.mubr.bf16.gmra.mxu1 %v2061_v45  ;;  %1784 = vst.msk [vmem:[#allocation2 + $0x1e7] sm:$0xff] %vm1347_vm8, %v1055_v2  ;;  %1785 = vst.msk [vmem:[#allocation2 + $0x1ef] sm:$0xff] %vm1347_vm8, %v1056_v60  ;;  %v2146_v15 = vpop.f32.mrf.mxu1  ;;  %v3445_v48 = vpop.f32.mrf.mxu0 }
 0x1dd   :  { %3535 = vmatprep.mubr.bf16.mxu1 %v2062_v46  ;;  %1642 = vst.msk [vmem:[#allocation2 + $0x20f] sm:$0xff] %vm1200_vm7, %v1057_v1  ;;  %v2337_v25 = vmax.f32 %v2146_v15, 0.0  ;;  %v1067_v46 = vmax.f32 %v866_v42, 0.0  ;;  %v4772_v50 = vmax.f32 %v3445_v48, 0.0 }
 0x1de   :  { %1690 = vst.msk [vmem:[#allocation2 + $0x1f9] sm:$0xff] %vm1249_vm2, %v1057_v1  ;;  %1691 = vst.msk [vmem:[#allocation2 + $0x201] sm:$0xff] %vm1249_vm2, %v1058_v7  ;;  %v3494_v18 = vpop.f32.mrf.mxu1  ;;  %v879_v52 = vpop.f32.mrf.mxu0 }
 0x1df   :  { %1834 = vst.msk [vmem:[#allocation2 + $0x1e1] sm:$0xff] %vm1396_vm3, %v1057_v1  ;;  %1835 = vst.msk [vmem:[#allocation2 + $0x1e9] sm:$0xff] %vm1396_vm3, %v1058_v7  ;;  %v2340_v21 = vmax.f32 %v3494_v18, 0.0  ;;  %v1070_v53 = vmax.f32 %v879_v52, 0.0 }
 0x1e0   :  { %1738 = vst.msk [vmem:[#allocation2 + $0x1f8] sm:$0xff] %vm1298_vm5, %v1057_v1  ;;  %1739 = vst.msk [vmem:[#allocation2 + $0x200] sm:$0xff] %vm1298_vm5, %v1058_v7  ;;  %v2149_v23 = vpop.f32.mrf.mxu1  ;;  %v3446_v55 = vpop.f32.mrf.mxu0 }
 0x1e1   :  { %1882 = vst.msk [vmem:[#allocation2 + $0x1e0] sm:$0xff] %vm1445_vm6, %v1057_v1  ;;  %1883 = vst.msk [vmem:[#allocation2 + $0x1e8] sm:$0xff] %vm1445_vm6, %v1058_v7  ;;  %v4703_v26 = vpack.c.bf16 %v2340_v21, %v2339_v20  ;;  %v2338_v27 = vmax.f32 %v2149_v23, 0.0  ;;  %v1073_v56 = vmax.f32 %v3446_v55, 0.0 }
 0x1e2   :  { %1547 = vst.msk [vmem:[#allocation2 + $0x219] sm:$0xff] %vm1102_vm1, %v1058_v7  ;;  %1550 = vst.msk [vmem:[#allocation2 + $0x231] sm:$0xff] %vm1102_vm1, %v1061_v9  ;;  %v882_v59 = vpop.f32.mrf.mxu0 }
 0x1e3   :  { %1786 = vst.msk [vmem:[#allocation2 + $0x1f7] sm:$0xff] %vm1347_vm8, %v1057_v1  ;;  %1787 = vst.msk [vmem:[#allocation2 + $0x1ff] sm:$0xff] %vm1347_vm8, %v1058_v7  ;;  %v4714_v31 = vpack.c.bf16 %v2338_v27, %v2337_v25  ;;  %v1071_v60 = vmax.f32 %v882_v59, 0.0 }
 0x1e4   :  { %3536 = vmatmul.mubr.bf16.gmra.mxu1 %v2063_v49  ;;  %1930 = vst.msk [vmem:[#allocation2 + $0x1df] sm:$0xff] %vm1494_vm9, %v1057_v1  ;;  %1931 = vst.msk [vmem:[#allocation2 + $0x1e7] sm:$0xff] %vm1494_vm9, %v1058_v7  ;;  %v3449_v62 = vpop.f32.mrf.mxu0 }
 0x1e5   :  { %2468 = vmatprep.mubr.bf16.mxu1 %v2431_v57  ;;  %1595 = vst.msk [vmem:[#allocation2 + $0x218] sm:$0xff] %vm1151_vm4, %v1058_v7  ;;  %1598 = vst.msk [vmem:[#allocation2 + $0x230] sm:$0xff] %vm1151_vm4, %v1061_v9  ;;  %v4827_v63 = vmax.f32 %v3449_v62, 0.0 }
 0x1e6   :  { %1643 = vst.msk [vmem:[#allocation2 + $0x217] sm:$0xff] %vm1200_vm7, %v1058_v7  ;;  %v895_v0 = vpop.f32.mrf.mxu0 }
 0x1e7   :  { %1693 = vst.msk [vmem:[#allocation2 + $0x211] sm:$0xff] %vm1249_vm2, %v1060_v4  ;;  %1692 = vst.msk [vmem:[#allocation2 + $0x209] sm:$0xff] %vm1249_vm2, %v1059_v11  ;;  %v1074_v2 = vmax.f32 %v895_v0, 0.0 }
 0x1e8   :  { %1837 = vst.msk [vmem:[#allocation2 + $0x1f9] sm:$0xff] %vm1396_vm3, %v1060_v4  ;;  %1836 = vst.msk [vmem:[#allocation2 + $0x1f1] sm:$0xff] %vm1396_vm3, %v1059_v11 }
 0x1e9   :  { %1548 = vst.msk [vmem:[#allocation2 + $0x221] sm:$0xff] %vm1102_vm1, %v1059_v11  ;;  %1553 = vst.msk [vmem:[#allocation2 + $0x249] sm:$0xff] %vm1102_vm1, %v4674_v14 }
 0x1ea   :  { %1596 = vst.msk [vmem:[#allocation2 + $0x220] sm:$0xff] %vm1151_vm4, %v1059_v11  ;;  %1597 = vst.msk [vmem:[#allocation2 + $0x228] sm:$0xff] %vm1151_vm4, %v1060_v4 }
 0x1eb   :  { %1740 = vst.msk [vmem:[#allocation2 + $0x208] sm:$0xff] %vm1298_vm5, %v1059_v11  ;;  %1741 = vst.msk [vmem:[#allocation2 + $0x210] sm:$0xff] %vm1298_vm5, %v1060_v4 }
 0x1ec   :  { %1884 = vst.msk [vmem:[#allocation2 + $0x1f0] sm:$0xff] %vm1445_vm6, %v1059_v11  ;;  %1885 = vst.msk [vmem:[#allocation2 + $0x1f8] sm:$0xff] %vm1445_vm6, %v1060_v4 }
 0x1ed   :  { %1644 = vst.msk [vmem:[#allocation2 + $0x21f] sm:$0xff] %vm1200_vm7, %v1059_v11  ;;  %1645 = vst.msk [vmem:[#allocation2 + $0x227] sm:$0xff] %vm1200_vm7, %v1060_v4 }
 0x1ee   :  { %1788 = vst.msk [vmem:[#allocation2 + $0x207] sm:$0xff] %vm1347_vm8, %v1059_v11  ;;  %1789 = vst.msk [vmem:[#allocation2 + $0x20f] sm:$0xff] %vm1347_vm8, %v1060_v4  ;;  %v3497_v29 = vpop.f32.mrf.mxu1 }
 0x1ef   :  { %1646 = vst.msk [vmem:[#allocation2 + $0x22f] sm:$0xff] %vm1200_vm7, %v1061_v9  ;;  %v2343_v38 = vmax.f32 %v3497_v29, 0.0 }
 0x1f0   :  { %1932 = vst.msk [vmem:[#allocation2 + $0x1ef] sm:$0xff] %vm1494_vm9, %v1059_v11  ;;  %1933 = vst.msk [vmem:[#allocation2 + $0x1f7] sm:$0xff] %vm1494_vm9, %v1060_v4  ;;  %v2162_v33 = vpop.f32.mrf.mxu1  ;;  %v3450_v4 = vpop.f32.mrf.mxu0 }
 0x1f1   :  { %1838 = vst.msk [vmem:[#allocation2 + $0x201] sm:$0xff] %vm1396_vm3, %v1061_v9  ;;  %1839 = vst.msk [vmem:[#allocation2 + $0x209] sm:$0xff] %vm1396_vm3, %v1062_v17  ;;  %v2341_v43 = vmax.f32 %v2162_v33, 0.0  ;;  %v1077_v6 = vmax.f32 %v3450_v4, 0.0 }
 0x1f2   :  { %1694 = vst.msk [vmem:[#allocation2 + $0x219] sm:$0xff] %vm1249_vm2, %v1061_v9  ;;  %1695 = vst.msk [vmem:[#allocation2 + $0x221] sm:$0xff] %vm1249_vm2, %v1062_v17  ;;  %v3498_v36 = vpop.f32.mrf.mxu1  ;;  %v898_v8 = vpop.f32.mrf.mxu0 }
 0x1f3   :  { %1886 = vst.msk [vmem:[#allocation2 + $0x200] sm:$0xff] %vm1445_vm6, %v1061_v9  ;;  %1887 = vst.msk [vmem:[#allocation2 + $0x208] sm:$0xff] %vm1445_vm6, %v1062_v17  ;;  %v2344_v39 = vmax.f32 %v3498_v36, 0.0 }
 0x1f4   :  { %1742 = vst.msk [vmem:[#allocation2 + $0x218] sm:$0xff] %vm1298_vm5, %v1061_v9  ;;  %1743 = vst.msk [vmem:[#allocation2 + $0x220] sm:$0xff] %vm1298_vm5, %v1062_v17  ;;  %v2165_v41 = vpop.f32.mrf.mxu1  ;;  %v3453_v11 = vpop.f32.mrf.mxu0 }
 0x1f5   :  { %1551 = vst.msk [vmem:[#allocation2 + $0x239] sm:$0xff] %vm1102_vm1, %v1062_v17  ;;  %1554 = vst.msk [vmem:[#allocation2 + $0x251] sm:$0xff] %vm1102_vm1, %v1065_v22  ;;  %v4754_v44 = vpack.c.bf16 %v2344_v39, %v2343_v38  ;;  %v2342_v45 = vmax.f32 %v2165_v41, 0.0  ;;  %v4882_v12 = vmax.f32 %v3453_v11, 0.0 }
 0x1f6   :  { %1934 = vst.msk [vmem:[#allocation2 + $0x1ff] sm:$0xff] %vm1494_vm9, %v1061_v9  ;;  %1935 = vst.msk [vmem:[#allocation2 + $0x207] sm:$0xff] %vm1494_vm9, %v1062_v17 }
 0x1f7   :  { %1790 = vst.msk [vmem:[#allocation2 + $0x217] sm:$0xff] %vm1347_vm8, %v1061_v9  ;;  %1791 = vst.msk [vmem:[#allocation2 + $0x21f] sm:$0xff] %vm1347_vm8, %v1062_v17  ;;  %v4767_v49 = vpack.c.bf16 %v2342_v45, %v2341_v43  ;;  %v1075_v9 = vmax.f32 %v898_v8, 0.0 }
 0x1f8   :  { %1599 = vst.msk [vmem:[#allocation2 + $0x238] sm:$0xff] %vm1151_vm4, %v1062_v17  ;;  %1602 = vst.msk [vmem:[#allocation2 + $0x250] sm:$0xff] %vm1151_vm4, %v1065_v22 }
 0x1f9   :  { %1647 = vst.msk [vmem:[#allocation2 + $0x237] sm:$0xff] %vm1200_vm7, %v1062_v17 }
 0x1fa   :  { %1697 = vst.msk [vmem:[#allocation2 + $0x231] sm:$0xff] %vm1249_vm2, %v4674_v14  ;;  %1696 = vst.msk [vmem:[#allocation2 + $0x229] sm:$0xff] %vm1249_vm2, %v1063_v28 }
 0x1fb   :  { %1841 = vst.msk [vmem:[#allocation2 + $0x219] sm:$0xff] %vm1396_vm3, %v4674_v14  ;;  %1840 = vst.msk [vmem:[#allocation2 + $0x211] sm:$0xff] %vm1396_vm3, %v1063_v28 }
 0x1fc   :  { %1552 = vst.msk [vmem:[#allocation2 + $0x241] sm:$0xff] %vm1102_vm1, %v1063_v28  ;;  %1557 = vst.msk [vmem:[#allocation2 + $0x269] sm:$0xff] %vm1102_vm1, %v4719_v32 }
 0x1fd   :  { %1600 = vst.msk [vmem:[#allocation2 + $0x240] sm:$0xff] %vm1151_vm4, %v1063_v28  ;;  %1601 = vst.msk [vmem:[#allocation2 + $0x248] sm:$0xff] %vm1151_vm4, %v4674_v14 }
 0x1fe   :  { %1744 = vst.msk [vmem:[#allocation2 + $0x228] sm:$0xff] %vm1298_vm5, %v1063_v28  ;;  %1745 = vst.msk [vmem:[#allocation2 + $0x230] sm:$0xff] %vm1298_vm5, %v4674_v14 }
 0x1ff   :  { %1888 = vst.msk [vmem:[#allocation2 + $0x210] sm:$0xff] %vm1445_vm6, %v1063_v28  ;;  %1889 = vst.msk [vmem:[#allocation2 + $0x218] sm:$0xff] %vm1445_vm6, %v4674_v14 }
 0x200   :  { %1648 = vst.msk [vmem:[#allocation2 + $0x23f] sm:$0xff] %vm1200_vm7, %v1063_v28  ;;  %1649 = vst.msk [vmem:[#allocation2 + $0x247] sm:$0xff] %vm1200_vm7, %v4674_v14 }
 0x201   :  { %1792 = vst.msk [vmem:[#allocation2 + $0x227] sm:$0xff] %vm1347_vm8, %v1063_v28  ;;  %1793 = vst.msk [vmem:[#allocation2 + $0x22f] sm:$0xff] %vm1347_vm8, %v4674_v14 }
 0x202   :  { %1650 = vst.msk [vmem:[#allocation2 + $0x24f] sm:$0xff] %vm1200_vm7, %v1065_v22  ;;  %v4760_v47 = vpop.f32.mrf.mxu1 }
 0x203   :  { %1936 = vst.msk [vmem:[#allocation2 + $0x20f] sm:$0xff] %vm1494_vm9, %v1063_v28  ;;  %1937 = vst.msk [vmem:[#allocation2 + $0x217] sm:$0xff] %vm1494_vm9, %v4674_v14  ;;  %v911_v14 = vpop.f32.mrf.mxu0 }
 0x204   :  { %1698 = vst.msk [vmem:[#allocation2 + $0x239] sm:$0xff] %vm1249_vm2, %v1065_v22  ;;  %1699 = vst.msk [vmem:[#allocation2 + $0x241] sm:$0xff] %vm1249_vm2, %v1066_v35  ;;  %v4774_v51 = vpop.f32.mrf.mxu1  ;;  %v1078_v15 = vmax.f32 %v911_v14, 0.0 }
 0x205   :  { %1842 = vst.msk [vmem:[#allocation2 + $0x221] sm:$0xff] %vm1396_vm3, %v1065_v22  ;;  %1843 = vst.msk [vmem:[#allocation2 + $0x229] sm:$0xff] %vm1396_vm3, %v1066_v35  ;;  %v3454_v17 = vpop.f32.mrf.mxu0 }
 0x206   :  { %1746 = vst.msk [vmem:[#allocation2 + $0x238] sm:$0xff] %vm1298_vm5, %v1065_v22  ;;  %1747 = vst.msk [vmem:[#allocation2 + $0x240] sm:$0xff] %vm1298_vm5, %v1066_v35  ;;  %v4797_v54 = vpop.f32.mrf.mxu1  ;;  %v1081_v18 = vmax.f32 %v3454_v17, 0.0 }
 0x207   :  { %1890 = vst.msk [vmem:[#allocation2 + $0x220] sm:$0xff] %vm1445_vm6, %v1065_v22  ;;  %1891 = vst.msk [vmem:[#allocation2 + $0x228] sm:$0xff] %vm1445_vm6, %v1066_v35  ;;  %v914_v20 = vpop.f32.mrf.mxu0 }
 0x208   :  { %1555 = vst.msk [vmem:[#allocation2 + $0x259] sm:$0xff] %vm1102_vm1, %v1066_v35  ;;  %1558 = vst.msk [vmem:[#allocation2 + $0x271] sm:$0xff] %vm1102_vm1, %v1069_v40  ;;  %v4806_v57 = vpop.f32.mrf.mxu1  ;;  %v1079_v21 = vmax.f32 %v914_v20, 0.0 }
 0x209   :  { %1794 = vst.msk [vmem:[#allocation2 + $0x237] sm:$0xff] %vm1347_vm8, %v1065_v22  ;;  %1795 = vst.msk [vmem:[#allocation2 + $0x23f] sm:$0xff] %vm1347_vm8, %v1066_v35  ;;  %v3457_v23 = vpop.f32.mrf.mxu0 }
 0x20a   :  { %1938 = vst.msk [vmem:[#allocation2 + $0x21f] sm:$0xff] %vm1494_vm9, %v1065_v22  ;;  %1939 = vst.msk [vmem:[#allocation2 + $0x227] sm:$0xff] %vm1494_vm9, %v1066_v35  ;;  %v4937_v24 = vmax.f32 %v3457_v23, 0.0 }
 0x20b   :  { %1603 = vst.msk [vmem:[#allocation2 + $0x258] sm:$0xff] %vm1151_vm4, %v1066_v35  ;;  %1606 = vst.msk [vmem:[#allocation2 + $0x270] sm:$0xff] %vm1151_vm4, %v1069_v40  ;;  %v927_v27 = vpop.f32.mrf.mxu0 }
 0x20c   :  { %1651 = vst.msk [vmem:[#allocation2 + $0x257] sm:$0xff] %vm1200_vm7, %v1066_v35  ;;  %v1082_v28 = vmax.f32 %v927_v27, 0.0  ;;  %v2348_v27 = vmax.f32 %v4797_v54, 0.0 }
 0x20d   :  { %1701 = vst.msk [vmem:[#allocation2 + $0x251] sm:$0xff] %vm1249_vm2, %v4719_v32  ;;  %1700 = vst.msk [vmem:[#allocation2 + $0x249] sm:$0xff] %vm1249_vm2, %v1067_v46  ;;  %v3458_v30 = vpop.f32.mrf.mxu0 }
 0x20e   :  { %1845 = vst.msk [vmem:[#allocation2 + $0x239] sm:$0xff] %vm1396_vm3, %v4719_v32  ;;  %1844 = vst.msk [vmem:[#allocation2 + $0x231] sm:$0xff] %vm1396_vm3, %v1067_v46 }
 0x20f   :  { %1556 = vst.msk [vmem:[#allocation2 + $0x261] sm:$0xff] %vm1102_vm1, %v1067_v46  ;;  %1561 = vst.msk [vmem:[#allocation2 + $0x289] sm:$0xff] %vm1102_vm1, %v4772_v50  ;;  %v930_v34 = vpop.f32.mrf.mxu0 }
 0x210   :  { %1604 = vst.msk [vmem:[#allocation2 + $0x260] sm:$0xff] %vm1151_vm4, %v1067_v46  ;;  %1605 = vst.msk [vmem:[#allocation2 + $0x268] sm:$0xff] %vm1151_vm4, %v4719_v32  ;;  %v1083_v35 = vmax.f32 %v930_v34, 0.0 }
 0x211   :  { %1748 = vst.msk [vmem:[#allocation2 + $0x248] sm:$0xff] %vm1298_vm5, %v1067_v46  ;;  %1749 = vst.msk [vmem:[#allocation2 + $0x250] sm:$0xff] %vm1298_vm5, %v4719_v32  ;;  %v3461_v37 = vpop.f32.mrf.mxu0 }
 0x212   :  { %1892 = vst.msk [vmem:[#allocation2 + $0x230] sm:$0xff] %vm1445_vm6, %v1067_v46  ;;  %1893 = vst.msk [vmem:[#allocation2 + $0x238] sm:$0xff] %vm1445_vm6, %v4719_v32  ;;  %v4992_v38 = vmax.f32 %v3461_v37, 0.0 }
 0x213   :  { %1652 = vst.msk [vmem:[#allocation2 + $0x25f] sm:$0xff] %vm1200_vm7, %v1067_v46  ;;  %1653 = vst.msk [vmem:[#allocation2 + $0x267] sm:$0xff] %vm1200_vm7, %v4719_v32 }
 0x214   :  { %1796 = vst.msk [vmem:[#allocation2 + $0x247] sm:$0xff] %vm1347_vm8, %v1067_v46  ;;  %1797 = vst.msk [vmem:[#allocation2 + $0x24f] sm:$0xff] %vm1347_vm8, %v4719_v32 }
 0x215   :  { %1654 = vst.msk [vmem:[#allocation2 + $0x26f] sm:$0xff] %vm1200_vm7, %v1069_v40 }
 0x216   :  { %1940 = vst.msk [vmem:[#allocation2 + $0x22f] sm:$0xff] %vm1494_vm9, %v1067_v46  ;;  %1941 = vst.msk [vmem:[#allocation2 + $0x237] sm:$0xff] %vm1494_vm9, %v4719_v32  ;;  %v4817_v61 = vpop.f32.mrf.mxu1  ;;  %v1085_v32 = vmax.f32 %v3458_v30, 0.0 }
 0x217   :  { %1702 = vst.msk [vmem:[#allocation2 + $0x259] sm:$0xff] %vm1249_vm2, %v1069_v40  ;;  %1703 = vst.msk [vmem:[#allocation2 + $0x261] sm:$0xff] %vm1249_vm2, %v1070_v53 }
 0x218   :  { %1846 = vst.msk [vmem:[#allocation2 + $0x241] sm:$0xff] %vm1396_vm3, %v1069_v40  ;;  %1847 = vst.msk [vmem:[#allocation2 + $0x249] sm:$0xff] %vm1396_vm3, %v1070_v53  ;;  %v4829_v1 = vpop.f32.mrf.mxu1 }
 0x219   :  { %1750 = vst.msk [vmem:[#allocation2 + $0x258] sm:$0xff] %vm1298_vm5, %v1069_v40  ;;  %1751 = vst.msk [vmem:[#allocation2 + $0x260] sm:$0xff] %vm1298_vm5, %v1070_v53 }
 0x21a   :  { %1894 = vst.msk [vmem:[#allocation2 + $0x240] sm:$0xff] %vm1445_vm6, %v1069_v40  ;;  %1895 = vst.msk [vmem:[#allocation2 + $0x248] sm:$0xff] %vm1445_vm6, %v1070_v53  ;;  %v4852_v3 = vpop.f32.mrf.mxu1 }
 0x21b   :  { %1559 = vst.msk [vmem:[#allocation2 + $0x279] sm:$0xff] %vm1102_vm1, %v1070_v53  ;;  %1562 = vst.msk [vmem:[#allocation2 + $0x291] sm:$0xff] %vm1102_vm1, %v1073_v56  ;;  %v2352_v62 = vmax.f32 %v4852_v3, 0.0  ;;  %v2351_v3 = vmax.f32 %v4817_v61, 0.0 }
 0x21c   :  { %1798 = vst.msk [vmem:[#allocation2 + $0x257] sm:$0xff] %vm1347_vm8, %v1069_v40  ;;  %1799 = vst.msk [vmem:[#allocation2 + $0x25f] sm:$0xff] %vm1347_vm8, %v1070_v53  ;;  %v4861_v7 = vpop.f32.mrf.mxu1 }
 0x21d   :  { %1942 = vst.msk [vmem:[#allocation2 + $0x23f] sm:$0xff] %vm1494_vm9, %v1069_v40  ;;  %1943 = vst.msk [vmem:[#allocation2 + $0x247] sm:$0xff] %vm1494_vm9, %v1070_v53  ;;  %v943_v40 = vpop.f32.mrf.mxu0  ;;  %v2350_v17 = vmax.f32 %v4861_v7, 0.0  ;;  %v2349_v7 = vmax.f32 %v4829_v1, 0.0 }
 0x21e   :  { %1607 = vst.msk [vmem:[#allocation2 + $0x278] sm:$0xff] %vm1151_vm4, %v1070_v53  ;;  %1610 = vst.msk [vmem:[#allocation2 + $0x290] sm:$0xff] %vm1151_vm4, %v1073_v56  ;;  %v1086_v41 = vmax.f32 %v943_v40, 0.0 }
 0x21f   :  { %1655 = vst.msk [vmem:[#allocation2 + $0x277] sm:$0xff] %vm1200_vm7, %v1070_v53  ;;  %v3462_v43 = vpop.f32.mrf.mxu0 }
 0x220   :  { %1705 = vst.msk [vmem:[#allocation2 + $0x271] sm:$0xff] %vm1249_vm2, %v4772_v50  ;;  %1704 = vst.msk [vmem:[#allocation2 + $0x269] sm:$0xff] %vm1249_vm2, %v1071_v60  ;;  %v1089_v45 = vmax.f32 %v3462_v43, 0.0 }
 0x221   :  { %1849 = vst.msk [vmem:[#allocation2 + $0x259] sm:$0xff] %vm1396_vm3, %v4772_v50  ;;  %1848 = vst.msk [vmem:[#allocation2 + $0x251] sm:$0xff] %vm1396_vm3, %v1071_v60  ;;  %v946_v48 = vpop.f32.mrf.mxu0 }
 0x222   :  { %1560 = vst.msk [vmem:[#allocation2 + $0x281] sm:$0xff] %vm1102_vm1, %v1071_v60  ;;  %1565 = vst.msk [vmem:[#allocation2 + $0x2a9] sm:$0xff] %vm1102_vm1, %v4827_v63 }
 0x223   :  { %1608 = vst.msk [vmem:[#allocation2 + $0x280] sm:$0xff] %vm1151_vm4, %v1071_v60  ;;  %1609 = vst.msk [vmem:[#allocation2 + $0x288] sm:$0xff] %vm1151_vm4, %v4772_v50  ;;  %v3465_v53 = vpop.f32.mrf.mxu0 }
 0x224   :  { %1752 = vst.msk [vmem:[#allocation2 + $0x268] sm:$0xff] %vm1298_vm5, %v1071_v60  ;;  %1753 = vst.msk [vmem:[#allocation2 + $0x270] sm:$0xff] %vm1298_vm5, %v4772_v50  ;;  %v5045_v55 = vmax.f32 %v3465_v53, 0.0 }
 0x225   :  { %1896 = vst.msk [vmem:[#allocation2 + $0x250] sm:$0xff] %vm1445_vm6, %v1071_v60  ;;  %1897 = vst.msk [vmem:[#allocation2 + $0x258] sm:$0xff] %vm1445_vm6, %v4772_v50  ;;  %v959_v59 = vpop.f32.mrf.mxu0 }
 0x226   :  { %1656 = vst.msk [vmem:[#allocation2 + $0x27f] sm:$0xff] %vm1200_vm7, %v1071_v60  ;;  %1657 = vst.msk [vmem:[#allocation2 + $0x287] sm:$0xff] %vm1200_vm7, %v4772_v50 }
 0x227   :  { %1800 = vst.msk [vmem:[#allocation2 + $0x267] sm:$0xff] %vm1347_vm8, %v1071_v60  ;;  %1801 = vst.msk [vmem:[#allocation2 + $0x26f] sm:$0xff] %vm1347_vm8, %v4772_v50  ;;  %v3466_v0 = vpop.f32.mrf.mxu0 }
 0x228   :  { %1658 = vst.msk [vmem:[#allocation2 + $0x28f] sm:$0xff] %vm1200_vm7, %v1073_v56 }
 0x229   :  { %1944 = vst.msk [vmem:[#allocation2 + $0x24f] sm:$0xff] %vm1494_vm9, %v1071_v60  ;;  %1945 = vst.msk [vmem:[#allocation2 + $0x257] sm:$0xff] %vm1494_vm9, %v4772_v50  ;;  %v1087_v50 = vmax.f32 %v946_v48, 0.0  ;;  %v1090_v60 = vmax.f32 %v959_v59, 0.0 }
 0x22a   :  { %1706 = vst.msk [vmem:[#allocation2 + $0x279] sm:$0xff] %vm1249_vm2, %v1073_v56  ;;  %1707 = vst.msk [vmem:[#allocation2 + $0x281] sm:$0xff] %vm1249_vm2, %v1074_v2  ;;  %v4872_v10 = vpop.f32.mrf.mxu1 }
 0x22b   :  { %1850 = vst.msk [vmem:[#allocation2 + $0x261] sm:$0xff] %vm1396_vm3, %v1073_v56  ;;  %1851 = vst.msk [vmem:[#allocation2 + $0x269] sm:$0xff] %vm1396_vm3, %v1074_v2 }
 0x22c   :  { %1754 = vst.msk [vmem:[#allocation2 + $0x278] sm:$0xff] %vm1298_vm5, %v1073_v56  ;;  %1755 = vst.msk [vmem:[#allocation2 + $0x280] sm:$0xff] %vm1298_vm5, %v1074_v2  ;;  %v4884_v13 = vpop.f32.mrf.mxu1 }
 0x22d   :  { %1898 = vst.msk [vmem:[#allocation2 + $0x260] sm:$0xff] %vm1445_vm6, %v1073_v56  ;;  %1899 = vst.msk [vmem:[#allocation2 + $0x268] sm:$0xff] %vm1445_vm6, %v1074_v2 }
 0x22e   :  { %1563 = vst.msk [vmem:[#allocation2 + $0x299] sm:$0xff] %vm1102_vm1, %v1074_v2  ;;  %1566 = vst.msk [vmem:[#allocation2 + $0x2b1] sm:$0xff] %vm1102_vm1, %v1077_v6  ;;  %v4907_v16 = vpop.f32.mrf.mxu1 }
 0x22f   :  { %1802 = vst.msk [vmem:[#allocation2 + $0x277] sm:$0xff] %vm1347_vm8, %v1073_v56  ;;  %1803 = vst.msk [vmem:[#allocation2 + $0x27f] sm:$0xff] %vm1347_vm8, %v1074_v2 }
 0x230   :  { %1946 = vst.msk [vmem:[#allocation2 + $0x25f] sm:$0xff] %vm1494_vm9, %v1073_v56  ;;  %1947 = vst.msk [vmem:[#allocation2 + $0x267] sm:$0xff] %vm1494_vm9, %v1074_v2  ;;  %v4916_v19 = vpop.f32.mrf.mxu1 }
 0x231   :  { %1611 = vst.msk [vmem:[#allocation2 + $0x298] sm:$0xff] %vm1151_vm4, %v1074_v2  ;;  %1614 = vst.msk [vmem:[#allocation2 + $0x2b0] sm:$0xff] %vm1151_vm4, %v1077_v6 }
 0x232   :  { %1659 = vst.msk [vmem:[#allocation2 + $0x297] sm:$0xff] %vm1200_vm7, %v1074_v2 }
 0x233   :  { %1709 = vst.msk [vmem:[#allocation2 + $0x291] sm:$0xff] %vm1249_vm2, %v4827_v63  ;;  %1708 = vst.msk [vmem:[#allocation2 + $0x289] sm:$0xff] %vm1249_vm2, %v1075_v9 }
 0x234   :  { %1853 = vst.msk [vmem:[#allocation2 + $0x279] sm:$0xff] %vm1396_vm3, %v4827_v63  ;;  %1852 = vst.msk [vmem:[#allocation2 + $0x271] sm:$0xff] %vm1396_vm3, %v1075_v9 }
 0x235   :  { %1564 = vst.msk [vmem:[#allocation2 + $0x2a1] sm:$0xff] %vm1102_vm1, %v1075_v9  ;;  %1569 = vst.msk [vmem:[#allocation2 + $0x2c9] sm:$0xff] %vm1102_vm1, %v4882_v12 }
 0x236   :  { %1612 = vst.msk [vmem:[#allocation2 + $0x2a0] sm:$0xff] %vm1151_vm4, %v1075_v9  ;;  %1613 = vst.msk [vmem:[#allocation2 + $0x2a8] sm:$0xff] %vm1151_vm4, %v4827_v63 }
 0x237   :  { %1756 = vst.msk [vmem:[#allocation2 + $0x288] sm:$0xff] %vm1298_vm5, %v1075_v9  ;;  %1757 = vst.msk [vmem:[#allocation2 + $0x290] sm:$0xff] %vm1298_vm5, %v4827_v63 }
 0x238   :  { %1900 = vst.msk [vmem:[#allocation2 + $0x270] sm:$0xff] %vm1445_vm6, %v1075_v9  ;;  %1901 = vst.msk [vmem:[#allocation2 + $0x278] sm:$0xff] %vm1445_vm6, %v4827_v63 }
 0x239   :  { %1660 = vst.msk [vmem:[#allocation2 + $0x29f] sm:$0xff] %vm1200_vm7, %v1075_v9  ;;  %1661 = vst.msk [vmem:[#allocation2 + $0x2a7] sm:$0xff] %vm1200_vm7, %v4827_v63 }
 0x23a   :  { %1804 = vst.msk [vmem:[#allocation2 + $0x287] sm:$0xff] %vm1347_vm8, %v1075_v9  ;;  %1805 = vst.msk [vmem:[#allocation2 + $0x28f] sm:$0xff] %vm1347_vm8, %v4827_v63 }
 0x23b   :  { %1662 = vst.msk [vmem:[#allocation2 + $0x2af] sm:$0xff] %vm1200_vm7, %v1077_v6 }
 0x23c   :  { %1948 = vst.msk [vmem:[#allocation2 + $0x26f] sm:$0xff] %vm1494_vm9, %v1075_v9  ;;  %1949 = vst.msk [vmem:[#allocation2 + $0x277] sm:$0xff] %vm1494_vm9, %v4827_v63  ;;  %v962_v9 = vpop.f32.mrf.mxu0 }
 0x23d   :  { %1710 = vst.msk [vmem:[#allocation2 + $0x299] sm:$0xff] %vm1249_vm2, %v1077_v6  ;;  %1711 = vst.msk [vmem:[#allocation2 + $0x2a1] sm:$0xff] %vm1249_vm2, %v1078_v15  ;;  %v1091_v61 = vmax.f32 %v962_v9, 0.0 }
 0x23e   :  { %1854 = vst.msk [vmem:[#allocation2 + $0x281] sm:$0xff] %vm1396_vm3, %v1077_v6  ;;  %1855 = vst.msk [vmem:[#allocation2 + $0x289] sm:$0xff] %vm1396_vm3, %v1078_v15  ;;  %v4927_v22 = vpop.f32.mrf.mxu1 }
 0x23f   :  { %1758 = vst.msk [vmem:[#allocation2 + $0x298] sm:$0xff] %vm1298_vm5, %v1077_v6  ;;  %1759 = vst.msk [vmem:[#allocation2 + $0x2a0] sm:$0xff] %vm1298_vm5, %v1078_v15 }
 0x240   :  { %1902 = vst.msk [vmem:[#allocation2 + $0x280] sm:$0xff] %vm1445_vm6, %v1077_v6  ;;  %1903 = vst.msk [vmem:[#allocation2 + $0x288] sm:$0xff] %vm1445_vm6, %v1078_v15  ;;  %v4939_v25 = vpop.f32.mrf.mxu1 }
 0x241   :  { %1567 = vst.msk [vmem:[#allocation2 + $0x2b9] sm:$0xff] %vm1102_vm1, %v1078_v15  ;;  %1570 = vst.msk [vmem:[#allocation2 + $0x2d1] sm:$0xff] %vm1102_vm1, %v1081_v18 }
 0x242   :  { %1806 = vst.msk [vmem:[#allocation2 + $0x297] sm:$0xff] %vm1347_vm8, %v1077_v6  ;;  %1807 = vst.msk [vmem:[#allocation2 + $0x29f] sm:$0xff] %vm1347_vm8, %v1078_v15  ;;  %v4962_v29 = vpop.f32.mrf.mxu1 }
 0x243   :  { %1950 = vst.msk [vmem:[#allocation2 + $0x27f] sm:$0xff] %vm1494_vm9, %v1077_v6  ;;  %1951 = vst.msk [vmem:[#allocation2 + $0x287] sm:$0xff] %vm1494_vm9, %v1078_v15  ;;  %v1093_v6 = vmax.f32 %v3466_v0, 0.0  ;;  %v2360_v43 = vmax.f32 %v4962_v29, 0.0  ;;  %v2356_v0 = vmax.f32 %v4907_v16, 0.0 }
 0x244   :  { %1615 = vst.msk [vmem:[#allocation2 + $0x2b8] sm:$0xff] %vm1151_vm4, %v1078_v15  ;;  %1618 = vst.msk [vmem:[#allocation2 + $0x2d0] sm:$0xff] %vm1151_vm4, %v1081_v18  ;;  %v4971_v33 = vpop.f32.mrf.mxu1 }
 0x245   :  { %1663 = vst.msk [vmem:[#allocation2 + $0x2b7] sm:$0xff] %vm1200_vm7, %v1078_v15  ;;  %v2392_v15 = vpack.c.bf16 %v2352_v62, %v2351_v3  ;;  %v2355_v3 = vmax.f32 %v4872_v10, 0.0 }
 0x246   :  { %1713 = vst.msk [vmem:[#allocation2 + $0x2b1] sm:$0xff] %vm1249_vm2, %v4882_v12  ;;  %1712 = vst.msk [vmem:[#allocation2 + $0x2a9] sm:$0xff] %vm1249_vm2, %v1079_v21 }
 0x247   :  { %1857 = vst.msk [vmem:[#allocation2 + $0x299] sm:$0xff] %vm1396_vm3, %v4882_v12  ;;  %1856 = vst.msk [vmem:[#allocation2 + $0x291] sm:$0xff] %vm1396_vm3, %v1079_v21  ;;  %v2394_v10 = vpack.c.bf16 %v2356_v0, %v2355_v3  ;;  %v2523_v0 = vld [vmem:[#allocation2 + $0x218] sm:$0xff] }
 0x248   :  { %1568 = vst.msk [vmem:[#allocation2 + $0x2c1] sm:$0xff] %vm1102_vm1, %v1079_v21  ;;  %1573 = vst.msk [vmem:[#allocation2 + $0x2e9] sm:$0xff] %vm1102_vm1, %v4937_v24  ;;  %v2527_v3 = vld [vmem:[#allocation2 + $0x238] sm:$0xff] }
 0x249   :  { %1616 = vst.msk [vmem:[#allocation2 + $0x2c0] sm:$0xff] %vm1151_vm4, %v1079_v21  ;;  %1617 = vst.msk [vmem:[#allocation2 + $0x2c8] sm:$0xff] %vm1151_vm4, %v4882_v12 }
 0x24a   :  { %1760 = vst.msk [vmem:[#allocation2 + $0x2a8] sm:$0xff] %vm1298_vm5, %v1079_v21  ;;  %1761 = vst.msk [vmem:[#allocation2 + $0x2b0] sm:$0xff] %vm1298_vm5, %v4882_v12 }
 0x24b   :  { %1904 = vst.msk [vmem:[#allocation2 + $0x290] sm:$0xff] %vm1445_vm6, %v1079_v21  ;;  %1905 = vst.msk [vmem:[#allocation2 + $0x298] sm:$0xff] %vm1445_vm6, %v4882_v12 }
 0x24c   :  { %1664 = vst.msk [vmem:[#allocation2 + $0x2bf] sm:$0xff] %vm1200_vm7, %v1079_v21  ;;  %1665 = vst.msk [vmem:[#allocation2 + $0x2c7] sm:$0xff] %vm1200_vm7, %v4882_v12 }
 0x24d   :  { %1808 = vst.msk [vmem:[#allocation2 + $0x2a7] sm:$0xff] %vm1347_vm8, %v1079_v21  ;;  %1809 = vst.msk [vmem:[#allocation2 + $0x2af] sm:$0xff] %vm1347_vm8, %v4882_v12 }
 0x24e   :  { %1666 = vst.msk [vmem:[#allocation2 + $0x2cf] sm:$0xff] %vm1200_vm7, %v1081_v18 }
 0x24f   :  { %1952 = vst.msk [vmem:[#allocation2 + $0x28f] sm:$0xff] %vm1494_vm9, %v1079_v21  ;;  %1953 = vst.msk [vmem:[#allocation2 + $0x297] sm:$0xff] %vm1494_vm9, %v4882_v12 }
 0x250   :  { %1714 = vst.msk [vmem:[#allocation2 + $0x2b9] sm:$0xff] %vm1249_vm2, %v1081_v18  ;;  %1715 = vst.msk [vmem:[#allocation2 + $0x2c1] sm:$0xff] %vm1249_vm2, %v1082_v28 }
 0x251   :  { %1858 = vst.msk [vmem:[#allocation2 + $0x2a1] sm:$0xff] %vm1396_vm3, %v1081_v18  ;;  %1859 = vst.msk [vmem:[#allocation2 + $0x2a9] sm:$0xff] %vm1396_vm3, %v1082_v28 }
 0x252   :  { %1762 = vst.msk [vmem:[#allocation2 + $0x2b8] sm:$0xff] %vm1298_vm5, %v1081_v18  ;;  %1763 = vst.msk [vmem:[#allocation2 + $0x2c0] sm:$0xff] %vm1298_vm5, %v1082_v28  ;;  %v4982_v36 = vpop.f32.mrf.mxu1 }
 0x253   :  { %1906 = vst.msk [vmem:[#allocation2 + $0x2a0] sm:$0xff] %vm1445_vm6, %v1081_v18  ;;  %1907 = vst.msk [vmem:[#allocation2 + $0x2a8] sm:$0xff] %vm1445_vm6, %v1082_v28  ;;  %v2363_v1 = vmax.f32 %v4982_v36, 0.0  ;;  %v2347_v36 = vmax.f32 %v4760_v47, 0.0 }
 0x254   :  { %1571 = vst.msk [vmem:[#allocation2 + $0x2d9] sm:$0xff] %vm1102_vm1, %v1082_v28  ;;  %1574 = vst.msk [vmem:[#allocation2 + $0x2f1] sm:$0xff] %vm1102_vm1, %v1085_v32  ;;  %v4994_v39 = vpop.f32.mrf.mxu1 }
 0x255   :  { %1810 = vst.msk [vmem:[#allocation2 + $0x2b7] sm:$0xff] %vm1347_vm8, %v1081_v18  ;;  %1811 = vst.msk [vmem:[#allocation2 + $0x2bf] sm:$0xff] %vm1347_vm8, %v1082_v28  ;;  %v2361_v54 = vmax.f32 %v4994_v39, 0.0  ;;  %v2390_v40 = vpack.c.bf16 %v2348_v27, %v2347_v36  ;;  %v2359_v39 = vmax.f32 %v4927_v22, 0.0  ;;  %v2358_v22 = vmax.f32 %v4971_v33, 0.0 }
 0x256   :  { %1954 = vst.msk [vmem:[#allocation2 + $0x29f] sm:$0xff] %vm1494_vm9, %v1081_v18  ;;  %1955 = vst.msk [vmem:[#allocation2 + $0x2a7] sm:$0xff] %vm1494_vm9, %v1082_v28  ;;  %v5017_v42 = vpop.f32.mrf.mxu1  ;;  %v2357_v33 = vmax.f32 %v4939_v25, 0.0 }
 0x257   :  { %1619 = vst.msk [vmem:[#allocation2 + $0x2d8] sm:$0xff] %vm1151_vm4, %v1082_v28  ;;  %1622 = vst.msk [vmem:[#allocation2 + $0x2f0] sm:$0xff] %vm1151_vm4, %v1085_v32  ;;  %v2364_v20 = vmax.f32 %v5017_v42, 0.0 }
 0x258   :  { %1667 = vst.msk [vmem:[#allocation2 + $0x2d7] sm:$0xff] %vm1200_vm7, %v1082_v28  ;;  %v5026_v46 = vpop.f32.mrf.mxu1  ;;  %v2391_v28 = vpack.c.bf16 %v2350_v17, %v2349_v7 }
 0x259   :  { %1717 = vst.msk [vmem:[#allocation2 + $0x2d1] sm:$0xff] %vm1249_vm2, %v4937_v24  ;;  %1716 = vst.msk [vmem:[#allocation2 + $0x2c9] sm:$0xff] %vm1249_vm2, %v1083_v35  ;;  %v2362_v34 = vmax.f32 %v5026_v46, 0.0  ;;  %v2345_v46 = vmax.f32 %v4774_v51, 0.0  ;;  %v2396_v51 = vpack.c.bf16 %v2360_v43, %v2359_v39  ;;  %v3739_v39 = vld [vmem:[%s5377_s2 + $0x38] sm:$0xff]  }
 0x25a   :  { %1861 = vst.msk [vmem:[#allocation2 + $0x2b9] sm:$0xff] %vm1396_vm3, %v4937_v24  ;;  %1860 = vst.msk [vmem:[#allocation2 + $0x2b1] sm:$0xff] %vm1396_vm3, %v1083_v35 }
 0x25b   :  { %1572 = vst.msk [vmem:[#allocation2 + $0x2e1] sm:$0xff] %vm1102_vm1, %v1083_v35  ;;  %1577 = vst.msk [vmem:[#allocation2 + $0x309] sm:$0xff] %vm1102_vm1, %v4992_v38 }
 0x25c   :  { %1620 = vst.msk [vmem:[#allocation2 + $0x2e0] sm:$0xff] %vm1151_vm4, %v1083_v35  ;;  %1621 = vst.msk [vmem:[#allocation2 + $0x2e8] sm:$0xff] %vm1151_vm4, %v4937_v24 }
 0x25d   :  { %1764 = vst.msk [vmem:[#allocation2 + $0x2c8] sm:$0xff] %vm1298_vm5, %v1083_v35  ;;  %1765 = vst.msk [vmem:[#allocation2 + $0x2d0] sm:$0xff] %vm1298_vm5, %v4937_v24 }
 0x25e   :  { %1908 = vst.msk [vmem:[#allocation2 + $0x2b0] sm:$0xff] %vm1445_vm6, %v1083_v35  ;;  %1909 = vst.msk [vmem:[#allocation2 + $0x2b8] sm:$0xff] %vm1445_vm6, %v4937_v24 }
 0x25f   :  { %1668 = vst.msk [vmem:[#allocation2 + $0x2df] sm:$0xff] %vm1200_vm7, %v1083_v35  ;;  %1669 = vst.msk [vmem:[#allocation2 + $0x2e7] sm:$0xff] %vm1200_vm7, %v4937_v24 }
 0x260   :  { %1812 = vst.msk [vmem:[#allocation2 + $0x2c7] sm:$0xff] %vm1347_vm8, %v1083_v35  ;;  %1813 = vst.msk [vmem:[#allocation2 + $0x2cf] sm:$0xff] %vm1347_vm8, %v4937_v24 }
 0x261   :  { %1670 = vst.msk [vmem:[#allocation2 + $0x2ef] sm:$0xff] %vm1200_vm7, %v1085_v32 }
 0x262   :  { %1956 = vst.msk [vmem:[#allocation2 + $0x2af] sm:$0xff] %vm1494_vm9, %v1083_v35  ;;  %1957 = vst.msk [vmem:[#allocation2 + $0x2b7] sm:$0xff] %vm1494_vm9, %v4937_v24  ;;  %v3469_v24 = vpop.f32.mrf.mxu0 }
 0x263   :  { %1718 = vst.msk [vmem:[#allocation2 + $0x2d9] sm:$0xff] %vm1249_vm2, %v1085_v32  ;;  %1719 = vst.msk [vmem:[#allocation2 + $0x2e1] sm:$0xff] %vm1249_vm2, %v1086_v41  ;;  %v1096_v59 = vmax.f32 %v3469_v24, 0.0 }
 0x264   :  { %1862 = vst.msk [vmem:[#allocation2 + $0x2c1] sm:$0xff] %vm1396_vm3, %v1085_v32  ;;  %1863 = vst.msk [vmem:[#allocation2 + $0x2c9] sm:$0xff] %vm1396_vm3, %v1086_v41  ;;  %v975_v35 = vpop.f32.mrf.mxu0 }
 0x265   :  { %1766 = vst.msk [vmem:[#allocation2 + $0x2d8] sm:$0xff] %vm1298_vm5, %v1085_v32  ;;  %1767 = vst.msk [vmem:[#allocation2 + $0x2e0] sm:$0xff] %vm1298_vm5, %v1086_v41 }
 0x266   :  { %1910 = vst.msk [vmem:[#allocation2 + $0x2c0] sm:$0xff] %vm1445_vm6, %v1085_v32  ;;  %1911 = vst.msk [vmem:[#allocation2 + $0x2c8] sm:$0xff] %vm1445_vm6, %v1086_v41  ;;  %v3521_v52 = vpop.f32.mrf.mxu1 }
 0x267   :  { %1575 = vst.msk [vmem:[#allocation2 + $0x2f9] sm:$0xff] %vm1102_vm1, %v1086_v41  ;;  %1578 = vst.msk [vmem:[#allocation2 + $0x311] sm:$0xff] %vm1102_vm1, %v1089_v45  ;;  %v2367_v2 = vmax.f32 %v3521_v52, 0.0 }
 0x268   :  { %1814 = vst.msk [vmem:[#allocation2 + $0x2d7] sm:$0xff] %vm1347_vm8, %v1085_v32  ;;  %1815 = vst.msk [vmem:[#allocation2 + $0x2df] sm:$0xff] %vm1347_vm8, %v1086_v41  ;;  %v2258_v56 = vpop.f32.mrf.mxu1 }
 0x269   :  { %1958 = vst.msk [vmem:[#allocation2 + $0x2bf] sm:$0xff] %vm1494_vm9, %v1085_v32  ;;  %1959 = vst.msk [vmem:[#allocation2 + $0x2c7] sm:$0xff] %vm1494_vm9, %v1086_v41  ;;  %v2365_v11 = vmax.f32 %v2258_v56, 0.0  ;;  %v2398_v32 = vpack.c.bf16 %v2364_v20, %v2363_v1 }
 0x26a   :  { %1623 = vst.msk [vmem:[#allocation2 + $0x2f8] sm:$0xff] %vm1151_vm4, %v1086_v41  ;;  %1626 = vst.msk [vmem:[#allocation2 + $0x310] sm:$0xff] %vm1151_vm4, %v1089_v45  ;;  %v3522_v63 = vpop.f32.mrf.mxu1 }
 0x26b   :  { %1671 = vst.msk [vmem:[#allocation2 + $0x2f7] sm:$0xff] %vm1200_vm7, %v1086_v41  ;;  %v2368_v4 = vmax.f32 %v3522_v63, 0.0  ;;  %v2346_v41 = vmax.f32 %v4806_v57, 0.0 }
 0x26c   :  { %1721 = vst.msk [vmem:[#allocation2 + $0x2f1] sm:$0xff] %vm1249_vm2, %v4992_v38  ;;  %1720 = vst.msk [vmem:[#allocation2 + $0x2e9] sm:$0xff] %vm1249_vm2, %v1087_v50  ;;  %v2261_v8 = vpop.f32.mrf.mxu1 }
 0x26d   :  { %1865 = vst.msk [vmem:[#allocation2 + $0x2d9] sm:$0xff] %vm1396_vm3, %v4992_v38  ;;  %1864 = vst.msk [vmem:[#allocation2 + $0x2d1] sm:$0xff] %vm1396_vm3, %v1087_v50  ;;  %v2400_v12 = vpack.c.bf16 %v2368_v4, %v2367_v2  ;;  %v2366_v14 = vmax.f32 %v2261_v8, 0.0  ;;  %v2395_v2 = vpack.c.bf16 %v2358_v22, %v2357_v33  ;;  %v2354_v8 = vmax.f32 %v4916_v19, 0.0  ;;  %v3746_v22 = vld [vmem:[%s5377_s2] sm:$0xff]  }
 0x26e   :  { %1576 = vst.msk [vmem:[#allocation2 + $0x301] sm:$0xff] %vm1102_vm1, %v1087_v50  ;;  %1581 = vst.msk [vmem:[#allocation2 + $0x329] sm:$0xff] %vm1102_vm1, %v5045_v55  ;;  %v2353_v19 = vmax.f32 %v4884_v13, 0.0  ;;  %v2520_v33 = vld [vmem:[#allocation2 + $0x200] sm:$0xff] }
 0x26f   :  { %1624 = vst.msk [vmem:[#allocation2 + $0x300] sm:$0xff] %vm1151_vm4, %v1087_v50  ;;  %1625 = vst.msk [vmem:[#allocation2 + $0x308] sm:$0xff] %vm1151_vm4, %v4992_v38  ;;  %v2399_v21 = vpack.c.bf16 %v2366_v14, %v2365_v11  ;;  %3260 = vmatprep.subr.bf16.mxu1 %v2400_v12 }
 0x270   :  { %1768 = vst.msk [vmem:[#allocation2 + $0x2e8] sm:$0xff] %vm1298_vm5, %v1087_v50  ;;  %1769 = vst.msk [vmem:[#allocation2 + $0x2f0] sm:$0xff] %vm1298_vm5, %v4992_v38  ;;  %3261 = vmatpush3.bf16.msra.mxu1 %v2392_v15  ;;  %v2393_v12 = vpack.c.bf16 %v2354_v8, %v2353_v19  ;;  %v2530_v19 = vld [vmem:[#allocation2 + $0x250] sm:$0xff] }
 0x271   :  { %1912 = vst.msk [vmem:[#allocation2 + $0x2d0] sm:$0xff] %vm1445_vm6, %v1087_v50  ;;  %1913 = vst.msk [vmem:[#allocation2 + $0x2d8] sm:$0xff] %vm1445_vm6, %v4992_v38  ;;  %3262 = vmatprep.subr.bf16.mxu1 %v2399_v21 }
 0x272   :  { %1672 = vst.msk [vmem:[#allocation2 + $0x2ff] sm:$0xff] %vm1200_vm7, %v1087_v50  ;;  %1673 = vst.msk [vmem:[#allocation2 + $0x307] sm:$0xff] %vm1200_vm7, %v4992_v38 }
 0x273   :  { %1816 = vst.msk [vmem:[#allocation2 + $0x2e7] sm:$0xff] %vm1347_vm8, %v1087_v50  ;;  %1817 = vst.msk [vmem:[#allocation2 + $0x2ef] sm:$0xff] %vm1347_vm8, %v4992_v38 }
 0x274   :  { %1674 = vst.msk [vmem:[#allocation2 + $0x30f] sm:$0xff] %vm1200_vm7, %v1089_v45  ;;  %3263 = vmatpush3.bf16.msra.mxu1 %v2391_v28 }
 0x275   :  { %1960 = vst.msk [vmem:[#allocation2 + $0x2cf] sm:$0xff] %vm1494_vm9, %v1087_v50  ;;  %1961 = vst.msk [vmem:[#allocation2 + $0x2d7] sm:$0xff] %vm1494_vm9, %v4992_v38  ;;  %3264 = vmatprep.subr.bf16.mxu1 %v2398_v32  ;;  %v3470_v38 = vpop.f32.mrf.mxu0  ;;  %v1094_v50 = vmax.f32 %v975_v35, 0.0 }
 0x276   :  { %1722 = vst.msk [vmem:[#allocation2 + $0x2f9] sm:$0xff] %vm1249_vm2, %v1089_v45  ;;  %1723 = vst.msk [vmem:[#allocation2 + $0x301] sm:$0xff] %vm1249_vm2, %v1090_v60 }
 0x277   :  { %1866 = vst.msk [vmem:[#allocation2 + $0x2e1] sm:$0xff] %vm1396_vm3, %v1089_v45  ;;  %1867 = vst.msk [vmem:[#allocation2 + $0x2e9] sm:$0xff] %vm1396_vm3, %v1090_v60  ;;  %v978_v47 = vpop.f32.mrf.mxu0 }
 0x278   :  { %1770 = vst.msk [vmem:[#allocation2 + $0x2f8] sm:$0xff] %vm1298_vm5, %v1089_v45  ;;  %1771 = vst.msk [vmem:[#allocation2 + $0x300] sm:$0xff] %vm1298_vm5, %v1090_v60  ;;  %3265 = vmatpush3.bf16.msra.mxu1 %v2390_v40  ;;  %v1095_v52 = vmax.f32 %v978_v47, 0.0 }
 0x279   :  { %1914 = vst.msk [vmem:[#allocation2 + $0x2e0] sm:$0xff] %vm1445_vm6, %v1089_v45  ;;  %1915 = vst.msk [vmem:[#allocation2 + $0x2e8] sm:$0xff] %vm1445_vm6, %v1090_v60  ;;  %v5143_v53 = vpop.f32.mrf.mxu0 }
 0x27a   :  { %1579 = vst.msk [vmem:[#allocation2 + $0x319] sm:$0xff] %vm1102_vm1, %v1090_v60  ;;  %1582 = vst.msk [vmem:[#allocation2 + $0x331] sm:$0xff] %vm1102_vm1, %v1093_v6  ;;  %v5087_v18 = vpop.f32.mrf.mxu1  ;;  %v1100_v14 = vmax.f32 %v5143_v53, 0.0  ;;  %v3742_v53 = vld [vmem:[%s5377_s2 + $0x20] sm:$0xff]  }
 0x27b   :  { %1818 = vst.msk [vmem:[#allocation2 + $0x2f7] sm:$0xff] %vm1347_vm8, %v1089_v45  ;;  %1819 = vst.msk [vmem:[#allocation2 + $0x2ff] sm:$0xff] %vm1347_vm8, %v1090_v60  ;;  %v991_v29 = vpop.f32.mrf.mxu0 }
 0x27c   :  { %1962 = vst.msk [vmem:[#allocation2 + $0x2df] sm:$0xff] %vm1494_vm9, %v1089_v45  ;;  %1963 = vst.msk [vmem:[#allocation2 + $0x2e7] sm:$0xff] %vm1494_vm9, %v1090_v60  ;;  %v5099_v23 = vpop.f32.mrf.mxu1  ;;  %v2397_v45 = vpack.c.bf16 %v2362_v34, %v2361_v54  ;;  %v1098_v16 = vmax.f32 %v991_v29, 0.0  ;;  %v2518_v29 = vld [vmem:[#allocation2 + $0x1f0] sm:$0xff] }
 0x27d   :  { %1627 = vst.msk [vmem:[#allocation2 + $0x318] sm:$0xff] %vm1151_vm4, %v1090_v60  ;;  %1630 = vst.msk [vmem:[#allocation2 + $0x330] sm:$0xff] %vm1151_vm4, %v1093_v6  ;;  %v3474_v62 = vpop.f32.mrf.mxu0 }
 0x27e   :  { %1675 = vst.msk [vmem:[#allocation2 + $0x317] sm:$0xff] %vm1200_vm7, %v1090_v60  ;;  %v5122_v30 = vpop.f32.mrf.mxu1  ;;  %3266 = vmatprep.subr.bf16.mxu1 %v2397_v45  ;;  %v1097_v60 = vmax.f32 %v3470_v38, 0.0  ;;  %v2371_v45 = vmax.f32 %v5087_v18, 0.0 }
 0x27f   :  { %1725 = vst.msk [vmem:[#allocation2 + $0x311] sm:$0xff] %vm1249_vm2, %v5045_v55  ;;  %1724 = vst.msk [vmem:[#allocation2 + $0x309] sm:$0xff] %vm1249_vm2, %v1091_v61  ;;  %v994_v25 = vpop.f32.mrf.mxu0 }
 0x280   :  { %1869 = vst.msk [vmem:[#allocation2 + $0x2f9] sm:$0xff] %vm1396_vm3, %v5045_v55  ;;  %1868 = vst.msk [vmem:[#allocation2 + $0x2f1] sm:$0xff] %vm1396_vm3, %v1091_v61  ;;  %v5130_v37 = vpop.f32.mrf.mxu1 }
 0x281   :  { %1580 = vst.msk [vmem:[#allocation2 + $0x321] sm:$0xff] %vm1102_vm1, %v1091_v61  ;;  %1583 = vst.msk [vmem:[#allocation2 + $0x339] sm:$0xff] %vm1102_vm1, %v1094_v50  ;;  %v2370_v47 = vmax.f32 %v5130_v37, 0.0  ;;  %v3741_v37 = vld [vmem:[%s5377_s2 + $0x28] sm:$0xff]  }
 0x282   :  { %1628 = vst.msk [vmem:[#allocation2 + $0x320] sm:$0xff] %vm1151_vm4, %v1091_v61  ;;  %1629 = vst.msk [vmem:[#allocation2 + $0x328] sm:$0xff] %vm1151_vm4, %v5045_v55 }
 0x283   :  { %1772 = vst.msk [vmem:[#allocation2 + $0x308] sm:$0xff] %vm1298_vm5, %v1091_v61  ;;  %1773 = vst.msk [vmem:[#allocation2 + $0x310] sm:$0xff] %vm1298_vm5, %v5045_v55 }
 0x284   :  { %1916 = vst.msk [vmem:[#allocation2 + $0x2f0] sm:$0xff] %vm1445_vm6, %v1091_v61  ;;  %1917 = vst.msk [vmem:[#allocation2 + $0x2f8] sm:$0xff] %vm1445_vm6, %v5045_v55 }
 0x285   :  { %1676 = vst.msk [vmem:[#allocation2 + $0x31f] sm:$0xff] %vm1200_vm7, %v1091_v61  ;;  %1677 = vst.msk [vmem:[#allocation2 + $0x327] sm:$0xff] %vm1200_vm7, %v5045_v55 }
 0x286   :  { %1820 = vst.msk [vmem:[#allocation2 + $0x307] sm:$0xff] %vm1347_vm8, %v1091_v61  ;;  %1821 = vst.msk [vmem:[#allocation2 + $0x30f] sm:$0xff] %vm1347_vm8, %v5045_v55 }
 0x287   :  { %1678 = vst.msk [vmem:[#allocation2 + $0x32f] sm:$0xff] %vm1200_vm7, %v1093_v6 }
 0x288   :  { %1964 = vst.msk [vmem:[#allocation2 + $0x2ef] sm:$0xff] %vm1494_vm9, %v1091_v61  ;;  %1965 = vst.msk [vmem:[#allocation2 + $0x2f7] sm:$0xff] %vm1494_vm9, %v5045_v55  ;;  %v2389_v55 = vpack.c.bf16 %v2346_v41, %v2345_v46  ;;  %v1101_v61 = vmax.f32 %v3474_v62, 0.0  ;;  %v2372_v41 = vmax.f32 %v5122_v30, 0.0  ;;  %v2369_v46 = vmax.f32 %v5099_v23, 0.0  ;;  %v3740_v23 = vld [vmem:[%s5377_s2 + $0x30] sm:$0xff]  }
 0x289   :  { %1726 = vst.msk [vmem:[#allocation2 + $0x319] sm:$0xff] %vm1249_vm2, %v1093_v6  ;;  %1727 = vst.msk [vmem:[#allocation2 + $0x321] sm:$0xff] %vm1249_vm2, %v1094_v50  ;;  %v5251_v30 = vcombine.high %v4627_v58, %v4627_v58 }
 0x28a   :  { %1870 = vst.msk [vmem:[#allocation2 + $0x301] sm:$0xff] %vm1396_vm3, %v1093_v6  ;;  %1871 = vst.msk [vmem:[#allocation2 + $0x309] sm:$0xff] %vm1396_vm3, %v1094_v50  ;;  %3267 = vmatpush3.bf16.msra.mxu1 %v2389_v55  ;;  %v3743_v55 = vld [vmem:[%s5377_s2 + $0x18] sm:$0xff]  }
 0x28b   :  { %1774 = vst.msk [vmem:[#allocation2 + $0x318] sm:$0xff] %vm1298_vm5, %v1093_v6  ;;  %1775 = vst.msk [vmem:[#allocation2 + $0x320] sm:$0xff] %vm1298_vm5, %v1094_v50  ;;  %3268 = vmatprep.subr.bf16.mxu1 %v2396_v51  ;;  %v3745_v51 = vld [vmem:[%s5377_s2 + $0x8] sm:$0xff]  }
 0x28c   :  { %1918 = vst.msk [vmem:[#allocation2 + $0x300] sm:$0xff] %vm1445_vm6, %v1093_v6  ;;  %1919 = vst.msk [vmem:[#allocation2 + $0x308] sm:$0xff] %vm1445_vm6, %v1094_v50 }
 0x28d   :  { %1822 = vst.msk [vmem:[#allocation2 + $0x317] sm:$0xff] %vm1347_vm8, %v1093_v6  ;;  %1823 = vst.msk [vmem:[#allocation2 + $0x31f] sm:$0xff] %vm1347_vm8, %v1094_v50 }
 0x28e   :  { %1966 = vst.msk [vmem:[#allocation2 + $0x2ff] sm:$0xff] %vm1494_vm9, %v1093_v6  ;;  %v5136_v42 = vpop.f32.mrf.mxu1  ;;  %1967 = vst.msk [vmem:[#allocation2 + $0x307] sm:$0xff] %vm1494_vm9, %v1094_v50  ;;  %3269 = vmatpush3.bf16.msra.mxu1 %v4754_v44  ;;  %v1099_v6 = vmax.f32 %v994_v25, 0.0  ;;  %v2525_v25 = vld [vmem:[#allocation2 + $0x228] sm:$0xff] }
 0x28f   :  { %1584 = vst.msk [vmem:[#allocation2 + $0x341] sm:$0xff] %vm1102_vm1, %v1095_v52  ;;  %1585 = vst.msk [vmem:[#allocation2 + $0x349] sm:$0xff] %vm1102_vm1, %v1096_v59  ;;  %3270 = vmatprep.subr.bf16.mxu1 %v2395_v2  ;;  %v2375_v36 = vmax.f32 %v5136_v42, 0.0  ;;  %v2402_v42 = vpack.c.bf16 %v2372_v41, %v2371_v45  ;;  %v2524_v2 = vld [vmem:[#allocation2 + $0x220] sm:$0xff]  ;;  %v2547_v41 = vld [vmem:[#allocation2 + $0x2d8] sm:$0xff] }
 0x290   :  { %v5140_v48 = vpop.f32.mrf.mxu1  ;;  %1728 = vst.msk [vmem:[#allocation2 + $0x329] sm:$0xff] %vm1249_vm2, %v1095_v52  ;;  %v2549_v45 = vld [vmem:[#allocation2 + $0x2e8] sm:$0xff] }
 0x291   :  { %1872 = vst.msk [vmem:[#allocation2 + $0x311] sm:$0xff] %vm1396_vm3, %v1095_v52  ;;  %1873 = vst.msk [vmem:[#allocation2 + $0x319] sm:$0xff] %vm1396_vm3, %v1096_v59  ;;  %v2373_v40 = vmax.f32 %v5140_v48, 0.0  ;;  %v2516_v48 = vld [vmem:[#allocation2 + $0x1e0] sm:$0xff] }
 0x292   :  { %v5145_v57 = vpop.f32.mrf.mxu1  ;;  %1631 = vst.msk [vmem:[#allocation2 + $0x338] sm:$0xff] %vm1151_vm4, %v1094_v50  ;;  %1632 = vst.msk [vmem:[#allocation2 + $0x340] sm:$0xff] %vm1151_vm4, %v1095_v52  ;;  %3271 = vmatpush3.bf16.msra.mxu1 %v4767_v49 }
 0x293   :  { %1776 = vst.msk [vmem:[#allocation2 + $0x328] sm:$0xff] %vm1298_vm5, %v1095_v52  ;;  %3272 = vmatprep.subr.bf16.mxu1 %v2394_v10  ;;  %v2376_v34 = vmax.f32 %v5145_v57, 0.0  ;;  %v3744_v57 = vld [vmem:[%s5377_s2 + $0x10] sm:$0xff]   ;;  %v2529_v10 = vld [vmem:[#allocation2 + $0x248] sm:$0xff] }
 0x294   :  { %1920 = vst.msk [vmem:[#allocation2 + $0x310] sm:$0xff] %vm1445_vm6, %v1095_v52  ;;  %v5160_v56 = vpop.f32.mrf.mxu1  ;;  %1921 = vst.msk [vmem:[#allocation2 + $0x318] sm:$0xff] %vm1445_vm6, %v1096_v59 }
 0x295   :  { %1679 = vst.msk [vmem:[#allocation2 + $0x337] sm:$0xff] %vm1200_vm7, %v1094_v50  ;;  %1680 = vst.msk [vmem:[#allocation2 + $0x33f] sm:$0xff] %vm1200_vm7, %v1095_v52  ;;  %v2404_v54 = vpack.c.bf16 %v2376_v34, %v2375_v36  ;;  %v2374_v38 = vmax.f32 %v5160_v56, 0.0  ;;  %v2517_v50 = vld [vmem:[#allocation2 + $0x1e8] sm:$0xff]  ;;  %v2519_v56 = vld [vmem:[#allocation2 + $0x1f8] sm:$0xff] }
 0x296   :  { %1824 = vst.msk [vmem:[#allocation2 + $0x327] sm:$0xff] %vm1347_vm8, %v1095_v52  ;;  %3273 = vmatpush3.bf16.msra.mxu1 %v4703_v26  ;;  %v2564_v18 = vpack.c.bf16 %v2517_v50, %v2516_v48  ;;  %v2543_v34 = vld [vmem:[#allocation2 + $0x2b8] sm:$0xff]  ;;  %v2545_v36 = vld [vmem:[#allocation2 + $0x2c8] sm:$0xff]  ;;  %v2552_v50 = vld [vmem:[#allocation2 + $0x300] sm:$0xff] }
 0x297   :  { %1968 = vst.msk [vmem:[#allocation2 + $0x30f] sm:$0xff] %vm1494_vm9, %v1095_v52  ;;  %1969 = vst.msk [vmem:[#allocation2 + $0x317] sm:$0xff] %vm1494_vm9, %v1096_v59  ;;  %3274 = vmatprep.subr.bf16.mxu1 %v2393_v12  ;;  %v2403_v43 = vpack.c.bf16 %v2374_v38, %v2373_v40  ;;  %v2401_v52 = vpack.c.bf16 %v2370_v47, %v2369_v46  ;;  %v2532_v12 = vld [vmem:[#allocation2 + $0x260] sm:$0xff]  ;;  %v2546_v40 = vld [vmem:[#allocation2 + $0x2d0] sm:$0xff] }
 0x298   :  { %1729 = vst.msk [vmem:[#allocation2 + $0x331] sm:$0xff] %vm1249_vm2, %v1096_v59  ;;  %1730 = vst.msk [vmem:[#allocation2 + $0x339] sm:$0xff] %vm1249_vm2, %v1097_v60  ;;  %v2550_v46 = vld [vmem:[#allocation2 + $0x2f0] sm:$0xff]  ;;  %v2551_v48 = vld [vmem:[#allocation2 + $0x2f8] sm:$0xff] }
 0x299   :  { %1586 = vst.msk [vmem:[#allocation2 + $0x351] sm:$0xff] %vm1102_vm1, %v1097_v60  ;;  %1587 = vst.msk [vmem:[#allocation2 + $0x359] sm:$0xff] %vm1102_vm1, %v1098_v16 }
 0x29a   :  { %1874 = vst.msk [vmem:[#allocation2 + $0x321] sm:$0xff] %vm1396_vm3, %v1097_v60  ;;  %3275 = vmatpush3.bf16.msra.mxu1 %v4714_v31 }
 0x29b   :  { %1634 = vst.msk [vmem:[#allocation2 + $0x350] sm:$0xff] %vm1151_vm4, %v1097_v60  ;;  %1633 = vst.msk [vmem:[#allocation2 + $0x348] sm:$0xff] %vm1151_vm4, %v1096_v59  ;;  %3539 = vmatprep.subr.bf16.mxu1 %v3769_v5 }
 0x29c   :  { %v5169_v63 = vpop.f32.mrf.mxu1  ;;  %1777 = vst.msk [vmem:[#allocation2 + $0x330] sm:$0xff] %vm1298_vm5, %v1096_v59  ;;  %1778 = vst.msk [vmem:[#allocation2 + $0x338] sm:$0xff] %vm1298_vm5, %v1097_v60 }
 0x29d   :  { %1922 = vst.msk [vmem:[#allocation2 + $0x320] sm:$0xff] %vm1445_vm6, %v1097_v60  ;;  %2469 = vmatmul.mubr.bf16.vlgmr.msra.gmra.mxu1 %v4627_v58  ;;  %v2379_v24 = vmax.f32 %v5169_v63, 0.0  ;;  %v2522_v63 = vld [vmem:[#allocation2 + $0x210] sm:$0xff] }
 0x29e   :  { %v5178_v4 = vpop.f32.mrf.mxu1  ;;  %1681 = vst.msk [vmem:[#allocation2 + $0x347] sm:$0xff] %vm1200_vm7, %v1096_v59  ;;  %1682 = vst.msk [vmem:[#allocation2 + $0x34f] sm:$0xff] %vm1200_vm7, %v1097_v60  ;;  %3555 = vmatprep.mubr.msk.bf16.mxu1 %vm3771_vm10, %v3769_v5 }
 0x29f   :  { %1825 = vst.msk [vmem:[#allocation2 + $0x32f] sm:$0xff] %vm1347_vm8, %v1096_v59  ;;  %1826 = vst.msk [vmem:[#allocation2 + $0x337] sm:$0xff] %vm1347_vm8, %v1097_v60  ;;  %v2377_v32 = vmax.f32 %v5178_v4, 0.0  ;;  %v2521_v59 = vld [vmem:[#allocation2 + $0x208] sm:$0xff]  ;;  %v2567_v4 = vpack.c.bf16 %v2523_v0, %v2522_v63 }
 0x2a0   :  { %1970 = vst.msk [vmem:[#allocation2 + $0x31f] sm:$0xff] %vm1494_vm9, %v1097_v60  ;;  %v3534_v44 = vpop.f32.mrf.mxu1  ;;  %v2565_v60 = vpack.c.bf16 %v2519_v56, %v2518_v29  ;;  %v2566_v62 = vpack.c.bf16 %v2521_v59, %v2520_v33 }
 0x2a1   :  { %1731 = vst.msk [vmem:[#allocation2 + $0x341] sm:$0xff] %vm1249_vm2, %v1098_v16  ;;  %1732 = vst.msk [vmem:[#allocation2 + $0x349] sm:$0xff] %vm1249_vm2, %v1099_v6  ;;  %v2380_v1 = vmax.f32 %v3534_v44, 0.0  ;;  %v2528_v44 = vld [vmem:[#allocation2 + $0x240] sm:$0xff] }
 0x2a2   :  { %1875 = vst.msk [vmem:[#allocation2 + $0x329] sm:$0xff] %vm1396_vm3, %v1098_v16  ;;  %1876 = vst.msk [vmem:[#allocation2 + $0x331] sm:$0xff] %vm1396_vm3, %v1099_v6  ;;  %v2309_v9 = vpop.f32.mrf.mxu1 }
 0x2a3   :  { %1635 = vst.msk [vmem:[#allocation2 + $0x358] sm:$0xff] %vm1151_vm4, %v1098_v16  ;;  %v2406_v27 = vpack.c.bf16 %v2380_v1, %v2379_v24  ;;  %v2378_v28 = vmax.f32 %v2309_v9, 0.0  ;;  %v2570_v9 = vpack.c.bf16 %v2529_v10, %v2528_v44  ;;  %v2539_v1 = vld [vmem:[#allocation2 + $0x298] sm:$0xff]  ;;  %v2541_v24 = vld [vmem:[#allocation2 + $0x2a8] sm:$0xff] }
 0x2a4   :  { %1779 = vst.msk [vmem:[#allocation2 + $0x340] sm:$0xff] %vm1298_vm5, %v1098_v16  ;;  %1780 = vst.msk [vmem:[#allocation2 + $0x348] sm:$0xff] %vm1298_vm5, %v1099_v6  ;;  %v3537_v11 = vpop.f32.mrf.mxu1 }
 0x2a5   :  { %1923 = vst.msk [vmem:[#allocation2 + $0x328] sm:$0xff] %vm1445_vm6, %v1098_v16  ;;  %1924 = vst.msk [vmem:[#allocation2 + $0x330] sm:$0xff] %vm1445_vm6, %v1099_v6  ;;  %v2383_v13 = vmax.f32 %v3537_v11, 0.0  ;;  %v2405_v35 = vpack.c.bf16 %v2378_v28, %v2377_v32  ;;  %v2531_v11 = vld [vmem:[#allocation2 + $0x258] sm:$0xff]  ;;  %v2542_v32 = vld [vmem:[#allocation2 + $0x2b0] sm:$0xff] }
 0x2a6   :  { %1683 = vst.msk [vmem:[#allocation2 + $0x357] sm:$0xff] %vm1200_vm7, %v1098_v16  ;;  %1684 = vst.msk [vmem:[#allocation2 + $0x35f] sm:$0xff] %vm1200_vm7, %v1099_v6  ;;  %v2322_v49 = vpop.f32.mrf.mxu1 }
 0x2a7   :  { %1827 = vst.msk [vmem:[#allocation2 + $0x33f] sm:$0xff] %vm1347_vm8, %v1098_v16  ;;  %1828 = vst.msk [vmem:[#allocation2 + $0x347] sm:$0xff] %vm1347_vm8, %v1099_v6  ;;  %v2381_v7 = vmax.f32 %v2322_v49, 0.0  ;;  %v2571_v49 = vpack.c.bf16 %v2531_v11, %v2530_v19 }
 0x2a8   :  { %1971 = vst.msk [vmem:[#allocation2 + $0x327] sm:$0xff] %vm1494_vm9, %v1098_v16  ;;  %1972 = vst.msk [vmem:[#allocation2 + $0x32f] sm:$0xff] %vm1494_vm9, %v1099_v6  ;;  %v3538_v15 = vpop.f32.mrf.mxu1  ;;  %v2568_v16 = vpack.c.bf16 %v2525_v25, %v2524_v2  ;;  %v2526_v6 = vld [vmem:[#allocation2 + $0x230] sm:$0xff] }
 0x2a9   :  { %1733 = vst.msk [vmem:[#allocation2 + $0x351] sm:$0xff] %vm1249_vm2, %v1100_v14  ;;  %1734 = vst.msk [vmem:[#allocation2 + $0x359] sm:$0xff] %vm1249_vm2, %v1101_v61  ;;  %v2384_v17 = vmax.f32 %v3538_v15, 0.0  ;;  %v2569_v8 = vpack.c.bf16 %v2527_v3, %v2526_v6  ;;  %v2534_v15 = vld [vmem:[#allocation2 + $0x270] sm:$0xff] }
 0x2aa   :  { %1877 = vst.msk [vmem:[#allocation2 + $0x339] sm:$0xff] %vm1396_vm3, %v1100_v14  ;;  %1878 = vst.msk [vmem:[#allocation2 + $0x341] sm:$0xff] %vm1396_vm3, %v1101_v61  ;;  %v2325_v26 = vpop.f32.mrf.mxu1 }
 0x2ab   :  { %1781 = vst.msk [vmem:[#allocation2 + $0x350] sm:$0xff] %vm1298_vm5, %v1100_v14  ;;  %1782 = vst.msk [vmem:[#allocation2 + $0x358] sm:$0xff] %vm1298_vm5, %v1101_v61  ;;  %v2408_v20 = vpack.c.bf16 %v2384_v17, %v2383_v13  ;;  %v2382_v21 = vmax.f32 %v2325_v26, 0.0  ;;  %v2535_v13 = vld [vmem:[#allocation2 + $0x278] sm:$0xff]  ;;  %v2536_v17 = vld [vmem:[#allocation2 + $0x280] sm:$0xff] }
 0x2ac   :  { %1925 = vst.msk [vmem:[#allocation2 + $0x338] sm:$0xff] %vm1445_vm6, %v1100_v14  ;;  %1926 = vst.msk [vmem:[#allocation2 + $0x340] sm:$0xff] %vm1445_vm6, %v1101_v61  ;;  %v2537_v26 = vld [vmem:[#allocation2 + $0x288] sm:$0xff] }
 0x2ad   :  { %1829 = vst.msk [vmem:[#allocation2 + $0x34f] sm:$0xff] %vm1347_vm8, %v1100_v14  ;;  %1830 = vst.msk [vmem:[#allocation2 + $0x357] sm:$0xff] %vm1347_vm8, %v1101_v61  ;;  %3540 = vmatpush3.bf16.msra.mxu1 %v2408_v20  ;;  %v2407_v31 = vpack.c.bf16 %v2382_v21, %v2381_v7  ;;  %v2573_v20 = vpack.c.bf16 %v2535_v13, %v2534_v15  ;;  %v2574_v21 = vpack.c.bf16 %v2537_v26, %v2536_v17  ;;  %v2538_v7 = vld [vmem:[#allocation2 + $0x290] sm:$0xff] }
 0x2ae   :  { %1973 = vst.msk [vmem:[#allocation2 + $0x337] sm:$0xff] %vm1494_vm9, %v1100_v14  ;;  %1974 = vst.msk [vmem:[#allocation2 + $0x33f] sm:$0xff] %vm1494_vm9, %v1101_v61  ;;  %3541 = vmatprep.subr.bf16.mxu1 %v3769_v5  ;;  %v2533_v14 = vld [vmem:[#allocation2 + $0x268] sm:$0xff] }
 0x2af   :  { %v2572_v61 = vpack.c.bf16 %v2533_v14, %v2532_v12 }
 0x2b1   :  { %3542 = vmatpush3.bf16.msra.mxu1 %v2407_v31  ;;  %v2540_v31 = vld [vmem:[#allocation2 + $0x2a0] sm:$0xff] }
 0x2b2   :  { %3543 = vmatprep.subr.bf16.mxu1 %v3769_v5  ;;  %v2576_v28 = vpack.c.bf16 %v2541_v24, %v2540_v31 }
 0x2b4   :  { %v2561_v33 = vld [vmem:[#allocation2 + $0x348] sm:$0xff]  ;;  %v2563_v63 = vld [vmem:[#allocation2 + $0x358] sm:$0xff] }
 0x2b5   :  { %3544 = vmatpush3.bf16.msra.mxu1 %v2406_v27  ;;  %v2575_v27 = vpack.c.bf16 %v2539_v1, %v2538_v7  ;;  %v2559_v29 = vld [vmem:[#allocation2 + $0x338] sm:$0xff]  ;;  %v2560_v56 = vld [vmem:[#allocation2 + $0x340] sm:$0xff] }
 0x2b6   :  { %3545 = vmatprep.subr.bf16.mxu1 %v3769_v5 }
 0x2b9   :  { %3546 = vmatpush3.bf16.msra.mxu1 %v2405_v35  ;;  %v2544_v35 = vld [vmem:[#allocation2 + $0x2c0] sm:$0xff] }
 0x2ba   :  { %3547 = vmatprep.subr.bf16.mxu1 %v3769_v5  ;;  %v2578_v38 = vpack.c.bf16 %v2545_v36, %v2544_v35 }
 0x2bd   :  { %3548 = vmatpush3.bf16.msra.mxu1 %v2404_v54  ;;  %v2577_v54 = vpack.c.bf16 %v2543_v34, %v2542_v32 }
 0x2be   :  { %3549 = vmatprep.subr.bf16.mxu1 %v3769_v5 }
 0x2c1   :  { %3550 = vmatpush3.bf16.msra.mxu1 %v2403_v43  ;;  %v2548_v43 = vld [vmem:[#allocation2 + $0x2e0] sm:$0xff] }
 0x2c2   :  { %3551 = vmatprep.subr.bf16.mxu1 %v3769_v5  ;;  %v2580_v47 = vpack.c.bf16 %v2549_v45, %v2548_v43 }
 0x2c5   :  { %3552 = vmatpush3.bf16.msra.mxu1 %v2402_v42  ;;  %v2579_v42 = vpack.c.bf16 %v2547_v41, %v2546_v40 }
 0x2c6   :  { %3553 = vmatprep.subr.bf16.mxu1 %v3769_v5 }
 0x2c9   :  { %3554 = vmatpush3.bf16.msra.mxu1 %v2401_v52  ;;  %v2553_v52 = vld [vmem:[#allocation2 + $0x308] sm:$0xff] }
 0x2ca   :  { %3559 = vmatprep.subr.bf16.mxu1 %v3739_v39 }
 0x2cc   :  { %3556 = vmatmul.mubr.bf16.vlgmr.msra.gmra.mxu1 %v5251_v30 }
 0x2cd   :  { %3560 = vmatpush3.bf16.msra.mxu1 %v3739_v39  ;;  %3575 = vmatprep.mubr.bf16.mxu1 %v2564_v18  ;;  %v2581_v18 = vpack.c.bf16 %v2551_v48, %v2550_v46  ;;  %v2582_v39 = vpack.c.bf16 %v2553_v52, %v2552_v50 }
 0x2ce   :  { %3561 = vmatprep.subr.bf16.mxu1 %v3740_v23 }
 0x2d1   :  { %3562 = vmatpush3.bf16.msra.mxu1 %v3740_v23  ;;  %v2554_v23 = vld [vmem:[#allocation2 + $0x310] sm:$0xff] }
 0x2d2   :  { %3563 = vmatprep.subr.bf16.mxu1 %v3741_v37 }
 0x2d5   :  { %3564 = vmatpush3.bf16.msra.mxu1 %v3741_v37  ;;  %v2555_v37 = vld [vmem:[#allocation2 + $0x318] sm:$0xff] }
 0x2d6   :  { %3565 = vmatprep.subr.bf16.mxu1 %v3742_v53 }
 0x2d9   :  { %3566 = vmatpush3.bf16.msra.mxu1 %v3742_v53  ;;  %v2556_v53 = vld [vmem:[#allocation2 + $0x320] sm:$0xff] }
 0x2da   :  { %3567 = vmatprep.subr.bf16.mxu1 %v3743_v55 }
 0x2dd   :  { %3568 = vmatpush3.bf16.msra.mxu1 %v3743_v55  ;;  %v2557_v55 = vld [vmem:[#allocation2 + $0x328] sm:$0xff] }
 0x2de   :  { %3569 = vmatprep.subr.bf16.mxu1 %v3744_v57 }
 0x2e1   :  { %3570 = vmatpush3.bf16.msra.mxu1 %v3744_v57  ;;  %v2583_v57 = vpack.c.bf16 %v2555_v37, %v2554_v23 }
 0x2e2   :  { %3571 = vmatprep.subr.bf16.mxu1 %v3745_v51 }
 0x2e5   :  { %3572 = vmatpush3.bf16.msra.mxu1 %v3745_v51  ;;  %v2584_v51 = vpack.c.bf16 %v2557_v55, %v2556_v53 }
 0x2e6   :  { %3573 = vmatprep.subr.bf16.mxu1 %v3746_v22 }
 0x2e9   :  { %3574 = vmatpush3.bf16.msra.mxu1 %v3746_v22  ;;  %v2558_v22 = vld [vmem:[#allocation2 + $0x330] sm:$0xff] }
 0x2ea   :  { %v2585_v59 = vpack.c.bf16 %v2559_v29, %v2558_v22 }
 0x2ec   :  { %3576 = vmatmul.mubr.bf16.vlgmr.msra.gmra.mxu1 %v2565_v60  ;;  %v2586_v60 = vpack.c.bf16 %v2561_v33, %v2560_v56 }
 0x2ed   :  { %3579 = vmatprep.mubr.bf16.mxu1 %v2566_v62  ;;  %v2562_v62 = vld [vmem:[#allocation2 + $0x350] sm:$0xff] }
 0x2ee   :  { %v2587_v0 = vpack.c.bf16 %v2563_v63, %v2562_v62 }
 0x2f4   :  { %3580 = vmatmul.mubr.bf16.gmra.mxu1 %v2567_v4 }
 0x2f5   :  { %3583 = vmatprep.mubr.bf16.mxu1 %v2568_v16 }
 0x2fc   :  { %3584 = vmatmul.mubr.bf16.gmra.mxu1 %v2569_v8 }
 0x2fd   :  { %3587 = vmatprep.mubr.bf16.mxu1 %v2570_v9 }
 0x304   :  { %3588 = vmatmul.mubr.bf16.gmra.mxu1 %v2571_v49 }
 0x305   :  { %3591 = vmatprep.mubr.bf16.mxu1 %v2572_v61 }
 0x30c   :  { %3592 = vmatmul.mubr.bf16.gmra.mxu1 %v2573_v20 }
 0x30d   :  { %3595 = vmatprep.mubr.bf16.mxu1 %v2574_v21 }
 0x314   :  { %3596 = vmatmul.mubr.bf16.gmra.mxu1 %v2575_v27 }
 0x315   :  { %3599 = vmatprep.mubr.bf16.mxu1 %v2576_v28 }
 0x31c   :  { %3600 = vmatmul.mubr.bf16.gmra.mxu1 %v2577_v54 }
 0x31d   :  { %3603 = vmatprep.mubr.bf16.mxu1 %v2578_v38 }
 0x324   :  { %3604 = vmatmul.mubr.bf16.gmra.mxu1 %v2579_v42 }
 0x325   :  { %3607 = vmatprep.mubr.bf16.mxu1 %v2580_v47 }
 0x32c   :  { %3608 = vmatmul.mubr.bf16.gmra.mxu1 %v2581_v18 }
 0x32d   :  { %3611 = vmatprep.mubr.bf16.mxu1 %v2582_v39 }
 0x334   :  { %3612 = vmatmul.mubr.bf16.gmra.mxu1 %v2583_v57 }
 0x335   :  { %3615 = vmatprep.mubr.bf16.mxu1 %v2584_v51 }
 0x33c   :  { %3616 = vmatmul.mubr.bf16.gmra.mxu1 %v2585_v59 }
 0x33d   :  { %3619 = vmatprep.mubr.bf16.mxu1 %v2586_v60 }
 0x344   :  { %3620 = vmatmul.mubr.bf16.gmra.mxu1 %v2587_v0 }
 0x35d   :  { %v3276_v2 = vpop.f32.mrf.mxu1 }
 0x35f   :  { %v3277_v25 = vpop.f32.mrf.mxu1 }
 0x360   :  { %v3278_v4 = vadd.f32 %v3277_v25, %v3276_v2 }
 0x361   :  { %v3279_v16 = vpop.f32.mrf.mxu1 }
 0x363   :  { %v3280_v6 = vpop.f32.mrf.mxu1 }
 0x38c   :  { %v2510_v3 = vpop.f32.mrf.mxu1 }
 0x38d   :  { %v5278_v44 = vadd.f32 %v3278_v4, %v2510_v3 }
 0x38e   :  { %v3557_v10 = vpop.f32.mrf.mxu1 }
 0x390   :  { %v2513_v8 = vpop.f32.mrf.mxu1 }
 0x392   :  { %v3558_v9 = vpop.f32.mrf.mxu1 }
 0x3ac   :  { %v3577_v19 = vpop.f32.mrf.mxu1 }
 0x3ad   :  { %v2815_v14 = vmax.f32 %v3577_v19, 0.0 }
 0x3ae   :  { %v2622_v11 = vpop.f32.mrf.mxu1 }
 0x3af   :  { %v2813_v15 = vmax.f32 %v2622_v11, 0.0 }
 0x3b0   :  { %v3578_v12 = vpop.f32.mrf.mxu1 }
 0x3b1   :  { %v2816_v49 = vmax.f32 %v3578_v12, 0.0 }
 0x3b2   :  { %v2625_v61 = vpop.f32.mrf.mxu1 }
 0x3b3   :  { %v5280_v13 = vpack.c.bf16 %v2816_v49, %v2815_v14  ;;  %v2814_v17 = vmax.f32 %v2625_v61, 0.0 }
 0x3b4   :  { %v3581_v26 = vpop.f32.mrf.mxu1 }
 0x3b5   :  { %v5282_v20 = vpack.c.bf16 %v2814_v17, %v2813_v15  ;;  %v2819_v1 = vmax.f32 %v3581_v26, 0.0 }
 0x3b6   :  { %v2638_v21 = vpop.f32.mrf.mxu1 }
 0x3b7   :  { %v2817_v27 = vmax.f32 %v2638_v21, 0.0 }
 0x3b8   :  { %v3582_v7 = vpop.f32.mrf.mxu1 }
 0x3b9   :  { %v2820_v31 = vmax.f32 %v3582_v7, 0.0 }
 0x3ba   :  { %v2641_v24 = vpop.f32.mrf.mxu1 }
 0x3bb   :  { %v5284_v28 = vpack.c.bf16 %v2820_v31, %v2819_v1  ;;  %v2818_v32 = vmax.f32 %v2641_v24, 0.0 }
 0x3bc   :  { %v3585_v34 = vpop.f32.mrf.mxu1 }
 0x3bd   :  { %v5286_v35 = vpack.c.bf16 %v2818_v32, %v2817_v27  ;;  %v2823_v49 = vmax.f32 %v3585_v34, 0.0 }
 0x3be   :  { %v2654_v36 = vpop.f32.mrf.mxu1 }
 0x3bf   :  { %v2821_v31 = vmax.f32 %v2654_v36, 0.0 }
 0x3c0   :  { %v3586_v54 = vpop.f32.mrf.mxu1 }
 0x3c1   :  { %v2824_v9 = vmax.f32 %v3586_v54, 0.0 }
 0x3c2   :  { %v2657_v38 = vpop.f32.mrf.mxu1 }
 0x3c3   :  { %v2866_v17 = vpack.c.bf16 %v2824_v9, %v2823_v49  ;;  %v2822_v26 = vmax.f32 %v2657_v38, 0.0  ;;  %v3737_v49 = vld [vmem:[%s5379_s4 + $0x8] sm:$0xff]  }
 0x3c4   :  { %v3589_v40 = vpop.f32.mrf.mxu1 }
 0x3c5   :  { %v2827_v59 = vmax.f32 %v3589_v40, 0.0  ;;  %v2865_v32 = vpack.c.bf16 %v2822_v26, %v2821_v31 }
 0x3c6   :  { %v2670_v41 = vpop.f32.mrf.mxu1 }
 0x3c7   :  { %v2825_v3 = vmax.f32 %v2670_v41, 0.0 }
 0x3c8   :  { %v3590_v43 = vpop.f32.mrf.mxu1 }
 0x3c9   :  { %v2828_v22 = vmax.f32 %v3590_v43, 0.0 }
 0x3ca   :  { %v2673_v45 = vpop.f32.mrf.mxu1 }
 0x3cb   :  { %v2868_v2 = vpack.c.bf16 %v2828_v22, %v2827_v59  ;;  %v2826_v25 = vmax.f32 %v2673_v45, 0.0 }
 0x3cc   :  { %v5288_v42 = vpop.f32.mrf.mxu1 }
 0x3cd   :  { %v2867_v19 = vpack.c.bf16 %v2826_v25, %v2825_v3 }
 0x3ce   :  { %v5290_v47 = vpop.f32.mrf.mxu1 }
 0x3d0   :  { %v5292_v46 = vpop.f32.mrf.mxu1 }
 0x3d1   :  { %v2832_v38 = vmax.f32 %v5292_v46, 0.0 }
 0x3d2   :  { %v5294_v48 = vpop.f32.mrf.mxu1 }
 0x3d4   :  { %v3597_v50 = vpop.f32.mrf.mxu1 }
 0x3d5   :  { %v2835_v27 = vmax.f32 %v3597_v50, 0.0 }
 0x3d6   :  { %v2702_v52 = vpop.f32.mrf.mxu1 }
 0x3d7   :  { %v2833_v43 = vmax.f32 %v2702_v52, 0.0  ;;  %v2829_v52 = vmax.f32 %v5290_v47, 0.0 }
 0x3d8   :  { %v3598_v18 = vpop.f32.mrf.mxu1 }
 0x3d9   :  { %v2836_v7 = vmax.f32 %v3598_v18, 0.0  ;;  %v2831_v18 = vmax.f32 %v5288_v42, 0.0 }
 0x3da   :  { %v2705_v39 = vpop.f32.mrf.mxu1 }
 0x3db   :  { %v2872_v34 = vpack.c.bf16 %v2836_v7, %v2835_v27  ;;  %v2834_v40 = vmax.f32 %v2705_v39, 0.0 }
 0x3dc   :  { %v3601_v23 = vpop.f32.mrf.mxu1 }
 0x3dd   :  { %v2839_v8 = vmax.f32 %v3601_v23, 0.0  ;;  %v2871_v23 = vpack.c.bf16 %v2834_v40, %v2833_v43 }
 0x3de   :  { %v2718_v37 = vpop.f32.mrf.mxu1 }
 0x3df   :  { %v2837_v15 = vmax.f32 %v2718_v37, 0.0  ;;  %v2870_v37 = vpack.c.bf16 %v2832_v38, %v2831_v18 }
 0x3e0   :  { %v3602_v53 = vpop.f32.mrf.mxu1 }
 0x3e1   :  { %v2840_v16 = vmax.f32 %v3602_v53, 0.0  ;;  %v2830_v53 = vmax.f32 %v5294_v48, 0.0 }
 0x3e2   :  { %v2721_v55 = vpop.f32.mrf.mxu1 }
 0x3e3   :  { %v2874_v12 = vpack.c.bf16 %v2840_v16, %v2839_v8  ;;  %v2838_v14 = vmax.f32 %v2721_v55, 0.0 }
 0x3e4   :  { %v3605_v57 = vpop.f32.mrf.mxu1 }
 0x3e5   :  { %v2843_v56 = vmax.f32 %v3605_v57, 0.0  ;;  %v2873_v1 = vpack.c.bf16 %v2838_v14, %v2837_v15  ;;  %v2869_v57 = vpack.c.bf16 %v2830_v53, %v2829_v52  ;;  %v3736_v14 = vld [vmem:[%s5379_s4 + $0x10] sm:$0xff]  }
 0x3e6   :  { %v2734_v51 = vpop.f32.mrf.mxu1 }
 0x3e7   :  { %v2841_v62 = vmax.f32 %v2734_v51, 0.0 }
 0x3e8   :  { %v3606_v29 = vpop.f32.mrf.mxu1 }
 0x3e9   :  { %v2844_v33 = vmax.f32 %v3606_v29, 0.0 }
 0x3ea   :  { %v2737_v60 = vpop.f32.mrf.mxu1 }
 0x3eb   :  { %v2876_v63 = vpack.c.bf16 %v2844_v33, %v2843_v56  ;;  %v2842_v0 = vmax.f32 %v2737_v60, 0.0 }
 0x3ec   :  { %v5296_v4 = vpop.f32.mrf.mxu1 }
 0x3ed   :  { %v2875_v6 = vpack.c.bf16 %v2842_v0, %v2841_v62  ;;  %3323 = vmatprep.subr.bf16.mxu0 %v2876_v63 }
 0x3ee   :  { %3324 = vmatpush3.bf16.msra.mxu0 %v2868_v2  ;;  %v5298_v10 = vpop.f32.mrf.mxu1 }
 0x3ef   :  { %3325 = vmatprep.subr.bf16.mxu0 %v2875_v6  ;;  %v2847_v6 = vmax.f32 %v5296_v4, 0.0  ;;  %v2845_v9 = vmax.f32 %v5298_v10, 0.0  ;;  %v3732_v4 = vld [vmem:[%s5379_s4 + $0x30] sm:$0xff]   ;;  %v3733_v10 = vld [vmem:[%s5379_s4 + $0x28] sm:$0xff]  }
 0x3f0   :  { %v5300_v11 = vpop.f32.mrf.mxu1 }
 0x3f1   :  { %v2848_v25 = vmax.f32 %v5300_v11, 0.0  ;;  %v3731_v11 = vld [vmem:[%s5379_s4 + $0x38] sm:$0xff]  }
 0x3f2   :  { %3326 = vmatpush3.bf16.msra.mxu0 %v2867_v19  ;;  %v5302_v61 = vpop.f32.mrf.mxu1 }
 0x3f3   :  { %3327 = vmatprep.subr.bf16.mxu0 %v2874_v12  ;;  %v2878_v3 = vpack.c.bf16 %v2848_v25, %v2847_v6  ;;  %v2846_v8 = vmax.f32 %v5302_v61, 0.0  ;;  %v3735_v12 = vld [vmem:[%s5379_s4 + $0x18] sm:$0xff]   ;;  %v3738_v61 = vld [vmem:[%s5379_s4] sm:$0xff]  }
 0x3f4   :  { %v5304_v21 = vpop.f32.mrf.mxu1 }
 0x3f5   :  { %v2851_v62 = vmax.f32 %v5304_v21, 0.0  ;;  %v2877_v19 = vpack.c.bf16 %v2846_v8, %v2845_v9 }
 0x3f6   :  { %3328 = vmatpush3.bf16.msra.mxu0 %v2866_v17  ;;  %v5306_v24 = vpop.f32.mrf.mxu1 }
 0x3f7   :  { %3329 = vmatprep.subr.bf16.mxu0 %v2873_v1  ;;  %v2849_v2 = vmax.f32 %v5306_v24, 0.0 }
 0x3f8   :  { %v3614_v54 = vpop.f32.mrf.mxu1 }
 0x3fa   :  { %3330 = vmatpush3.bf16.msra.mxu0 %v2865_v32  ;;  %v2769_v41 = vpop.f32.mrf.mxu1 }
 0x3fb   :  { %3331 = vmatprep.subr.bf16.mxu0 %v2872_v34  ;;  %v2850_v0 = vmax.f32 %v2769_v41, 0.0  ;;  %v3163_v41 = vld [vmem:[%s5380_s5] ss:$0 sm:$0xff] }
 0x3fc   :  { %v3617_v45 = vpop.f32.mrf.mxu1 }
 0x3fd   :  { %v2855_v56 = vmax.f32 %v3617_v45, 0.0  ;;  %v2879_v16 = vpack.c.bf16 %v2850_v0, %v2849_v2 }
 0x3fe   :  { %3332 = vmatpush3.bf16.msra.mxu0 %v5284_v28  ;;  %v2782_v36 = vpop.f32.mrf.mxu1 }
 0x3ff   :  { %3333 = vmatprep.subr.bf16.mxu0 %v2871_v23  ;;  %v2853_v59 = vmax.f32 %v2782_v36, 0.0 }
 0x400   :  { %v3618_v50 = vpop.f32.mrf.mxu1 }
 0x402   :  { %3334 = vmatpush3.bf16.msra.mxu0 %v5286_v35  ;;  %v2785_v39 = vpop.f32.mrf.mxu1 }
 0x403   :  { %3335 = vmatprep.subr.bf16.mxu0 %v2870_v37  ;;  %v2854_v33 = vmax.f32 %v2785_v39, 0.0 }
 0x404   :  { %v3621_v55 = vpop.f32.mrf.mxu1 }
 0x405   :  { %v2859_v51 = vmax.f32 %v3621_v55, 0.0  ;;  %v2881_v60 = vpack.c.bf16 %v2854_v33, %v2853_v59 }
 0x406   :  { %3336 = vmatpush3.bf16.msra.mxu0 %v5280_v13  ;;  %v2798_v46 = vpop.f32.mrf.mxu1  ;;  %v2856_v13 = vmax.f32 %v3618_v50, 0.0 }
 0x407   :  { %3337 = vmatprep.subr.bf16.mxu0 %v2869_v57  ;;  %v2857_v47 = vmax.f32 %v2798_v46, 0.0 }
 0x408   :  { %v3622_v28 = vpop.f32.mrf.mxu1 }
 0x409   :  { %v2860_v42 = vmax.f32 %v3622_v28, 0.0 }
 0x40a   :  { %3338 = vmatpush3.bf16.msra.mxu0 %v5282_v20  ;;  %v2801_v22 = vpop.f32.mrf.mxu1  ;;  %v2882_v20 = vpack.c.bf16 %v2856_v13, %v2855_v56 }
 0x40b   :  { %v2884_v29 = vpack.c.bf16 %v2860_v42, %v2859_v51  ;;  %3623 = vmatprep.subr.bf16.mxu0 %v3769_v5  ;;  %v2858_v35 = vmax.f32 %v2801_v22, 0.0 }
 0x40d   :  { %2918 = vmatmul.mubr.bf16.vlgmr.msra.gmra.mxu0 %v4627_v58  ;;  %v2883_v48 = vpack.c.bf16 %v2858_v35, %v2857_v47  ;;  %v2852_v58 = vmax.f32 %v3614_v54, 0.0 }
 0x40e   :  { %3624 = vmatpush3.bf16.msra.mxu0 %v2884_v29  ;;  %3639 = vmatprep.mubr.msk.bf16.mxu0 %vm3771_vm10, %v3769_v5 }
 0x40f   :  { %3625 = vmatprep.subr.bf16.mxu0 %v3769_v5  ;;  %v2880_v63 = vpack.c.bf16 %v2852_v58, %v2851_v62 }
 0x412   :  { %3626 = vmatpush3.bf16.msra.mxu0 %v2883_v48 }
 0x413   :  { %3627 = vmatprep.subr.bf16.mxu0 %v3769_v5 }
 0x416   :  { %3628 = vmatpush3.bf16.msra.mxu0 %v2882_v20 }
 0x417   :  { %3629 = vmatprep.subr.bf16.mxu0 %v3769_v5 }
 0x41a   :  { %3630 = vmatpush3.bf16.msra.mxu0 %v2881_v60 }
 0x41b   :  { %3631 = vmatprep.subr.bf16.mxu0 %v3769_v5 }
 0x41e   :  { %3632 = vmatpush3.bf16.msra.mxu0 %v2880_v63 }
 0x41f   :  { %3633 = vmatprep.subr.bf16.mxu0 %v3769_v5 }
 0x422   :  { %3634 = vmatpush3.bf16.msra.mxu0 %v2879_v16 }
 0x423   :  { %3635 = vmatprep.subr.bf16.mxu0 %v3769_v5 }
 0x426   :  { %3636 = vmatpush3.bf16.msra.mxu0 %v2878_v3 }
 0x427   :  { %3637 = vmatprep.subr.bf16.mxu0 %v3769_v5 }
 0x42a   :  { %3638 = vmatpush3.bf16.msra.mxu0 %v2877_v19 }
 0x42b   :  { %3643 = vmatprep.subr.bf16.mxu0 %v3769_v5 }
 0x42d   :  { %3640 = vmatmul.mubr.bf16.vlgmr.msra.gmra.mxu0 %v5251_v30  ;;  %v3734_v30 = vld [vmem:[%s5379_s4 + $0x20] sm:$0xff]  }
 0x42e   :  { %3644 = vmatpush3.bf16.msra.mxu0 %v3731_v11  ;;  %3659 = vmatprep.mubr.msk.bf16.mxu0 %vm3771_vm10, %v3769_v5 }
 0x42f   :  { %3645 = vmatprep.subr.bf16.mxu0 %v3769_v5 }
 0x432   :  { %3646 = vmatpush3.bf16.msra.mxu0 %v3732_v4 }
 0x433   :  { %3647 = vmatprep.subr.bf16.mxu0 %v3769_v5 }
 0x436   :  { %3648 = vmatpush3.bf16.msra.mxu0 %v3733_v10 }
 0x437   :  { %3649 = vmatprep.subr.bf16.mxu0 %v3769_v5 }
 0x43a   :  { %3650 = vmatpush3.bf16.msra.mxu0 %v3734_v30 }
 0x43b   :  { %3651 = vmatprep.subr.bf16.mxu0 %v3769_v5 }
 0x43e   :  { %3652 = vmatpush3.bf16.msra.mxu0 %v3735_v12 }
 0x43f   :  { %3653 = vmatprep.subr.bf16.mxu0 %v3769_v5 }
 0x442   :  { %3654 = vmatpush3.bf16.msra.mxu0 %v3736_v14 }
 0x443   :  { %3655 = vmatprep.subr.bf16.mxu0 %v3769_v5 }
 0x446   :  { %3656 = vmatpush3.bf16.msra.mxu0 %v3737_v49 }
 0x447   :  { %3657 = vmatprep.subr.bf16.mxu0 %v3769_v5 }
 0x44a   :  { %3658 = vmatpush3.bf16.msra.mxu0 %v3738_v61 }
 0x4cd   :  { %v3339_v15 = vpop.f32.mrf.mxu0 }
 0x4cf   :  { %v3340_v17 = vpop.f32.mrf.mxu0 }
 0x4d0   :  { %v3341_v7 = vadd.f32 %v3340_v17, %v3339_v15 }
 0x4d1   :  { %v3342_v26 = vpop.f32.mrf.mxu0 }
 0x4d3   :  { %v3343_v21 = vpop.f32.mrf.mxu0 }
 0x4ed   :  { %v2959_v1 = vpop.f32.mrf.mxu0 }
 0x4ee   :  { %v2960_v31 = vadd.f32 %v3341_v7, %v2959_v1 }
 0x4ef   :  { %v3641_v24 = vpop.f32.mrf.mxu0 }
 0x4f0   :  { %v2966_v27 = vrot.slane %v2960_v31, 7 }
 0x4f1   :  { %v2962_v32 = vpop.f32.mrf.mxu0 }
 0x4f2   :  { %v2969_v54 = vsel %vm2968_vm11, %v5278_v44, %v2966_v27 }
 0x4f3   :  { %v2970_v34 = vmul.f32 0.00390625, %v2969_v54  ;;  %v3642_v5 = vpop.f32.mrf.mxu0 }
 0x4f5   :  { %v2971_v40 = vpack.c.bf16 %v2970_v34, %v2970_v34 }
 0x4f7   :  { %3660 = vmatmul.mubr.bf16.vlgmr.msra.gmra.mxu0 %v2971_v40 }
 0x5b7   :  { %v3077_v43 = vpop.f32.mrf.mxu0 }
 0x5b8   :  { %v3078_v45 = vadd.f32 %v3163_v41, %v3077_v43 }
 0x5b9   :  { %v3661_v38 = vpop.f32.mrf.mxu0 }
 0x5ba   :  { %3083 = vst [vmem:[#allocation3] sm:$0x3] %v3078_v45 }
 0x5bb   :  { %v3080_v23 = vpop.f32.mrf.mxu0 }
 0x5bc   :  { %3758 = shalt.err (!%p3755_p4)
}
 0x5bd   :  { %3093 = dma.vmem_to_hbm [thread:$0]  %s3091_s30, 32, %s5381_s6, [#allocation4]   ;;  %v3662_v44 = vpop.f32.mrf.mxu0 }
 0x5be   :  { %3767 = dma.done.wait [#allocation4], 32  }
 0x5bf   :  { %3768 = vsyncadd [#allocation4], 4294967264 }
 0x5c0   :  { %3097 = vsyncpa [#allocation4], 1 }

</bundles_post_ra>
